<compile_context>
chip_gen: v7x
topology: tpu7x:2x2x1
jax: 0.10.0
libtpu: 0.0.40
codegen_flags: <defaults>
</compile_context>

<pallas_src>
import functools

import jax
import jax.numpy as jnp
from jax.experimental import pallas as pl
from jax.experimental.pallas import tpu as pltpu

LN_EPS = 1e-5      # F.layer_norm / nn.LayerNorm default eps
L2_EPS = 1e-12     # F.normalize default eps


# ----------------------------- in-kernel helpers -----------------------------

def _layernorm(x, w, b):
    """F.layer_norm over the last dim (biased variance, eps inside sqrt)."""
    mu = jnp.mean(x, axis=-1, keepdims=True)
    xc = x - mu
    var = jnp.mean(xc * xc, axis=-1, keepdims=True)
    return xc * jax.lax.rsqrt(var + LN_EPS) * w + b


def _erf(x):
    # float32-accurate rational approximation of erf (Numerical Recipes 6.2.2).
    # TODO(synk): replace with lax.erf once Mosaic exposes a native erf lowering.
    a = jnp.abs(x)
    t = pl.reciprocal(1.0 + 0.5 * a, approx=True)        # EUP slot, ~free
    poly = -1.26551223 + t * (1.00002368 + t * (0.37409196 + t * (0.09678418 +
           t * (-0.18628806 + t * (0.27886807 + t * (-1.13520398 + t * (1.48851587 +
           t * (-0.82215223 + t * 0.17087277))))))))
    tau = t * jnp.exp(-a * a + poly)
    return jnp.where(x >= 0.0, 1.0 - tau, tau - 1.0)


def _gelu_exact(x):
    # matches F.gelu(approximate='none') = 0.5*x*(1+erf(x/sqrt(2)))
    return 0.5 * x * (1.0 + _erf(x * 0.7071067811865476))


# --------------------------------- kernel ------------------------------------

def _transformer_kernel(x_ref, vecs_ref, wq_ref, wkv_ref, wo_ref,
                        w1x_ref, w1g_ref, w2_ref, hmask_ref, gout_ref,
                        o_ref, act_ref, attn_ref, *, heads, dim_head, dim):
    layer = pl.program_id(1)
    bs, n, _ = x_ref.shape
    m = bs * n
    hdh = heads * dim_head

    # First layer for this batch block: seed the resident activation from x.
    @pl.when(layer == 0)
    def _():
        act_ref[...] = x_ref[...].reshape(m, dim)

    x = act_ref[...]                                        # (M, D) f32

    vec = vecs_ref[0]                                       # (8, Wv) f32
    g1 = vec[0:1, :dim]                                     # attn LN gamma
    g2 = vec[1:2, :dim]                                     # ff LN weight
    b2 = vec[2:3, :dim]                                     # ff LN bias
    qs = vec[3:4, :hdh]                                     # tiled q_scale * attn-scale
    ks = vec[4:5, :hdh]                                     # tiled k_scale

    # ------------------ self-attention + fused residual ------------------
    # NOTE: K/V come from the un-normed input, Q from the normed input
    # (matches the reference binding order of kv_input vs. x = self.norm(x)).
    xn_q = _layernorm(x, g1, 0.0)
    q_all = jnp.dot(xn_q.astype(jnp.bfloat16), wq_ref[0],
                    preferred_element_type=jnp.float32)     # (M, H*Dh)
    kv_all = jnp.dot(x.astype(jnp.bfloat16), wkv_ref[0],
                     preferred_element_type=jnp.float32)    # (M, 2*H*Dh)
    k_all = kv_all[:, :hdh]
    v_all = kv_all[:, hdh:]

    # Per-head l2-norm without sub-128-lane slices: the block-diagonal head
    # mask matmul gives every lane its own head's sum of squares (MXU slot).
    hmask = hmask_ref[...]                                  # (H*Dh, H*Dh) f32
    ss_q = jnp.dot(q_all * q_all, hmask, preferred_element_type=jnp.float32)
    ss_k = jnp.dot(k_all * k_all, hmask, preferred_element_type=jnp.float32)
    qn = q_all * jax.lax.rsqrt(jnp.maximum(ss_q, L2_EPS * L2_EPS)) * qs
    kn = k_all * jax.lax.rsqrt(jnp.maximum(ss_k, L2_EPS * L2_EPS)) * ks

    qn3 = qn.reshape(bs, n, hdh).astype(jnp.bfloat16)
    kn3 = kn.reshape(bs, n, hdh).astype(jnp.bfloat16)
    v3 = v_all.reshape(bs, n, hdh).astype(jnp.bfloat16)

    # TODO(synk): flash-style KV tiling for large N; full (N,N) sim is fine here.
    for h in range(heads):                                  # static, unrolled
        lo, hi = h * dim_head, (h + 1) * dim_head
        sim = jnp.einsum('bid,bjd->bij', qn3[:, :, lo:hi], kn3[:, :, lo:hi],
                         preferred_element_type=jnp.float32)    # (Bs, N, N)
        mx = jnp.max(sim, axis=-1, keepdims=True)
        e = jnp.exp(sim - mx)
        attn = e * pl.reciprocal(jnp.sum(e, axis=-1, keepdims=True), approx=True)
        # write this head's output straight into its lane slot (bounds live range)
        attn_ref[:, :, lo:hi] = jnp.einsum(
            'bij,bjd->bid', attn.astype(jnp.bfloat16), v3[:, :, lo:hi],
            preferred_element_type=jnp.float32)

    out_cat = attn_ref[...].reshape(m, hdh)
    x = x + jnp.dot(out_cat.astype(jnp.bfloat16), wo_ref[0],
                    preferred_element_type=jnp.float32)     # fused residual

    # ---------------- feed-forward (GEGLU) + fused residual ----------------
    xn_f = _layernorm(x, g2, b2).astype(jnp.bfloat16)
    xp = jnp.dot(xn_f, w1x_ref[0], preferred_element_type=jnp.float32)
    gate = jnp.dot(xn_f, w1g_ref[0], preferred_element_type=jnp.float32)
    act = (_gelu_exact(gate) * xp).astype(jnp.bfloat16)
    x = x + jnp.dot(act, w2_ref[0], preferred_element_type=jnp.float32)

    act_ref[...] = x                                        # carry to next layer

    # Last layer: apply the output LayerNorm and emit.
    @pl.when(layer == pl.num_programs(1) - 1)
    def _():
        o_ref[...] = _layernorm(x, gout_ref[...], 0.0).reshape(bs, n, dim)


# ------------------------------ pallas wrapper --------------------------------

def transformer_forward(x, p, *, heads, dim_head, n_splits=1,
                        vmem_limit_bytes=64 * 1024 * 1024):
    B, N, D = x.shape
    depth = p["wq"].shape[0]
    hdh = heads * dim_head
    ffp = p["w1x"].shape[-1]
    assert B % n_splits == 0
    bs = B // n_splits
    # TODO(synk): on v7x set n_splits=2 so both TensorCores run (parallel axis).

    kernel = functools.partial(_transformer_kernel, heads=heads,
                               dim_head=dim_head, dim=D)

    def wspec(shape):
        """Per-layer parameter spec: leading depth axis indexed by the layer."""
        nd = len(shape)
        return pl.BlockSpec((1,) + tuple(shape[1:]),
                            lambda s, l, _nd=nd: (l,) + (0,) * (_nd - 1))

    # Advisory cost estimate (MXU flops + exp count + weight/activation bytes).
    M = B * N
    flops_layer = (2 * M * D * hdh                # q proj
                   + 2 * M * D * 2 * hdh          # kv proj
                   + 2 * 2 * M * hdh * hdh        # head-mask sum-of-squares
                   + 2 * 2 * B * heads * N * N * dim_head  # sim + attn@v
                   + 2 * M * hdh * D              # out proj
                   + 6 * M * D * ffp)             # GEGLU FF
    trans_layer = B * heads * N * N + M * ffp
    w_bytes = 2 * depth * (D * hdh + D * 2 * hdh + hdh * D + 3 * D * ffp)
    cost = pl.CostEstimate(flops=int(depth * flops_layer),
                           transcendentals=int(depth * trans_layer),
                           bytes_accessed=int(w_bytes + 2 * 4 * B * N * D))

    return pl.pallas_call(
        kernel,
        out_shape=jax.ShapeDtypeStruct((B, N, D), jnp.float32),
        grid=(n_splits, depth),
        in_specs=[
            pl.BlockSpec((bs, N, D), lambda s, l: (s, 0, 0)),         # x (read at l==0)
            wspec(p["vecs"].shape),                                   # packed small vecs
            wspec(p["wq"].shape),                                     # (depth, D, H*Dh)
            wspec(p["wkv"].shape),                                    # (depth, D, 2*H*Dh)
            wspec(p["wo"].shape),                                     # (depth, H*Dh, D)
            wspec(p["w1x"].shape),                                    # (depth, D, ffp)
            wspec(p["w1g"].shape),                                    # (depth, D, ffp)
            wspec(p["w2"].shape),                                     # (depth, ffp, D)
            pl.BlockSpec(tuple(p["hmask"].shape), lambda s, l: (0, 0)),   # head mask
            pl.BlockSpec(tuple(p["gout"].shape), lambda s, l: (0, 0)),    # out LN gamma
        ],
        out_specs=pl.BlockSpec((bs, N, D), lambda s, l: (s, 0, 0)),
        scratch_shapes=[pltpu.VMEM((bs * N, D), jnp.float32),         # resident activation
                        pltpu.VMEM((bs, N, hdh), jnp.float32)],       # attn head outputs
        compiler_params=pltpu.CompilerParams(
            dimension_semantics=("parallel", "arbitrary"),
            vmem_limit_bytes=vmem_limit_bytes),
        cost_estimate=cost,
    )(x, p["vecs"], p["wq"], p["wkv"], p["wo"], p["w1x"], p["w1g"], p["w2"],
      p["hmask"], p["gout"])


# ------------------------------ parameter setup --------------------------------

def init_params(key, *, dim, depth, heads, dim_head, ff_mult, scale=8.0):
    hdh = heads * dim_head
    ff_inner = int(ff_mult * (2 / 3) * dim)       # exactly as FeedForward() computes it
    ffp = ((ff_inner + 127) // 128) * 128         # lane-dense padding (zero-filled)

    def w(k, shape):
        # Linear weights stored (in, out); heads packed head-major, matching
        # rearrange('b n (h d) -> b h n d').  bf16 for MXU / HBM traffic.
        return (jax.random.normal(k, shape, jnp.float32) * 0.05).astype(jnp.bfloat16)

    wq, wkv, wo, w1x, w1g, w2 = [], [], [], [], [], []
    for _ in range(depth):
        key, k1, k2, k3, k4, k5, k6 = jax.random.split(key, 7)
        wq.append(w(k1, (dim, hdh)))                          # to_q
        wkv.append(w(k2, (dim, 2 * hdh)))                     # to_kv ([K | V])
        wo.append(w(k3, (hdh, dim)))                          # to_out
        w1x.append(jnp.pad(w(k4, (dim, ff_inner)),            # GEGLU "x" half
                           ((0, 0), (0, ffp - ff_inner))))
        w1g.append(jnp.pad(w(k5, (dim, ff_inner)),            # GEGLU gate half
                           ((0, 0), (0, ffp - ff_inner))))
        w2.append(jnp.pad(w(k6, (ff_inner, dim)),             # Linear(inner, dim)
                          ((0, ffp - ff_inner), (0, 0))))     # padded rows MUST be zero

    # Packed per-layer small vectors: row 0=attn-LN gamma, 1=ff-LN weight,
    # 2=ff-LN bias, 3=tiled q_scale*attn_scale, 4=tiled k_scale.
    wv = max(dim, hdh)
    vecs = jnp.zeros((depth, 8, wv), jnp.float32)
    g1 = jnp.ones((dim,), jnp.float32)
    g2 = jnp.ones((dim,), jnp.float32)
    b2 = jnp.zeros((dim,), jnp.float32)
    qs_full = jnp.tile(jnp.ones((dim_head,), jnp.float32), heads) * scale
    ks_full = jnp.tile(jnp.ones((dim_head,), jnp.float32), heads)
    for l in range(depth):
        vecs = vecs.at[l, 0, :dim].set(g1)
        vecs = vecs.at[l, 1, :dim].set(g2)
        vecs = vecs.at[l, 2, :dim].set(b2)
        vecs = vecs.at[l, 3, :hdh].set(qs_full)
        vecs = vecs.at[l, 4, :hdh].set(ks_full)

    # Block-diagonal head mask for the per-head sum-of-squares matmul.
    hmask = jnp.kron(jnp.eye(heads, dtype=jnp.float32),
                     jnp.ones((dim_head, dim_head), jnp.float32))

    return dict(
        vecs=vecs,
        wq=jnp.stack(wq), wkv=jnp.stack(wkv), wo=jnp.stack(wo),
        w1x=jnp.stack(w1x), w1g=jnp.stack(w1g), w2=jnp.stack(w2),
        hmask=hmask,
        gout=jnp.ones((1, dim), jnp.float32),                 # norm_out gamma
    )


# ----------------------------------- main --------------------------------------

if __name__ == "__main__":
    # Small but lane-dense config: D = heads*dim_head = 128.
    B, N, D = 2, 16, 128
    heads, dim_head, depth, ff_mult = 4, 32, 2, 4

    key = jax.random.PRNGKey(0)
    kx, kp = jax.random.split(key)
    x = jax.random.normal(kx, (B, N, D), jnp.float32)

    params = init_params(kp, dim=D, depth=depth, heads=heads,
                         dim_head=dim_head, ff_mult=ff_mult)

    out = transformer_forward(x, params, heads=heads, dim_head=dim_head,
                              n_splits=1)
    jax.block_until_ready(out)
    assert out.shape == (B, N, D)
    print("KERNEL_OK")
</pallas_src>

<mosaic_0001>
module attributes {stable_mosaic.version = 11 : i64} {
  func.func @_transformer_kernel(%arg0: i32, %arg1: i32, %arg2: memref<2x16x128xf32, #tpu.memory_space<vmem>>, %arg3: memref<1x8x128xf32, #tpu.memory_space<vmem>>, %arg4: memref<1x128x128xbf16, #tpu.memory_space<vmem>>, %arg5: memref<1x128x256xbf16, #tpu.memory_space<vmem>>, %arg6: memref<1x128x128xbf16, #tpu.memory_space<vmem>>, %arg7: memref<1x128x384xbf16, #tpu.memory_space<vmem>>, %arg8: memref<1x128x384xbf16, #tpu.memory_space<vmem>>, %arg9: memref<1x384x128xbf16, #tpu.memory_space<vmem>>, %arg10: memref<128x128xf32, #tpu.memory_space<vmem>>, %arg11: memref<1x128xf32, #tpu.memory_space<vmem>>, %arg12: memref<2x16x128xf32, #tpu.memory_space<vmem>>, %arg13: memref<32x128xf32, #tpu.memory_space<vmem>>, %arg14: memref<2x16x128xf32, #tpu.memory_space<vmem>>) attributes {dimension_semantics = [#tpu.dimension_semantics<parallel>, #tpu.dimension_semantics<arbitrary>], iteration_bounds = array<i64: 1, 2>, scalar_prefetch = 0 : i64, scratch_operands = 2 : i64, tpu.core_type = #tpu.core_type<tc>, window_params = [{transform_indices = @transform_0, window_bounds = array<i64: 2, 16, 128>}, {transform_indices = @transform_1, window_bounds = array<i64: 1, 8, 128>}, {transform_indices = @transform_2, window_bounds = array<i64: 1, 128, 128>}, {transform_indices = @transform_3, window_bounds = array<i64: 1, 128, 256>}, {transform_indices = @transform_4, window_bounds = array<i64: 1, 128, 128>}, {transform_indices = @transform_5, window_bounds = array<i64: 1, 128, 384>}, {transform_indices = @transform_6, window_bounds = array<i64: 1, 128, 384>}, {transform_indices = @transform_7, window_bounds = array<i64: 1, 384, 128>}, {pipeline_mode = #tpu.pipeline_mode<synchronous>, transform_indices = @transform_8, window_bounds = array<i64: 128, 128>}, {pipeline_mode = #tpu.pipeline_mode<synchronous>, transform_indices = @transform_9, window_bounds = array<i64: 1, 128>}, {transform_indices = @transform_10, window_bounds = array<i64: 2, 16, 128>}]} {
    %c0_i32 = arith.constant 0 : i32
    %0 = arith.cmpi eq, %arg1, %c0_i32 : i32
    %1 = arith.extui %0 : i1 to i32
    %c0_i32_0 = arith.constant 0 : i32
    %2 = arith.cmpi ne, %1, %c0_i32_0 : i32
    scf.if %2 {
      %c0_95 = arith.constant 0 : index
      %c0_96 = arith.constant 0 : index
      %c0_97 = arith.constant 0 : index
      %230 = vector.load %arg2[%c0_95, %c0_96, %c0_97] : memref<2x16x128xf32, #tpu.memory_space<vmem>>, vector<2x16x128xf32>
      %231 = vector.shape_cast %230 : vector<2x16x128xf32> to vector<32x128xf32>
      %c0_98 = arith.constant 0 : index
      %c0_99 = arith.constant 0 : index
      %232 = vector.load %arg13[%c0_98, %c0_99] : memref<32x128xf32, #tpu.memory_space<vmem>>, vector<32x128xf32>
      tpu.vector_store %arg13[%c0_98, %c0_99], %231 {strides = array<i32>} : memref<32x128xf32, #tpu.memory_space<vmem>>, vector<32x128xf32>,
    } else {
    }
    %c0 = arith.constant 0 : index
    %c0_1 = arith.constant 0 : index
    %3 = vector.load %arg13[%c0, %c0_1] : memref<32x128xf32, #tpu.memory_space<vmem>>, vector<32x128xf32>
    %c0_2 = arith.constant 0 : index
    %c0_3 = arith.constant 0 : index
    %c0_4 = arith.constant 0 : index
    %4 = vector.load %arg3[%c0_2, %c0_3, %c0_4] : memref<1x8x128xf32, #tpu.memory_space<vmem>>, vector<1x8x128xf32>
    %5 = vector.shape_cast %4 : vector<1x8x128xf32> to vector<8x128xf32>
    %6 = vector.extract_strided_slice %5 {offsets = [0, 0], sizes = [1, 128], strides = [1, 1]} : vector<8x128xf32> to vector<1x128xf32>
    %7 = vector.extract_strided_slice %5 {offsets = [1, 0], sizes = [1, 128], strides = [1, 1]} : vector<8x128xf32> to vector<1x128xf32>
    %8 = vector.extract_strided_slice %5 {offsets = [2, 0], sizes = [1, 128], strides = [1, 1]} : vector<8x128xf32> to vector<1x128xf32>
    %9 = vector.extract_strided_slice %5 {offsets = [3, 0], sizes = [1, 128], strides = [1, 1]} : vector<8x128xf32> to vector<1x128xf32>
    %10 = vector.extract_strided_slice %5 {offsets = [4, 0], sizes = [1, 128], strides = [1, 1]} : vector<8x128xf32> to vector<1x128xf32>
    %cst = arith.constant dense<0.000000e+00> : vector<32xf32>
    %11 = vector.multi_reduction <add>, %3, %cst [1] : vector<32x128xf32> to vector<32xf32>
    %12 = vector.shape_cast %11 : vector<32xf32> to vector<32x1xf32>
    %cst_5 = arith.constant 1.280000e+02 : f32
    %13 = vector.broadcast %cst_5 : f32 to vector<32x1xf32>
    %14 = arith.divf %12, %13 : vector<32x1xf32>
    %15 = vector.broadcast %14 : vector<32x1xf32> to vector<32x128xf32>
    %16 = arith.subf %3, %15 : vector<32x128xf32>
    %17 = arith.mulf %16, %16 : vector<32x128xf32>
    %cst_6 = arith.constant dense<0.000000e+00> : vector<32xf32>
    %18 = vector.multi_reduction <add>, %17, %cst_6 [1] : vector<32x128xf32> to vector<32xf32>
    %19 = vector.shape_cast %18 : vector<32xf32> to vector<32x1xf32>
    %cst_7 = arith.constant 1.280000e+02 : f32
    %20 = vector.broadcast %cst_7 : f32 to vector<32x1xf32>
    %21 = arith.divf %19, %20 : vector<32x1xf32>
    %cst_8 = arith.constant 9.99999974E-6 : f32
    %22 = vector.broadcast %cst_8 : f32 to vector<32x1xf32>
    %23 = arith.addf %21, %22 : vector<32x1xf32>
    %24 = math.rsqrt %23 : vector<32x1xf32>
    %25 = vector.broadcast %24 : vector<32x1xf32> to vector<32x128xf32>
    %26 = arith.mulf %16, %25 : vector<32x128xf32>
    %27 = vector.broadcast %6 : vector<1x128xf32> to vector<32x128xf32>
    %28 = arith.mulf %26, %27 : vector<32x128xf32>
    %cst_9 = arith.constant 0.000000e+00 : f32
    %29 = vector.broadcast %cst_9 : f32 to vector<32x128xf32>
    %30 = arith.addf %28, %29 : vector<32x128xf32>
    %31 = arith.truncf %30 : vector<32x128xf32> to vector<32x128xbf16>
    %c0_10 = arith.constant 0 : index
    %c0_11 = arith.constant 0 : index
    %c0_12 = arith.constant 0 : index
    %32 = vector.load %arg4[%c0_10, %c0_11, %c0_12] : memref<1x128x128xbf16, #tpu.memory_space<vmem>>, vector<1x128x128xbf16>
    %33 = vector.shape_cast %32 : vector<1x128x128xbf16> to vector<128x128xbf16>
    %cst_13 = arith.constant dense<0.000000e+00> : vector<32x128xf32>
    %34 = tpu.matmul %31, %33, %cst_13 {dimension_numbers = #tpu.dot_dimension_numbers<[1], [0], [0], [1], [0, 0, 1, 1], [], []>} : vector<32x128xbf16>, vector<128x128xbf16>, vector<32x128xf32> -> vector<32x128xf32>
    %35 = arith.truncf %3 : vector<32x128xf32> to vector<32x128xbf16>
    %c0_14 = arith.constant 0 : index
    %c0_15 = arith.constant 0 : index
    %c0_16 = arith.constant 0 : index
    %36 = vector.load %arg5[%c0_14, %c0_15, %c0_16] : memref<1x128x256xbf16, #tpu.memory_space<vmem>>, vector<1x128x256xbf16>
    %37 = vector.shape_cast %36 : vector<1x128x256xbf16> to vector<128x256xbf16>
    %cst_17 = arith.constant dense<0.000000e+00> : vector<32x256xf32>
    %38 = tpu.matmul %35, %37, %cst_17 {dimension_numbers = #tpu.dot_dimension_numbers<[1], [0], [0], [1], [0, 0, 1, 1], [], []>} : vector<32x128xbf16>, vector<128x256xbf16>, vector<32x256xf32> -> vector<32x256xf32>
    %39 = vector.extract_strided_slice %38 {offsets = [0, 0], sizes = [32, 128], strides = [1, 1]} : vector<32x256xf32> to vector<32x128xf32>
    %40 = vector.extract_strided_slice %38 {offsets = [0, 128], sizes = [32, 128], strides = [1, 1]} : vector<32x256xf32> to vector<32x128xf32>
    %c0_18 = arith.constant 0 : index
    %c0_19 = arith.constant 0 : index
    %41 = vector.load %arg10[%c0_18, %c0_19] : memref<128x128xf32, #tpu.memory_space<vmem>>, vector<128x128xf32>
    %42 = arith.mulf %34, %34 : vector<32x128xf32>
    %cst_20 = arith.constant dense<0.000000e+00> : vector<32x128xf32>
    %43 = tpu.matmul %42, %41, %cst_20 {dimension_numbers = #tpu.dot_dimension_numbers<[1], [0], [0], [1], [0, 0, 1, 1], [], []>} : vector<32x128xf32>, vector<128x128xf32>, vector<32x128xf32> -> vector<32x128xf32>
    %44 = arith.mulf %39, %39 : vector<32x128xf32>
    %cst_21 = arith.constant dense<0.000000e+00> : vector<32x128xf32>
    %45 = tpu.matmul %44, %41, %cst_21 {dimension_numbers = #tpu.dot_dimension_numbers<[1], [0], [0], [1], [0, 0, 1, 1], [], []>} : vector<32x128xf32>, vector<128x128xf32>, vector<32x128xf32> -> vector<32x128xf32>
    %cst_22 = arith.constant 1.000000e-24 : f32
    %46 = vector.broadcast %cst_22 : f32 to vector<32x128xf32>
    %47 = arith.maximumf %43, %46 : vector<32x128xf32>
    %48 = math.rsqrt %47 : vector<32x128xf32>
    %49 = arith.mulf %34, %48 : vector<32x128xf32>
    %50 = vector.broadcast %9 : vector<1x128xf32> to vector<32x128xf32>
    %51 = arith.mulf %49, %50 : vector<32x128xf32>
    %cst_23 = arith.constant 1.000000e-24 : f32
    %52 = vector.broadcast %cst_23 : f32 to vector<32x128xf32>
    %53 = arith.maximumf %45, %52 : vector<32x128xf32>
    %54 = math.rsqrt %53 : vector<32x128xf32>
    %55 = arith.mulf %39, %54 : vector<32x128xf32>
    %56 = vector.broadcast %10 : vector<1x128xf32> to vector<32x128xf32>
    %57 = arith.mulf %55, %56 : vector<32x128xf32>
    %58 = vector.shape_cast %51 : vector<32x128xf32> to vector<2x16x128xf32>
    %59 = arith.truncf %58 : vector<2x16x128xf32> to vector<2x16x128xbf16>
    %60 = vector.shape_cast %57 : vector<32x128xf32> to vector<2x16x128xf32>
    %61 = arith.truncf %60 : vector<2x16x128xf32> to vector<2x16x128xbf16>
    %62 = vector.shape_cast %40 : vector<32x128xf32> to vector<2x16x128xf32>
    %63 = arith.truncf %62 : vector<2x16x128xf32> to vector<2x16x128xbf16>
    %64 = vector.extract_strided_slice %59 {offsets = [0, 0, 0], sizes = [2, 16, 32], strides = [1, 1, 1]} : vector<2x16x128xbf16> to vector<2x16x32xbf16>
    %65 = vector.extract_strided_slice %61 {offsets = [0, 0, 0], sizes = [2, 16, 32], strides = [1, 1, 1]} : vector<2x16x128xbf16> to vector<2x16x32xbf16>
    "tpu.trace_start"() <{level = 10 : i32, message = "bid,bjd->bij"}> : () -> ()
    %cst_24 = arith.constant dense<0.000000e+00> : vector<2x16x16xf32>
    %66 = tpu.matmul %64, %65, %cst_24 {dimension_numbers = #tpu.dot_dimension_numbers<[2], [2], [1], [1], [0, 0, 0, 1, 1, 1], [0], [0]>} : vector<2x16x32xbf16>, vector<2x16x32xbf16>, vector<2x16x16xf32> -> vector<2x16x16xf32>
    "tpu.trace_stop"() : () -> ()
    %cst_25 = arith.constant dense<0xFF800000> : vector<2x16xf32>
    %67 = vector.multi_reduction <maximumf>, %66, %cst_25 [2] : vector<2x16x16xf32> to vector<2x16xf32>
    %68 = vector.shape_cast %67 : vector<2x16xf32> to vector<2x16x1xf32>
    %69 = vector.broadcast %68 : vector<2x16x1xf32> to vector<2x16x16xf32>
    %70 = arith.subf %66, %69 : vector<2x16x16xf32>
    %71 = math.exp %70 : vector<2x16x16xf32>
    %cst_26 = arith.constant dense<0.000000e+00> : vector<2x16xf32>
    %72 = vector.multi_reduction <add>, %71, %cst_26 [2] : vector<2x16x16xf32> to vector<2x16xf32>
    %73 = vector.shape_cast %72 : vector<2x16xf32> to vector<2x16x1xf32>
    %74 = tpu.reciprocal %73 {approx = true} : vector<2x16x1xf32> -> vector<2x16x1xf32>
    %75 = vector.broadcast %74 : vector<2x16x1xf32> to vector<2x16x16xf32>
    %76 = arith.mulf %71, %75 : vector<2x16x16xf32>
    %77 = arith.truncf %76 : vector<2x16x16xf32> to vector<2x16x16xbf16>
    %78 = vector.extract_strided_slice %63 {offsets = [0, 0, 0], sizes = [2, 16, 32], strides = [1, 1, 1]} : vector<2x16x128xbf16> to vector<2x16x32xbf16>
    "tpu.trace_start"() <{level = 10 : i32, message = "bij,bjd->bid"}> : () -> ()
    %cst_27 = arith.constant dense<0.000000e+00> : vector<2x16x32xf32>
    %79 = tpu.matmul %77, %78, %cst_27 {dimension_numbers = #tpu.dot_dimension_numbers<[2], [1], [1], [2], [0, 0, 0, 1, 1, 2], [0], [0]>} : vector<2x16x16xbf16>, vector<2x16x32xbf16>, vector<2x16x32xf32> -> vector<2x16x32xf32>
    "tpu.trace_stop"() : () -> ()
    %c0_28 = arith.constant 0 : index
    %c0_29 = arith.constant 0 : index
    %c0_30 = arith.constant 0 : index
    %80 = vector.load %arg14[%c0_28, %c0_29, %c0_30] : memref<2x16x128xf32, #tpu.memory_space<vmem>>, vector<2x16x32xf32>
    tpu.vector_store %arg14[%c0_28, %c0_29, %c0_30], %79 {strides = array<i32>} : memref<2x16x128xf32, #tpu.memory_space<vmem>>, vector<2x16x32xf32>,
    %81 = vector.extract_strided_slice %59 {offsets = [0, 0, 32], sizes = [2, 16, 32], strides = [1, 1, 1]} : vector<2x16x128xbf16> to vector<2x16x32xbf16>
    %82 = vector.extract_strided_slice %61 {offsets = [0, 0, 32], sizes = [2, 16, 32], strides = [1, 1, 1]} : vector<2x16x128xbf16> to vector<2x16x32xbf16>
    "tpu.trace_start"() <{level = 10 : i32, message = "bid,bjd->bij"}> : () -> ()
    %cst_31 = arith.constant dense<0.000000e+00> : vector<2x16x16xf32>
    %83 = tpu.matmul %81, %82, %cst_31 {dimension_numbers = #tpu.dot_dimension_numbers<[2], [2], [1], [1], [0, 0, 0, 1, 1, 1], [0], [0]>} : vector<2x16x32xbf16>, vector<2x16x32xbf16>, vector<2x16x16xf32> -> vector<2x16x16xf32>
    "tpu.trace_stop"() : () -> ()
    %cst_32 = arith.constant dense<0xFF800000> : vector<2x16xf32>
    %84 = vector.multi_reduction <maximumf>, %83, %cst_32 [2] : vector<2x16x16xf32> to vector<2x16xf32>
    %85 = vector.shape_cast %84 : vector<2x16xf32> to vector<2x16x1xf32>
    %86 = vector.broadcast %85 : vector<2x16x1xf32> to vector<2x16x16xf32>
    %87 = arith.subf %83, %86 : vector<2x16x16xf32>
    %88 = math.exp %87 : vector<2x16x16xf32>
    %cst_33 = arith.constant dense<0.000000e+00> : vector<2x16xf32>
    %89 = vector.multi_reduction <add>, %88, %cst_33 [2] : vector<2x16x16xf32> to vector<2x16xf32>
    %90 = vector.shape_cast %89 : vector<2x16xf32> to vector<2x16x1xf32>
    %91 = tpu.reciprocal %90 {approx = true} : vector<2x16x1xf32> -> vector<2x16x1xf32>
    %92 = vector.broadcast %91 : vector<2x16x1xf32> to vector<2x16x16xf32>
    %93 = arith.mulf %88, %92 : vector<2x16x16xf32>
    %94 = arith.truncf %93 : vector<2x16x16xf32> to vector<2x16x16xbf16>
    %95 = vector.extract_strided_slice %63 {offsets = [0, 0, 32], sizes = [2, 16, 32], strides = [1, 1, 1]} : vector<2x16x128xbf16> to vector<2x16x32xbf16>
    "tpu.trace_start"() <{level = 10 : i32, message = "bij,bjd->bid"}> : () -> ()
    %cst_34 = arith.constant dense<0.000000e+00> : vector<2x16x32xf32>
    %96 = tpu.matmul %94, %95, %cst_34 {dimension_numbers = #tpu.dot_dimension_numbers<[2], [1], [1], [2], [0, 0, 0, 1, 1, 2], [0], [0]>} : vector<2x16x16xbf16>, vector<2x16x32xbf16>, vector<2x16x32xf32> -> vector<2x16x32xf32>
    "tpu.trace_stop"() : () -> ()
    %c0_35 = arith.constant 0 : index
    %c0_36 = arith.constant 0 : index
    %c32 = arith.constant 32 : index
    %97 = vector.load %arg14[%c0_35, %c0_36, %c32] : memref<2x16x128xf32, #tpu.memory_space<vmem>>, vector<2x16x32xf32>
    tpu.vector_store %arg14[%c0_35, %c0_36, %c32], %96 {strides = array<i32>} : memref<2x16x128xf32, #tpu.memory_space<vmem>>, vector<2x16x32xf32>,
    %98 = vector.extract_strided_slice %59 {offsets = [0, 0, 64], sizes = [2, 16, 32], strides = [1, 1, 1]} : vector<2x16x128xbf16> to vector<2x16x32xbf16>
    %99 = vector.extract_strided_slice %61 {offsets = [0, 0, 64], sizes = [2, 16, 32], strides = [1, 1, 1]} : vector<2x16x128xbf16> to vector<2x16x32xbf16>
    "tpu.trace_start"() <{level = 10 : i32, message = "bid,bjd->bij"}> : () -> ()
    %cst_37 = arith.constant dense<0.000000e+00> : vector<2x16x16xf32>
    %100 = tpu.matmul %98, %99, %cst_37 {dimension_numbers = #tpu.dot_dimension_numbers<[2], [2], [1], [1], [0, 0, 0, 1, 1, 1], [0], [0]>} : vector<2x16x32xbf16>, vector<2x16x32xbf16>, vector<2x16x16xf32> -> vector<2x16x16xf32>
    "tpu.trace_stop"() : () -> ()
    %cst_38 = arith.constant dense<0xFF800000> : vector<2x16xf32>
    %101 = vector.multi_reduction <maximumf>, %100, %cst_38 [2] : vector<2x16x16xf32> to vector<2x16xf32>
    %102 = vector.shape_cast %101 : vector<2x16xf32> to vector<2x16x1xf32>
    %103 = vector.broadcast %102 : vector<2x16x1xf32> to vector<2x16x16xf32>
    %104 = arith.subf %100, %103 : vector<2x16x16xf32>
    %105 = math.exp %104 : vector<2x16x16xf32>
    %cst_39 = arith.constant dense<0.000000e+00> : vector<2x16xf32>
    %106 = vector.multi_reduction <add>, %105, %cst_39 [2] : vector<2x16x16xf32> to vector<2x16xf32>
    %107 = vector.shape_cast %106 : vector<2x16xf32> to vector<2x16x1xf32>
    %108 = tpu.reciprocal %107 {approx = true} : vector<2x16x1xf32> -> vector<2x16x1xf32>
    %109 = vector.broadcast %108 : vector<2x16x1xf32> to vector<2x16x16xf32>
    %110 = arith.mulf %105, %109 : vector<2x16x16xf32>
    %111 = arith.truncf %110 : vector<2x16x16xf32> to vector<2x16x16xbf16>
    %112 = vector.extract_strided_slice %63 {offsets = [0, 0, 64], sizes = [2, 16, 32], strides = [1, 1, 1]} : vector<2x16x128xbf16> to vector<2x16x32xbf16>
    "tpu.trace_start"() <{level = 10 : i32, message = "bij,bjd->bid"}> : () -> ()
    %cst_40 = arith.constant dense<0.000000e+00> : vector<2x16x32xf32>
    %113 = tpu.matmul %111, %112, %cst_40 {dimension_numbers = #tpu.dot_dimension_numbers<[2], [1], [1], [2], [0, 0, 0, 1, 1, 2], [0], [0]>} : vector<2x16x16xbf16>, vector<2x16x32xbf16>, vector<2x16x32xf32> -> vector<2x16x32xf32>
    "tpu.trace_stop"() : () -> ()
    %c0_41 = arith.constant 0 : index
    %c0_42 = arith.constant 0 : index
    %c64 = arith.constant 64 : index
    %114 = vector.load %arg14[%c0_41, %c0_42, %c64] : memref<2x16x128xf32, #tpu.memory_space<vmem>>, vector<2x16x32xf32>
    tpu.vector_store %arg14[%c0_41, %c0_42, %c64], %113 {strides = array<i32>} : memref<2x16x128xf32, #tpu.memory_space<vmem>>, vector<2x16x32xf32>,
    %115 = vector.extract_strided_slice %59 {offsets = [0, 0, 96], sizes = [2, 16, 32], strides = [1, 1, 1]} : vector<2x16x128xbf16> to vector<2x16x32xbf16>
    %116 = vector.extract_strided_slice %61 {offsets = [0, 0, 96], sizes = [2, 16, 32], strides = [1, 1, 1]} : vector<2x16x128xbf16> to vector<2x16x32xbf16>
    "tpu.trace_start"() <{level = 10 : i32, message = "bid,bjd->bij"}> : () -> ()
    %cst_43 = arith.constant dense<0.000000e+00> : vector<2x16x16xf32>
    %117 = tpu.matmul %115, %116, %cst_43 {dimension_numbers = #tpu.dot_dimension_numbers<[2], [2], [1], [1], [0, 0, 0, 1, 1, 1], [0], [0]>} : vector<2x16x32xbf16>, vector<2x16x32xbf16>, vector<2x16x16xf32> -> vector<2x16x16xf32>
    "tpu.trace_stop"() : () -> ()
    %cst_44 = arith.constant dense<0xFF800000> : vector<2x16xf32>
    %118 = vector.multi_reduction <maximumf>, %117, %cst_44 [2] : vector<2x16x16xf32> to vector<2x16xf32>
    %119 = vector.shape_cast %118 : vector<2x16xf32> to vector<2x16x1xf32>
    %120 = vector.broadcast %119 : vector<2x16x1xf32> to vector<2x16x16xf32>
    %121 = arith.subf %117, %120 : vector<2x16x16xf32>
    %122 = math.exp %121 : vector<2x16x16xf32>
    %cst_45 = arith.constant dense<0.000000e+00> : vector<2x16xf32>
    %123 = vector.multi_reduction <add>, %122, %cst_45 [2] : vector<2x16x16xf32> to vector<2x16xf32>
    %124 = vector.shape_cast %123 : vector<2x16xf32> to vector<2x16x1xf32>
    %125 = tpu.reciprocal %124 {approx = true} : vector<2x16x1xf32> -> vector<2x16x1xf32>
    %126 = vector.broadcast %125 : vector<2x16x1xf32> to vector<2x16x16xf32>
    %127 = arith.mulf %122, %126 : vector<2x16x16xf32>
    %128 = arith.truncf %127 : vector<2x16x16xf32> to vector<2x16x16xbf16>
    %129 = vector.extract_strided_slice %63 {offsets = [0, 0, 96], sizes = [2, 16, 32], strides = [1, 1, 1]} : vector<2x16x128xbf16> to vector<2x16x32xbf16>
    "tpu.trace_start"() <{level = 10 : i32, message = "bij,bjd->bid"}> : () -> ()
    %cst_46 = arith.constant dense<0.000000e+00> : vector<2x16x32xf32>
    %130 = tpu.matmul %128, %129, %cst_46 {dimension_numbers = #tpu.dot_dimension_numbers<[2], [1], [1], [2], [0, 0, 0, 1, 1, 2], [0], [0]>} : vector<2x16x16xbf16>, vector<2x16x32xbf16>, vector<2x16x32xf32> -> vector<2x16x32xf32>
    "tpu.trace_stop"() : () -> ()
    %c0_47 = arith.constant 0 : index
    %c0_48 = arith.constant 0 : index
    %c96 = arith.constant 96 : index
    %131 = vector.load %arg14[%c0_47, %c0_48, %c96] : memref<2x16x128xf32, #tpu.memory_space<vmem>>, vector<2x16x32xf32>
    tpu.vector_store %arg14[%c0_47, %c0_48, %c96], %130 {strides = array<i32>} : memref<2x16x128xf32, #tpu.memory_space<vmem>>, vector<2x16x32xf32>,
    %c0_49 = arith.constant 0 : index
    %c0_50 = arith.constant 0 : index
    %c0_51 = arith.constant 0 : index
    %132 = vector.load %arg14[%c0_49, %c0_50, %c0_51] : memref<2x16x128xf32, #tpu.memory_space<vmem>>, vector<2x16x128xf32>
    %133 = vector.shape_cast %132 : vector<2x16x128xf32> to vector<32x128xf32>
    %134 = arith.truncf %133 : vector<32x128xf32> to vector<32x128xbf16>
    %c0_52 = arith.constant 0 : index
    %c0_53 = arith.constant 0 : index
    %c0_54 = arith.constant 0 : index
    %135 = vector.load %arg6[%c0_52, %c0_53, %c0_54] : memref<1x128x128xbf16, #tpu.memory_space<vmem>>, vector<1x128x128xbf16>
    %136 = vector.shape_cast %135 : vector<1x128x128xbf16> to vector<128x128xbf16>
    %cst_55 = arith.constant dense<0.000000e+00> : vector<32x128xf32>
    %137 = tpu.matmul %134, %136, %cst_55 {dimension_numbers = #tpu.dot_dimension_numbers<[1], [0], [0], [1], [0, 0, 1, 1], [], []>} : vector<32x128xbf16>, vector<128x128xbf16>, vector<32x128xf32> -> vector<32x128xf32>
    %138 = arith.addf %3, %137 : vector<32x128xf32>
    %cst_56 = arith.constant dense<0.000000e+00> : vector<32xf32>
    %139 = vector.multi_reduction <add>, %138, %cst_56 [1] : vector<32x128xf32> to vector<32xf32>
    %140 = vector.shape_cast %139 : vector<32xf32> to vector<32x1xf32>
    %cst_57 = arith.constant 1.280000e+02 : f32
    %141 = vector.broadcast %cst_57 : f32 to vector<32x1xf32>
    %142 = arith.divf %140, %141 : vector<32x1xf32>
    %143 = vector.broadcast %142 : vector<32x1xf32> to vector<32x128xf32>
    %144 = arith.subf %138, %143 : vector<32x128xf32>
    %145 = arith.mulf %144, %144 : vector<32x128xf32>
    %cst_58 = arith.constant dense<0.000000e+00> : vector<32xf32>
    %146 = vector.multi_reduction <add>, %145, %cst_58 [1] : vector<32x128xf32> to vector<32xf32>
    %147 = vector.shape_cast %146 : vector<32xf32> to vector<32x1xf32>
    %cst_59 = arith.constant 1.280000e+02 : f32
    %148 = vector.broadcast %cst_59 : f32 to vector<32x1xf32>
    %149 = arith.divf %147, %148 : vector<32x1xf32>
    %cst_60 = arith.constant 9.99999974E-6 : f32
    %150 = vector.broadcast %cst_60 : f32 to vector<32x1xf32>
    %151 = arith.addf %149, %150 : vector<32x1xf32>
    %152 = math.rsqrt %151 : vector<32x1xf32>
    %153 = vector.broadcast %152 : vector<32x1xf32> to vector<32x128xf32>
    %154 = arith.mulf %144, %153 : vector<32x128xf32>
    %155 = vector.broadcast %7 : vector<1x128xf32> to vector<32x128xf32>
    %156 = arith.mulf %154, %155 : vector<32x128xf32>
    %157 = vector.broadcast %8 : vector<1x128xf32> to vector<32x128xf32>
    %158 = arith.addf %156, %157 : vector<32x128xf32>
    %159 = arith.truncf %158 : vector<32x128xf32> to vector<32x128xbf16>
    %c0_61 = arith.constant 0 : index
    %c0_62 = arith.constant 0 : index
    %c0_63 = arith.constant 0 : index
    %160 = vector.load %arg7[%c0_61, %c0_62, %c0_63] : memref<1x128x384xbf16, #tpu.memory_space<vmem>>, vector<1x128x384xbf16>
    %161 = vector.shape_cast %160 : vector<1x128x384xbf16> to vector<128x384xbf16>
    %cst_64 = arith.constant dense<0.000000e+00> : vector<32x384xf32>
    %162 = tpu.matmul %159, %161, %cst_64 {dimension_numbers = #tpu.dot_dimension_numbers<[1], [0], [0], [1], [0, 0, 1, 1], [], []>} : vector<32x128xbf16>, vector<128x384xbf16>, vector<32x384xf32> -> vector<32x384xf32>
    %c0_65 = arith.constant 0 : index
    %c0_66 = arith.constant 0 : index
    %c0_67 = arith.constant 0 : index
    %163 = vector.load %arg8[%c0_65, %c0_66, %c0_67] : memref<1x128x384xbf16, #tpu.memory_space<vmem>>, vector<1x128x384xbf16>
    %164 = vector.shape_cast %163 : vector<1x128x384xbf16> to vector<128x384xbf16>
    %cst_68 = arith.constant dense<0.000000e+00> : vector<32x384xf32>
    %165 = tpu.matmul %159, %164, %cst_68 {dimension_numbers = #tpu.dot_dimension_numbers<[1], [0], [0], [1], [0, 0, 1, 1], [], []>} : vector<32x128xbf16>, vector<128x384xbf16>, vector<32x384xf32> -> vector<32x384xf32>
    %cst_69 = arith.constant 5.000000e-01 : f32
    %166 = vector.broadcast %cst_69 : f32 to vector<32x384xf32>
    %167 = arith.mulf %166, %165 : vector<32x384xf32>
    %cst_70 = arith.constant 0.707106769 : f32
    %168 = vector.broadcast %cst_70 : f32 to vector<32x384xf32>
    %169 = arith.mulf %165, %168 : vector<32x384xf32>
    %170 = math.absf %169 : vector<32x384xf32>
    %cst_71 = arith.constant 5.000000e-01 : f32
    %171 = vector.broadcast %cst_71 : f32 to vector<32x384xf32>
    %172 = arith.mulf %171, %170 : vector<32x384xf32>
    %cst_72 = arith.constant 1.000000e+00 : f32
    %173 = vector.broadcast %cst_72 : f32 to vector<32x384xf32>
    %174 = arith.addf %173, %172 : vector<32x384xf32>
    %175 = tpu.reciprocal %174 {approx = true} : vector<32x384xf32> -> vector<32x384xf32>
    %cst_73 = arith.constant 0.170872763 : f32
    %176 = vector.broadcast %cst_73 : f32 to vector<32x384xf32>
    %177 = arith.mulf %175, %176 : vector<32x384xf32>
    %cst_74 = arith.constant -0.822152256 : f32
    %178 = vector.broadcast %cst_74 : f32 to vector<32x384xf32>
    %179 = arith.addf %178, %177 : vector<32x384xf32>
    %180 = arith.mulf %175, %179 : vector<32x384xf32>
    %cst_75 = arith.constant 1.48851585 : f32
    %181 = vector.broadcast %cst_75 : f32 to vector<32x384xf32>
    %182 = arith.addf %181, %180 : vector<32x384xf32>
    %183 = arith.mulf %175, %182 : vector<32x384xf32>
    %cst_76 = arith.constant -1.13520396 : f32
    %184 = vector.broadcast %cst_76 : f32 to vector<32x384xf32>
    %185 = arith.addf %184, %183 : vector<32x384xf32>
    %186 = arith.mulf %175, %185 : vector<32x384xf32>
    %cst_77 = arith.constant 0.278868079 : f32
    %187 = vector.broadcast %cst_77 : f32 to vector<32x384xf32>
    %188 = arith.addf %187, %186 : vector<32x384xf32>
    %189 = arith.mulf %175, %188 : vector<32x384xf32>
    %cst_78 = arith.constant -0.186288059 : f32
    %190 = vector.broadcast %cst_78 : f32 to vector<32x384xf32>
    %191 = arith.addf %190, %189 : vector<32x384xf32>
    %192 = arith.mulf %175, %191 : vector<32x384xf32>
    %cst_79 = arith.constant 0.0967841818 : f32
    %193 = vector.broadcast %cst_79 : f32 to vector<32x384xf32>
    %194 = arith.addf %193, %192 : vector<32x384xf32>
    %195 = arith.mulf %175, %194 : vector<32x384xf32>
    %cst_80 = arith.constant 0.374091953 : f32
    %196 = vector.broadcast %cst_80 : f32 to vector<32x384xf32>
    %197 = arith.addf %196, %195 : vector<32x384xf32>
    %198 = arith.mulf %175, %197 : vector<32x384xf32>
    %cst_81 = arith.constant 1.00002372 : f32
    %199 = vector.broadcast %cst_81 : f32 to vector<32x384xf32>
    %200 = arith.addf %199, %198 : vector<32x384xf32>
    %201 = arith.mulf %175, %200 : vector<32x384xf32>
    %cst_82 = arith.constant -1.26551223 : f32
    %202 = vector.broadcast %cst_82 : f32 to vector<32x384xf32>
    %203 = arith.addf %202, %201 : vector<32x384xf32>
    %cst_83 = arith.constant 0.000000e+00 : f32
    %204 = vector.broadcast %cst_83 : f32 to vector<32x384xf32>
    %205 = arith.subf %204, %170 : vector<32x384xf32>
    %206 = arith.mulf %205, %170 : vector<32x384xf32>
    %207 = arith.addf %206, %203 : vector<32x384xf32>
    %208 = math.exp %207 : vector<32x384xf32>
    %209 = arith.mulf %175, %208 : vector<32x384xf32>
    %cst_84 = arith.constant 0.000000e+00 : f32
    %210 = vector.broadcast %cst_84 : f32 to vector<32x384xf32>
    %211 = arith.cmpf oge, %169, %210 : vector<32x384xf32>
    %cst_85 = arith.constant 1.000000e+00 : f32
    %212 = vector.broadcast %cst_85 : f32 to vector<32x384xf32>
    %213 = arith.subf %212, %209 : vector<32x384xf32>
    %cst_86 = arith.constant 1.000000e+00 : f32
    %214 = vector.broadcast %cst_86 : f32 to vector<32x384xf32>
    %215 = arith.subf %209, %214 : vector<32x384xf32>
    %216 = arith.select %211, %213, %215 : vector<32x384xi1>, vector<32x384xf32>
    %cst_87 = arith.constant 1.000000e+00 : f32
    %217 = vector.broadcast %cst_87 : f32 to vector<32x384xf32>
    %218 = arith.addf %217, %216 : vector<32x384xf32>
    %219 = arith.mulf %167, %218 : vector<32x384xf32>
    %220 = arith.mulf %219, %162 : vector<32x384xf32>
    %221 = arith.truncf %220 : vector<32x384xf32> to vector<32x384xbf16>
    %c0_88 = arith.constant 0 : index
    %c0_89 = arith.constant 0 : index
    %c0_90 = arith.constant 0 : index
    %222 = vector.load %arg9[%c0_88, %c0_89, %c0_90] : memref<1x384x128xbf16, #tpu.memory_space<vmem>>, vector<1x384x128xbf16>
    %223 = vector.shape_cast %222 : vector<1x384x128xbf16> to vector<384x128xbf16>
    %cst_91 = arith.constant dense<0.000000e+00> : vector<32x128xf32>
    %224 = tpu.matmul %221, %223, %cst_91 {dimension_numbers = #tpu.dot_dimension_numbers<[1], [0], [0], [1], [0, 0, 1, 1], [], []>} : vector<32x384xbf16>, vector<384x128xbf16>, vector<32x128xf32> -> vector<32x128xf32>
    %225 = arith.addf %138, %224 : vector<32x128xf32>
    %c0_92 = arith.constant 0 : index
    %c0_93 = arith.constant 0 : index
    %226 = vector.load %arg13[%c0_92, %c0_93] : memref<32x128xf32, #tpu.memory_space<vmem>>, vector<32x128xf32>
    tpu.vector_store %arg13[%c0_92, %c0_93], %225 {strides = array<i32>} : memref<32x128xf32, #tpu.memory_space<vmem>>, vector<32x128xf32>,
    %c1_i32 = arith.constant 1 : i32
    %227 = arith.cmpi eq, %arg1, %c1_i32 : i32
    %228 = arith.extui %227 : i1 to i32
    %c0_i32_94 = arith.constant 0 : i32
    %229 = arith.cmpi ne, %228, %c0_i32_94 : i32
    scf.if %229 {
      %c0_95 = arith.constant 0 : index
      %c0_96 = arith.constant 0 : index
      %230 = vector.load %arg11[%c0_95, %c0_96] : memref<1x128xf32, #tpu.memory_space<vmem>>, vector<1x128xf32>
      %cst_97 = arith.constant dense<0.000000e+00> : vector<32xf32>
      %231 = vector.multi_reduction <add>, %225, %cst_97 [1] : vector<32x128xf32> to vector<32xf32>
      %232 = vector.shape_cast %231 : vector<32xf32> to vector<32x1xf32>
      %cst_98 = arith.constant 1.280000e+02 : f32
      %233 = vector.broadcast %cst_98 : f32 to vector<32x1xf32>
      %234 = arith.divf %232, %233 : vector<32x1xf32>
      %235 = vector.broadcast %234 : vector<32x1xf32> to vector<32x128xf32>
      %236 = arith.subf %225, %235 : vector<32x128xf32>
      %237 = arith.mulf %236, %236 : vector<32x128xf32>
      %cst_99 = arith.constant dense<0.000000e+00> : vector<32xf32>
      %238 = vector.multi_reduction <add>, %237, %cst_99 [1] : vector<32x128xf32> to vector<32xf32>
      %239 = vector.shape_cast %238 : vector<32xf32> to vector<32x1xf32>
      %cst_100 = arith.constant 1.280000e+02 : f32
      %240 = vector.broadcast %cst_100 : f32 to vector<32x1xf32>
      %241 = arith.divf %239, %240 : vector<32x1xf32>
      %cst_101 = arith.constant 9.99999974E-6 : f32
      %242 = vector.broadcast %cst_101 : f32 to vector<32x1xf32>
      %243 = arith.addf %241, %242 : vector<32x1xf32>
      %244 = math.rsqrt %243 : vector<32x1xf32>
      %245 = vector.broadcast %244 : vector<32x1xf32> to vector<32x128xf32>
      %246 = arith.mulf %236, %245 : vector<32x128xf32>
      %247 = vector.broadcast %230 : vector<1x128xf32> to vector<32x128xf32>
      %248 = arith.mulf %246, %247 : vector<32x128xf32>
      %cst_102 = arith.constant 0.000000e+00 : f32
      %249 = vector.broadcast %cst_102 : f32 to vector<32x128xf32>
      %250 = arith.addf %248, %249 : vector<32x128xf32>
      %251 = vector.shape_cast %250 : vector<32x128xf32> to vector<2x16x128xf32>
      %c0_103 = arith.constant 0 : index
      %c0_104 = arith.constant 0 : index
      %c0_105 = arith.constant 0 : index
      %252 = vector.load %arg12[%c0_103, %c0_104, %c0_105] : memref<2x16x128xf32, #tpu.memory_space<vmem>>, vector<2x16x128xf32>
      tpu.vector_store %arg12[%c0_103, %c0_104, %c0_105], %251 {strides = array<i32>} : memref<2x16x128xf32, #tpu.memory_space<vmem>>, vector<2x16x128xf32>,
    } else {
    }
    return
  }
  func.func @transform_0(%arg0: i32, %arg1: i32) -> (i32, i32, i32) {
    %c0_i32 = arith.constant 0 : i32
    %c0_i32_0 = arith.constant 0 : i32
    %c0_i32_1 = arith.constant 0 : i32
    return %arg0, %c0_i32, %c0_i32_0 : i32, i32, i32
  }
  func.func @transform_1(%arg0: i32, %arg1: i32) -> (i32, i32, i32) {
    %c0_i32 = arith.constant 0 : i32
    %c0_i32_0 = arith.constant 0 : i32
    %c0_i32_1 = arith.constant 0 : i32
    return %arg1, %c0_i32, %c0_i32_0 : i32, i32, i32
  }
  func.func @transform_2(%arg0: i32, %arg1: i32) -> (i32, i32, i32) {
    %c0_i32 = arith.constant 0 : i32
    %c0_i32_0 = arith.constant 0 : i32
    %c0_i32_1 = arith.constant 0 : i32
    return %arg1, %c0_i32, %c0_i32_0 : i32, i32, i32
  }
  func.func @transform_3(%arg0: i32, %arg1: i32) -> (i32, i32, i32) {
    %c0_i32 = arith.constant 0 : i32
    %c0_i32_0 = arith.constant 0 : i32
    %c0_i32_1 = arith.constant 0 : i32
    return %arg1, %c0_i32, %c0_i32_0 : i32, i32, i32
  }
  func.func @transform_4(%arg0: i32, %arg1: i32) -> (i32, i32, i32) {
    %c0_i32 = arith.constant 0 : i32
    %c0_i32_0 = arith.constant 0 : i32
    %c0_i32_1 = arith.constant 0 : i32
    return %arg1, %c0_i32, %c0_i32_0 : i32, i32, i32
  }
  func.func @transform_5(%arg0: i32, %arg1: i32) -> (i32, i32, i32) {
    %c0_i32 = arith.constant 0 : i32
    %c0_i32_0 = arith.constant 0 : i32
    %c0_i32_1 = arith.constant 0 : i32
    return %arg1, %c0_i32, %c0_i32_0 : i32, i32, i32
  }
  func.func @transform_6(%arg0: i32, %arg1: i32) -> (i32, i32, i32) {
    %c0_i32 = arith.constant 0 : i32
    %c0_i32_0 = arith.constant 0 : i32
    %c0_i32_1 = arith.constant 0 : i32
    return %arg1, %c0_i32, %c0_i32_0 : i32, i32, i32
  }
  func.func @transform_7(%arg0: i32, %arg1: i32) -> (i32, i32, i32) {
    %c0_i32 = arith.constant 0 : i32
    %c0_i32_0 = arith.constant 0 : i32
    %c0_i32_1 = arith.constant 0 : i32
    return %arg1, %c0_i32, %c0_i32_0 : i32, i32, i32
  }
  func.func @transform_8(%arg0: i32, %arg1: i32) -> (i32, i32) {
    %c0_i32 = arith.constant 0 : i32
    %c0_i32_0 = arith.constant 0 : i32
    %c0_i32_1 = arith.constant 0 : i32
    return %c0_i32, %c0_i32_0 : i32, i32
  }
  func.func @transform_9(%arg0: i32, %arg1: i32) -> (i32, i32) {
    %c0_i32 = arith.constant 0 : i32
    %c0_i32_0 = arith.constant 0 : i32
    %c0_i32_1 = arith.constant 0 : i32
    return %c0_i32, %c0_i32_0 : i32, i32
  }
  func.func @transform_10(%arg0: i32, %arg1: i32) -> (i32, i32, i32) {
    %c0_i32 = arith.constant 0 : i32
    %c0_i32_0 = arith.constant 0 : i32
    %c0_i32_1 = arith.constant 0 : i32
    return %arg0, %c0_i32, %c0_i32_0 : i32, i32, i32
  }
}

</mosaic_0001>

<bundles_post_ra>
// kernel: tpu_custom_call.1
= control target key start
LH: loop header
LB: loop body
LE: loop exit
PB: predicated region body
PF: predicated region fallthrough
CT: control target
= control target key end

     0   :  { %s6965_s0 = inlined_call_operand.hbm [shape: f32[2,16,128], index: 0, kind: input, shape index: {}]   ;;  %s6966_s1 = inlined_call_operand.hbm [shape: f32[2,8,128], index: 1, kind: input, shape index: {}]   ;;  %s6967_s2 = inlined_call_operand.hbm [shape: bf16[2,128,128], index: 2, kind: input, shape index: {}]   ;;  %s6968_s3 = inlined_call_operand.hbm [shape: bf16[2,128,256], index: 3, kind: input, shape index: {}]   ;;  %s6969_s4 = inlined_call_operand.hbm [shape: bf16[2,128,128], index: 4, kind: input, shape index: {}]   ;;  %s6970_s5 = inlined_call_operand.hbm [shape: bf16[2,128,384], index: 5, kind: input, shape index: {}]   ;;  %s6971_s6 = inlined_call_operand.hbm [shape: bf16[2,128,384], index: 6, kind: input, shape index: {}]   ;;  %s6972_s7 = inlined_call_operand.hbm [shape: bf16[2,384,128], index: 7, kind: input, shape index: {}]   ;;  %s6973_s8 = inlined_call_operand.hbm [shape: f32[128,128], index: 8, kind: input, shape index: {}]   ;;  %s6974_s9 = inlined_call_operand.hbm [shape: f32[1,128], index: 9, kind: input, shape index: {}]   ;;  %s6975_s10 = inlined_call_operand.hbm [shape: f32[2,16,128], index: 10, kind: output, shape index: {}]  }
   0x1   :  { %7020 = sst [smem:[#allocation58_spill]] %s6966_s1 }
   0x2   :  { %7021 = sst [smem:[#allocation59_spill]] %s6968_s3 }
   0x3   :  { %7022 = sst [smem:[#allocation60_spill]] %s6970_s5 }
   0x4   :  { %7023 = sst [smem:[#allocation61_spill]] %s6972_s7 }
   0x5   :  { %7024 = sst [smem:[#allocation62_spill]] %s6973_s8 }
   0x6   :  { %7025 = sst [smem:[#allocation63_spill]] %s6975_s10 }
   0x7   :  { %15 = vsyncpa [#allocation5], 0 }
   0x8   :  { %16 = vsyncpa [#allocation8], 0 }
   0x9   :  { %18 = vsyncpa [#allocation8 + $0x1], 0 }
   0xa   :  { %19 = vsyncpa [#allocation11], 0 }
   0xb   :  { %21 = vsyncpa [#allocation11 + $0x1], 0 }
   0xc   :  { %22 = vsyncpa [#allocation14], 0 }
   0xd   :  { %24 = vsyncpa [#allocation14 + $0x1], 0 }
   0xe   :  { %25 = vsyncpa [#allocation17], 0 }
   0xf   :  { %27 = vsyncpa [#allocation17 + $0x1], 0 }
  0x10   :  { %28 = vsyncpa [#allocation20], 0 }
  0x11   :  { %29 = vsyncpa [#allocation6], 0  ;;  %s5599_s13 = smov 0   ;;  %s5601_s14 = smov 0  }
  0x12   :  { %s5603_s15 = smov 0   ;;  %s5605_s16 = smov 0  }
  0x13   :  { %s5607_s17 = smov 0   ;;  %s5609_s18 = smov 0  }
  0x14 LB: > { %7026 = sst [smem:[#allocation30_spill]] %s5501_s14  ;;  %s5628_s19 = sadd.s32 4294967295, %s5517_s18   ;;  %s5517_s18 = sphi %s5609_s18, %s35_s18   ;;  %s5513_s17 = sphi %s5607_s17, %s7119_s17   ;;  %s5509_s16 = sphi %s5605_s16, %s7118_s16   ;;  %s5505_s15 = sphi %s5603_s15, %s7116_s15   ;;  %s5501_s14 = sphi %s5601_s14, %s7115_s14   ;;  %s5497_s13 = sphi %s5599_s13, %s7114_s13  }
  0x15   : > { %7027 = sst [smem:[#allocation31_spill]] %s5505_s15  ;;  %p93_p0 = scmp.ne.s32.totalorder %s5501_s14, %s5497_s13 }
  0x16   : > { %7028 = sst [smem:[#allocation32_spill]] %s5509_s16  ;;  %p6976_p1 = scmp.eq.s32.totalorder %s5628_s19, 0 }
  0x17   : > { %7029 = sst [smem:[#allocation33_spill]] %s5517_s18  ;;  %p4035_p2 = scmp.ge.s32.totalorder %s5517_s18, 1 }
  0x18   : > { %7030 = sst [smem:[#allocation34_spill]] %s5628_s19  ;;  %p328_p3 = scmp.lt.s32.totalorder %s5517_s18, 3 }
  0x19   : > { %p5636_p4 = por %p6976_p1, %p93_p0  ;;  %s5519_s22 = smov [#allocation18]  }
  0x1a   : > { %p5640_p5 = pnand %p4035_p2, %p328_p3  ;;  %s357_s23 = sshll.u32 %s5519_s22, 4  ;;  %s358_s23 = int_to_ptr.vmem [resolvable:$true] %s357_s23 }
  0x1b   : > { %s7031_s20 = scalar_select %p5636_p4, 1, 0 }
  0x1c   : > { %s7033_s21 = scalar_select %p5640_p5, 1, 0 }
  0x1d   : > { %7032 = sst [smem:[#allocation35_spill]] %s7031_s20  ;;  %p4727_p6 = pneg %p5640_p5 }
  0x1e   : > { %7034 = sst [smem:[#allocation36_spill]] %s7033_s21  ;;  %s44_s25 = sadd.s32 1, %s5513_s17 }
  0x1f   : > { %p5648_p7 = pnand %p4727_p6, %p6976_p1  ;;  %s7036_s8 = sld [smem:[#allocation62_spill]] }
  0x21   : > { %s7035_s24 = scalar_select %p5648_p7, 1, 0 }
  0x22   : > { %p5661_p9 = pneg %p5648_p7 }
  0x24   : > { %s7037_s11 = scalar_select %p5661_p9, 1, 0 }
  0x25   : > { %s5119_s28 = scalar_lea.hbm %s7036_s8, 2048 }
  0x26   : > { %p5120_p8 = scmp.ne.s32.totalorder %s7036_s8, %s5119_s28  ;;  %p5126_p12 = scmp.lt.u32.totalorder %s5119_s28, %s7036_s8 }
  0x28   : > { %p5122_p10 = pnand %p5661_p9, %p5120_p8 }
  0x2a   : > { %p5123_p11 = pneg %p5122_p10 }
  0x2c   : > { %p5128_p13 = pnand %p5126_p12, %p5123_p11 }
  0x2e   : > { %5131 = shalt.err (!%p5128_p13)
}
  0x2f   : > { %s5132_s22 = scalar_lea.vmem %s358_s23, 2048  ;;  %p5140_p6 = scmp.lt.s32.totalorder %s358_s23, %s358_s23 }
  0x30   : > { %p5133_p0 = scmp.ne.s32.totalorder %s358_s23, %s5132_s22  ;;  %p5141_p1 = scmp.lt.s32.totalorder %s5132_s22, %s5132_s22 }
  0x32   : > { %p5135_p2 = pnand %p5133_p0, %p5661_p9  ;;  %p5142_p4 = por %p5141_p1, %p5140_p6 }
  0x34   : > { %p5136_p3 = pneg %p5135_p2 }
  0x36   : > { %p5143_p5 = pnand %p5142_p4, %p5136_p3 }
  0x38   : > { %5146 = shalt.err (!%p5143_p5)
}
  0x39   : > { %s6979_s26 = smov 128   ;;  %s6981_s27 = smov 8  }
  0x3a   : > { %4733 = dma.hbm_to_vmem [thread:$0]  (!%p5648_p7), %s7036_s8, 2048, %s358_s23, [#allocation17], %s6979_s26, %s6979_s26, %s6981_s27  }
  0x3b   : > { %p45_p1 = scmp.ge.s32.totalorder %s44_s25, 2  ;;  %s80_s30 = sadd.s32 1, %s5505_s15 }
  0x3c   : > { %p87_p4 = scmp.ne.s32.totalorder %s5505_s15, %s5501_s14  ;;  %p88_p5 = scmp.eq.s32.totalorder %s5517_s18, 0 }
  0x3d   : > { %s7121_s25 = smov (%p45_p1, %s44_s25), 0  ;;  %p4762_p10 = scmp.lt.s32.totalorder %s5517_s18, 2 }
  0x3e   : > { %7038 = sst [smem:[#allocation37_spill]] %s7121_s25  ;;  %p89_p8 = por %p88_p5, %p87_p4 }
  0x3f   : > { %s77_s12 = ssub.s32 %s5513_s17, %s7121_s25  ;;  %s5690_s13 = sand.u32 1, %s5517_s18  }
  0x40   : > { %p78_p11 = scmp.eq.s32.totalorder %s77_s12, 0  ;;  %s5693_s22 = sand.u32 1, %s5505_s15  }
  0x41   : > { %s4041_s28 = sshll.u32 %s5513_s17, 7  ;;  %s4040_s29 = sshll.u32 %s5693_s22, 3 }
  0x42   : > { %s5697_s23 = scalar_select %p78_p11, %s5505_s15, %s80_s30  }
  0x43   : > { %s7040_s1 = sld [smem:[#allocation58_spill]]  ;;  %p5705_p12 = pnand %p4762_p10, %p89_p8 }
  0x44   : > { %7039 = sst [smem:[#allocation38_spill]] %s5697_s23  ;;  %s386_s12 = scalar_lea.vmem [#allocation7], %s4040_s29 }
  0x45   : > { %s7041_s25 = scalar_select %p5705_p12, 1, 0 }
  0x46   : > { %s393_s18 = sshll.u32 %s386_s12, 4  ;;  %p5717_p0 = pneg %p5705_p12  ;;  %s5710_s18 = int_to_ptr.vmem [resolvable:$true] %s393_s18 }
  0x48   : > { %s7042_s26 = scalar_select %p5717_p0, 1, 0 }
  0x49   : > { %s5703_s8 = scalar_lea.hbm %s7040_s1, %s4041_s28  ;;  %s5152_s29 = scalar_lea.hbm %s7040_s1, 256 }
  0x4a   : > { %s5147_s23 = scalar_lea.hbm %s5703_s8, 128  ;;  %p5153_p6 = scmp.lt.u32.totalorder %s5703_s8, %s7040_s1 }
  0x4b   : > { %p5148_p13 = scmp.ne.s32.totalorder %s5703_s8, %s5147_s23  ;;  %p5154_p1 = scmp.lt.u32.totalorder %s5152_s29, %s5147_s23 }
  0x4c   : > { %p5156_p5 = scmp.lt.u32.totalorder %s5147_s23, %s5703_s8 }
  0x4d   : > { %p5150_p2 = pnand %p5717_p0, %p5148_p13  ;;  %p5155_p4 = por %p5154_p1, %p5153_p6 }
  0x4f   : > { %p5151_p3 = pneg %p5150_p2  ;;  %p5157_p8 = por %p5156_p5, %p5155_p4 }
  0x51   : > { %p5158_p10 = pnand %p5157_p8, %p5151_p3 }
  0x53   : > { %5161 = shalt.err (!%p5158_p10)
}
  0x54   : > { %s5162_s30 = scalar_lea.vmem %s5710_s18, 128  ;;  %s5522_s27 = smov [#allocation7]  }
  0x55   : > { %p5163_p11 = scmp.ne.s32.totalorder %s5710_s18, %s5162_s30  ;;  %s5167_s28 = sshll.u32 %s5522_s27, 4  ;;  %s5168_s28 = int_to_ptr.vmem [resolvable:$false] %s5167_s28 }
  0x56   : > { %s5169_s10 = scalar_lea.vmem %s5168_s28, 256  ;;  %p5170_p7 = scmp.lt.s32.totalorder %s5710_s18, %s5168_s28 }
  0x57   : > { %p5165_p13 = pnand %p5163_p11, %p5717_p0  ;;  %p5171_p9 = scmp.lt.s32.totalorder %s5169_s10, %s5162_s30 }
  0x59   : > { %p5166_p2 = pneg %p5165_p13  ;;  %p5172_p6 = por %p5171_p9, %p5170_p7 }
  0x5b   : > { %p5173_p1 = pnand %p5172_p6, %p5166_p2 }
  0x5d   : > { %5176 = shalt.err (!%p5173_p1)
}
  0x5e   : > { %s7043_s23 = scalar_lea.sflag [#allocation8], %s5690_s13  ;;  %s5743_s29 = smul.u32 192, %s5693_s22 }
  0x5f   : > { %4740 = dma.hbm_to_vmem [thread:$0]  (!%p5705_p12), %s5703_s8, 128, %s5710_s18, %s7043_s23  }
  0x60   : > { %7044 = sst [smem:[#allocation39_spill]] %s5743_s29  ;;  %s4045_s12 = sshll.u32 %s5693_s22, 7 }
  0x61   : > { %s4202_s27 = sshll.u32 %s5513_s17, 11  ;;  %s7045_s3 = sld [smem:[#allocation59_spill]] }
  0x62   : > { %s425_s1 = scalar_lea.vmem [#allocation10], %s4045_s12  ;;  %s6993_s16 = scalar_lea.sflag [#allocation11], %s5690_s13 }
  0x63   : > { %s432_s15 = sshll.u32 %s425_s1, 4  ;;  %s5752_s15 = int_to_ptr.vmem [resolvable:$true] %s432_s15 }
  0x67   : > { %s5750_s10 = scalar_lea.hbm %s7045_s3, %s4202_s27  ;;  %s5182_s23 = scalar_lea.hbm %s7045_s3, 4096 }
  0x68   : > { %s5177_s20 = scalar_lea.hbm %s5750_s10, 2048  ;;  %p5183_p4 = scmp.lt.u32.totalorder %s5750_s10, %s7045_s3 }
  0x69   : > { %p5178_p7 = scmp.ne.s32.totalorder %s5750_s10, %s5177_s20  ;;  %p5184_p5 = scmp.lt.u32.totalorder %s5182_s23, %s5177_s20 }
  0x6a   : > { %p5186_p10 = scmp.lt.u32.totalorder %s5177_s20, %s5750_s10 }
  0x6b   : > { %p5180_p9 = pnand %p5178_p7, %p5717_p0  ;;  %p5185_p8 = por %p5184_p5, %p5183_p4 }
  0x6d   : > { %p5181_p3 = pneg %p5180_p9  ;;  %p5187_p11 = por %p5186_p10, %p5185_p8 }
  0x6f   : > { %p5188_p13 = pnand %p5187_p11, %p5181_p3 }
  0x71   : > { %5191 = shalt.err (!%p5188_p13)
}
  0x72   : > { %s5192_s1 = scalar_lea.vmem %s5752_s15, 2048  ;;  %s5523_s12 = smov [#allocation10]  }
  0x73   : > { %p5193_p2 = scmp.ne.s32.totalorder %s5752_s15, %s5192_s1  ;;  %s5197_s28 = sshll.u32 %s5523_s12, 4  ;;  %s5198_s28 = int_to_ptr.vmem [resolvable:$false] %s5197_s28 }
  0x74   : > { %s5199_s8 = scalar_lea.vmem %s5198_s28, 4096  ;;  %p5200_p7 = scmp.lt.s32.totalorder %s5752_s15, %s5198_s28 }
  0x75   : > { %p5195_p6 = pnand %p5193_p2, %p5717_p0  ;;  %p5201_p9 = scmp.lt.s32.totalorder %s5199_s8, %s5192_s1 }
  0x77   : > { %p5196_p1 = pneg %p5195_p6  ;;  %p5202_p4 = por %p5201_p9, %p5200_p7 }
  0x79   : > { %p5203_p5 = pnand %p5202_p4, %p5196_p1 }
  0x7b   : > { %5206 = shalt.err (!%p5203_p5)
}
  0x7c   : > { %s7046_s20 = smov 8   ;;  %s7047_s18 = smov 128  }
  0x7d   : > { %4746 = dma.hbm_to_vmem [thread:$0]  (!%p5705_p12), %s5750_s10, 2048, %s5752_s15, %s6993_s16, %s7047_s18, %s7047_s18, %s7046_s20  }
  0x7e   : > { %s5782_s23 = smul.u32 3072, %s5513_s17  ;;  %s467_s27 = scalar_lea.vmem [#allocation13], %s5743_s29 }
  0x7f   : > { %s474_s30 = sshll.u32 %s467_s27, 4  ;;  %s7048_s5 = sld [smem:[#allocation60_spill]]  ;;  %s5791_s30 = int_to_ptr.vmem [resolvable:$true] %s474_s30 }
  0x80   : > { %s464_s8 = scalar_lea.sflag [#allocation14], %s5690_s13 }
  0x85   : > { %s5789_s28 = scalar_lea.hbm %s7048_s5, %s5782_s23  ;;  %s5212_s27 = scalar_lea.hbm %s7048_s5, 6144 }
  0x86   : > { %s5207_s3 = scalar_lea.hbm %s5789_s28, 3072  ;;  %p5213_p11 = scmp.lt.u32.totalorder %s5789_s28, %s7048_s5 }
  0x87   : > { %p5208_p3 = scmp.ne.s32.totalorder %s5789_s28, %s5207_s3  ;;  %p5214_p13 = scmp.lt.u32.totalorder %s5212_s27, %s5207_s3 }
  0x88   : > { %p5216_p6 = scmp.lt.u32.totalorder %s5207_s3, %s5789_s28 }
  0x89   : > { %p5210_p8 = pnand %p5208_p3, %p5717_p0  ;;  %p5215_p2 = por %p5214_p13, %p5213_p11 }
  0x8b   : > { %p5211_p10 = pneg %p5210_p8  ;;  %p5217_p1 = por %p5216_p6, %p5215_p2 }
  0x8d   : > { %p5218_p7 = pnand %p5217_p1, %p5211_p10 }
  0x8f   : > { %5221 = shalt.err (!%p5218_p7)
}
  0x90   : > { %s5222_s12 = scalar_lea.vmem %s5791_s30, 3072  ;;  %s5524_s15 = smov [#allocation13]  }
  0x91   : > { %p5223_p9 = scmp.ne.s32.totalorder %s5791_s30, %s5222_s12  ;;  %s5227_s10 = sshll.u32 %s5524_s15, 4  ;;  %s5228_s10 = int_to_ptr.vmem [resolvable:$false] %s5227_s10 }
  0x92   : > { %s5229_s16 = scalar_lea.vmem %s5228_s10, 6144  ;;  %p5230_p3 = scmp.lt.s32.totalorder %s5791_s30, %s5228_s10 }
  0x93   : > { %p5225_p4 = pnand %p5223_p9, %p5717_p0  ;;  %p5231_p8 = scmp.lt.s32.totalorder %s5229_s16, %s5222_s12 }
  0x95   : > { %p5226_p5 = pneg %p5225_p4  ;;  %p5232_p11 = por %p5231_p8, %p5230_p3 }
  0x97   : > { %p5233_p13 = pnand %p5232_p11, %p5226_p5 }
  0x99   : > { %5236 = shalt.err (!%p5233_p13)
}
  0x9a   : > { %s5525_s3 = smov 192   ;;  %s5526_s27 = smov 12  }
  0x9b   : > { %4752 = dma.hbm_to_vmem [thread:$0]  (!%p5705_p12), %s5789_s28, 3072, %s5791_s30, %s464_s8, %s5525_s3, %s5525_s3, %s5526_s27  }
  0x9c   : > { %s5527_s1 = smov [#allocation4]   ;;  %s5528_s12 = smov [#allocation19]  }
  0x9d   : > { %s344_s15 = sshll.u32 %s5527_s1, 4  ;;  %s371_s10 = sshll.u32 %s5528_s12, 4  ;;  %s345_s15 = int_to_ptr.vmem [resolvable:$true] %s344_s15  ;;  %s372_s10 = int_to_ptr.vmem [resolvable:$true] %s371_s10 }
  0x9e   : > { %s5237_s14 = scalar_lea.hbm %s6965_s0, 512  ;;  %p7049_p2 = scmp.ne.s32.totalorder %s7037_s11, 0 }
  0x9f   : > { %p5238_p10 = scmp.ne.s32.totalorder %s6965_s0, %s5237_s14  ;;  %p5244_p7 = scmp.lt.u32.totalorder %s5237_s14, %s6965_s0 }
  0xa1   : > { %p5240_p6 = pnand %p5238_p10, %p7049_p2 }
  0xa3   : > { %p5241_p1 = pneg %p5240_p6 }
  0xa5   : > { %p5246_p9 = pnand %p5244_p7, %p5241_p1 }
  0xa7   : > { %5249 = shalt.err (!%p5246_p9)
}
  0xa8   : > { %s5250_s30 = scalar_lea.vmem %s345_s15, 512  ;;  %p5258_p8 = scmp.lt.s32.totalorder %s345_s15, %s345_s15 }
  0xa9   : > { %p5251_p4 = scmp.ne.s32.totalorder %s345_s15, %s5250_s30  ;;  %p5259_p11 = scmp.lt.s32.totalorder %s5250_s30, %s5250_s30 }
  0xab   : > { %p5253_p5 = pnand %p5251_p4, %p7049_p2  ;;  %p5260_p13 = por %p5259_p11, %p5258_p8 }
  0xad   : > { %p5254_p3 = pneg %p5253_p5 }
  0xaf   : > { %p5261_p12 = pnand %p5260_p13, %p5254_p3 }
  0xb1   : > { %5264 = shalt.err (!%p5261_p12)
}
  0xb2   : > { %p7050_p10 = scmp.ne.s32.totalorder %s7035_s24, 0  ;;  %s5265_s21 = scalar_lea.hbm %s6974_s9, 16 }
  0xb3   : > { %p5266_p6 = scmp.ne.s32.totalorder %s6974_s9, %s5265_s21  ;;  %p5272_p7 = scmp.lt.u32.totalorder %s5265_s21, %s6974_s9 }
  0xb4   : > { %4730 = dma.hbm_to_vmem [thread:$0]  (!%p7050_p10), %s6965_s0, 512, %s345_s15, [#allocation5], %s7047_s18, %s7047_s18, %s7046_s20  }
  0xb5   : > { %p5268_p12 = pnand %p5266_p6, %p7049_p2 }
  0xb7   : > { %p5269_p1 = pneg %p5268_p12 }
  0xb9   : > { %p5274_p9 = pnand %p5272_p7, %p5269_p1 }
  0xbb   : > { %5277 = shalt.err (!%p5274_p9)
}
  0xbc   : > { %s5278_s16 = scalar_lea.vmem %s372_s10, 16  ;;  %s5285_s20 = scalar_lea.vmem %s372_s10, 32 }
  0xbd   : > { %p5279_p4 = scmp.ne.s32.totalorder %s372_s10, %s5278_s16  ;;  %p5286_p8 = scmp.lt.s32.totalorder %s372_s10, %s372_s10 }
  0xbe   : > { %p5287_p11 = scmp.lt.s32.totalorder %s5285_s20, %s5278_s16 }
  0xbf   : > { %p5281_p5 = pnand %p5279_p4, %p7049_p2 }
  0xc0   : > { %p5288_p13 = por %p5287_p11, %p5286_p8 }
  0xc1   : > { %p5282_p3 = pneg %p5281_p5 }
  0xc3   : > { %p5289_p0 = pnand %p5288_p13, %p5282_p3 }
  0xc5   : > { %5292 = shalt.err (!%p5289_p0)
}
  0xc6   : > { %4736 = dma.hbm_to_vmem [thread:$0]  (!%p7050_p10), %s6974_s9, 16, %s372_s10, [#allocation20]  }
  0xc7   : > { %s4201_s30 = sshll.u32 %s5513_s17, 10  ;;  %s7051_s11 = sshll.u32 %s5693_s22, 6 }
  0xc8   : > { %s404_s5 = scalar_lea.vmem [#allocation9], %s7051_s11  ;;  %s5867_s21 = scalar_lea.hbm %s6967_s2, %s4201_s30 }
  0xc9   : > { %s411_s7 = sshll.u32 %s404_s5, 4  ;;  %s5293_s24 = scalar_lea.hbm %s5867_s21, 1024  ;;  %s5869_s7 = int_to_ptr.vmem [resolvable:$true] %s411_s7 }
  0xca   : > { %p5294_p0 = scmp.ne.s32.totalorder %s5867_s21, %s5293_s24  ;;  %p7052_p2 = scmp.ne.s32.totalorder %s7042_s26, 0 }
  0xcb   : > { %s5298_s28 = scalar_lea.hbm %s6967_s2, 2048  ;;  %p5299_p12 = scmp.lt.u32.totalorder %s5867_s21, %s6967_s2 }
  0xcc   : > { %p5296_p10 = pnand %p5294_p0, %p7052_p2  ;;  %p5300_p1 = scmp.lt.u32.totalorder %s5298_s28, %s5293_s24 }
  0xcd   : > { %p5302_p9 = scmp.lt.u32.totalorder %s5293_s24, %s5867_s21 }
  0xce   : > { %p5297_p6 = pneg %p5296_p10  ;;  %p5301_p7 = por %p5300_p1, %p5299_p12 }
  0xd0   : > { %p5303_p4 = por %p5302_p9, %p5301_p7 }
  0xd2   : > { %p5304_p5 = pnand %p5303_p4, %p5297_p6 }
  0xd4   : > { %5307 = shalt.err (!%p5304_p5)
}
  0xd5   : > { %s5308_s16 = scalar_lea.vmem %s5869_s7, 1024  ;;  %s5529_s20 = smov [#allocation9]  }
  0xd6   : > { %p5309_p3 = scmp.ne.s32.totalorder %s5869_s7, %s5308_s16  ;;  %s5313_s18 = sshll.u32 %s5529_s20, 4  ;;  %s5314_s18 = int_to_ptr.vmem [resolvable:$false] %s5313_s18 }
  0xd7   : > { %s5315_s15 = scalar_lea.vmem %s5314_s18, 2048  ;;  %p5316_p13 = scmp.lt.s32.totalorder %s5869_s7, %s5314_s18 }
  0xd8   : > { %p5311_p8 = pnand %p5309_p3, %p7052_p2  ;;  %p5317_p0 = scmp.lt.s32.totalorder %s5315_s15, %s5308_s16 }
  0xda   : > { %p5312_p11 = pneg %p5311_p8  ;;  %p5318_p10 = por %p5317_p0, %p5316_p13 }
  0xdc   : > { %p5319_p12 = pnand %p5318_p10, %p5312_p11 }
  0xde   : > { %5322 = shalt.err (!%p5319_p12)
}
  0xdf   : > { %s5530_s11 = smov 64   ;;  %s5531_s5 = smov 4  }
  0xe0   : > { %p7053_p6 = scmp.ne.s32.totalorder %s7041_s25, 0  ;;  %s7054_s14 = scalar_lea.sflag [#allocation8], %s5690_s13 }
  0xe1   : > { %s5902_s10 = scalar_lea.hbm %s6969_s4, %s4201_s30  ;;  %s7055_s29 = sshll.u32 %s5693_s22, 6 }
  0xe2   : > { %4743 = dma.hbm_to_vmem [thread:$0]  (!%p7053_p6), %s5867_s21, 1024, %s5869_s7, %s7054_s14, %s5530_s11, %s5530_s11, %s5531_s5  }
  0xe3   : > { %s446_s28 = scalar_lea.vmem [#allocation12], %s7055_s29  ;;  %s5912_s20 = scalar_lea.hbm %s6971_s6, %s5782_s23 }
  0xe4   : > { %s453_s1 = sshll.u32 %s446_s28, 4  ;;  %s5323_s7 = scalar_lea.hbm %s5902_s10, 1024  ;;  %s5906_s1 = int_to_ptr.vmem [resolvable:$true] %s453_s1 }
  0xe5   : > { %p5324_p1 = scmp.ne.s32.totalorder %s5902_s10, %s5323_s7  ;;  %s5328_s21 = scalar_lea.hbm %s6969_s4, 2048 }
  0xe6   : > { %p5329_p4 = scmp.lt.u32.totalorder %s5902_s10, %s6969_s4  ;;  %p5330_p5 = scmp.lt.u32.totalorder %s5328_s21, %s5323_s7 }
  0xe7   : > { %p5326_p7 = pnand %p5324_p1, %p7052_p2  ;;  %p5332_p8 = scmp.lt.u32.totalorder %s5323_s7, %s5902_s10 }
  0xe8   : > { %p5331_p3 = por %p5330_p5, %p5329_p4 }
  0xe9   : > { %p5327_p9 = pneg %p5326_p7 }
  0xea   : > { %p5333_p11 = por %p5332_p8, %p5331_p3 }
  0xec   : > { %p5334_p13 = pnand %p5333_p11, %p5327_p9 }
  0xee   : > { %5337 = shalt.err (!%p5334_p13)
}
  0xef   : > { %s5338_s14 = scalar_lea.vmem %s5906_s1, 1024  ;;  %s5532_s19 = smov [#allocation12]  }
  0xf0   : > { %p5339_p0 = scmp.ne.s32.totalorder %s5906_s1, %s5338_s14  ;;  %s5343_s24 = sshll.u32 %s5532_s19, 4  ;;  %s5344_s24 = int_to_ptr.vmem [resolvable:$false] %s5343_s24 }
  0xf1   : > { %s5345_s29 = scalar_lea.vmem %s5344_s24, 2048  ;;  %p5346_p1 = scmp.lt.s32.totalorder %s5906_s1, %s5344_s24 }
  0xf2   : > { %p5341_p10 = pnand %p5339_p0, %p7052_p2  ;;  %p5347_p7 = scmp.lt.s32.totalorder %s5345_s29, %s5338_s14 }
  0xf4   : > { %p5342_p12 = pneg %p5341_p10  ;;  %p5348_p4 = por %p5347_p7, %p5346_p1 }
  0xf6   : > { %p5349_p5 = pnand %p5348_p4, %p5342_p12 }
  0xf8   : > { %5352 = shalt.err (!%p5349_p5)
}
  0xf9   : > { %s7056_s28 = scalar_lea.sflag [#allocation11], %s5690_s13  ;;  %s7057_s12 = sld [smem:[#allocation39_spill]] }
  0xfa   : > { %4749 = dma.hbm_to_vmem [thread:$0]  (!%p7053_p6), %s5902_s10, 1024, %s5906_s1, %s7056_s28, %s5530_s11, %s5530_s11, %s5531_s5  }
  0xfb   : > { %s7058_s21 = sld [smem:[#allocation61_spill]]  ;;  %s5353_s15 = scalar_lea.hbm %s5912_s20, 3072 }
  0xfc   : > { %p5354_p9 = scmp.ne.s32.totalorder %s5912_s20, %s5353_s15  ;;  %s5358_s24 = scalar_lea.hbm %s6971_s6, 6144 }
  0xfd   : > { %p5359_p11 = scmp.lt.u32.totalorder %s5912_s20, %s6971_s6  ;;  %p5360_p13 = scmp.lt.u32.totalorder %s5358_s24, %s5353_s15 }
  0xfe   : > { %p5356_p3 = pnand %p5354_p9, %p7052_p2  ;;  %p5362_p10 = scmp.lt.u32.totalorder %s5353_s15, %s5912_s20 }
  0xff   : > { %s488_s16 = scalar_lea.vmem [#allocation15], %s7057_s12  ;;  %p5361_p0 = por %p5360_p13, %p5359_p11 }
 0x100   : > { %s495_s7 = sshll.u32 %s488_s16, 4  ;;  %p5357_p8 = pneg %p5356_p3  ;;  %s5941_s7 = int_to_ptr.vmem [resolvable:$true] %s495_s7 }
 0x101   : > { %s5947_s18 = scalar_lea.hbm %s7058_s21, %s5782_s23  ;;  %p5363_p12 = por %p5362_p10, %p5361_p0 }
 0x103   : > { %p5364_p1 = pnand %p5363_p12, %p5357_p8 }
 0x105   : > { %5367 = shalt.err (!%p5364_p1)
}
 0x106   : > { %s5368_s23 = scalar_lea.vmem %s5941_s7, 3072  ;;  %s5533_s1 = smov [#allocation15]  }
 0x107   : > { %p5369_p7 = scmp.ne.s32.totalorder %s5941_s7, %s5368_s23  ;;  %s5373_s28 = sshll.u32 %s5533_s1, 4  ;;  %s5374_s28 = int_to_ptr.vmem [resolvable:$false] %s5373_s28 }
 0x108   : > { %s5375_s16 = scalar_lea.vmem %s5374_s28, 6144  ;;  %p5376_p9 = scmp.lt.s32.totalorder %s5941_s7, %s5374_s28 }
 0x109   : > { %p5371_p4 = pnand %p5369_p7, %p7052_p2  ;;  %p5377_p3 = scmp.lt.s32.totalorder %s5375_s16, %s5368_s23 }
 0x10b   : > { %p5372_p5 = pneg %p5371_p4  ;;  %p5378_p11 = por %p5377_p3, %p5376_p9 }
 0x10d   : > { %p5379_p13 = pnand %p5378_p11, %p5372_p5 }
 0x10f   : > { %5382 = shalt.err (!%p5379_p13)
}
 0x110   : > { %4755 = dma.hbm_to_vmem [thread:$0]  (!%p7053_p6), %s5912_s20, 3072, %s5941_s7, %s464_s8, %s5525_s3, %s5525_s3, %s5526_s27  }
 0x111   : > { %s509_s30 = scalar_lea.vmem [#allocation16], %s7057_s12  ;;  %s506_s15 = scalar_lea.sflag [#allocation17], %s5690_s13 }
 0x112   : > { %s516_s22 = sshll.u32 %s509_s30, 4  ;;  %s5383_s14 = scalar_lea.hbm %s5947_s18, 3072  ;;  %s5976_s22 = int_to_ptr.vmem [resolvable:$true] %s516_s22 }
 0x113   : > { %p5384_p8 = scmp.ne.s32.totalorder %s5947_s18, %s5383_s14  ;;  %s5388_s29 = scalar_lea.hbm %s7058_s21, 6144 }
 0x114   : > { %p5389_p12 = scmp.lt.u32.totalorder %s5947_s18, %s7058_s21  ;;  %p5390_p1 = scmp.lt.u32.totalorder %s5388_s29, %s5383_s14 }
 0x115   : > { %p5386_p0 = pnand %p5384_p8, %p7052_p2  ;;  %p5392_p4 = scmp.lt.u32.totalorder %s5383_s14, %s5947_s18 }
 0x116   : > { %p5391_p7 = por %p5390_p1, %p5389_p12 }
 0x117   : > { %p5387_p10 = pneg %p5386_p0 }
 0x118   : > { %p5393_p5 = por %p5392_p4, %p5391_p7 }
 0x11a   : > { %p5394_p9 = pnand %p5393_p5, %p5387_p10 }
 0x11c   : > { %5397 = shalt.err (!%p5394_p9)
}
 0x11d   : > { %s5398_s8 = scalar_lea.vmem %s5976_s22, 3072  ;;  %s5534_s3 = smov [#allocation16]  }
 0x11e   : > { %p5399_p3 = scmp.ne.s32.totalorder %s5976_s22, %s5398_s8  ;;  %s5403_s27 = sshll.u32 %s5534_s3, 4  ;;  %s5404_s27 = int_to_ptr.vmem [resolvable:$false] %s5403_s27 }
 0x11f   : > { %s5405_s20 = scalar_lea.vmem %s5404_s27, 6144  ;;  %p5406_p8 = scmp.lt.s32.totalorder %s5976_s22, %s5404_s27 }
 0x120   : > { %p5401_p11 = pnand %p5399_p3, %p7052_p2  ;;  %p5407_p0 = scmp.lt.s32.totalorder %s5405_s20, %s5398_s8 }
 0x122   : > { %p5402_p13 = pneg %p5401_p11  ;;  %p5408_p12 = por %p5407_p0, %p5406_p8 }
 0x124   : > { %p5409_p1 = pnand %p5408_p12, %p5402_p13 }
 0x126   : > { %5412 = shalt.err (!%p5409_p1)
}
 0x127   : > { %4758 = dma.hbm_to_vmem [thread:$0]  (!%p7053_p6), %s5947_s18, 3072, %s5976_s22, %s506_s15, %s5530_s11, %s5530_s11, %s5531_s5  }
 0x128   : > { %s7059_s26 = sld [smem:[#allocation36_spill]] }
 0x12e   : > { %p7060_p2 = scmp.ne.s32.totalorder %s7059_s26, 0 }
 0x130   : > { %528 = sbr.rel (%p7060_p2) target bundleno = 5231 (0x146f), region = 60 }
 0x137   : > { %s7061_s12 = sld [smem:[#allocation34_spill]] }
 0x13d   : > { %p7062_p10 = scmp.eq.s32.totalorder %s7061_s12, 0 }
 0x13f   : > { %5464 = dma.done.wait (%p7062_p10), [#allocation5], 512   ;;  %p7063_p7 = pmov %p7062_p10 }
 0x140   : > { %s7064_s7 = sld [smem:[#allocation30_spill]]  ;;  %s7065_s25 = sld [smem:[#allocation35_spill]] }
 0x141   : > { %5466 = vsyncadd (%p7063_p7), [#allocation5], 4294966784  ;;  %s534_s1 = sand.u32 1, %s7061_s12  }
 0x142   : > { %s535_s30 = scalar_lea.sflag [#allocation8], %s534_s1 }
 0x146   : > { %s536_s28 = sand.u32 1, %s7064_s7   ;;  %p7066_p4 = scmp.ne.s32.totalorder %s7065_s25, 0 }
 0x147   : > { %s4056_s16 = sshll.u32 %s536_s28, 3 }
 0x148   : > { %s6013_s13 = scalar_lea.vmem [#allocation7], %s4056_s16 }
 0x149   : > { %5468 = dma.done.wait (%p7066_p4), %s535_s30, 1152  }
 0x14a   : > { %5470 = vsyncadd (%p7066_p4), %s535_s30, 4294966144  ;;  %s4057_s11 = sshll.u32 %s536_s28, 6  ;;  %s4058_s5 = sshll.u32 %s536_s28, 7 }
 0x14b   : > { %s6019_s18 = scalar_lea.vmem [#allocation9], %s4057_s11  ;;  %s553_s22 = scalar_lea.sflag [#allocation11], %s534_s1 }
 0x14c   : > { %s6021_s15 = scalar_lea.vmem [#allocation10], %s4058_s5 }
 0x14d   : > { %5472 = dma.done.wait (%p7066_p4), %s553_s22, 3072  }
 0x14e   : > { %5474 = vsyncadd (%p7066_p4), %s553_s22, 4294964224  ;;  %s4696_s14 = smul.u32 192, %s536_s28  ;;  %s6027_s19 = scalar_lea.vmem [#allocation12], %s4057_s11 }
 0x14f   : > { %s571_s24 = scalar_lea.sflag [#allocation14], %s534_s1 }
 0x150   : > { %s6029_s29 = scalar_lea.vmem [#allocation13], %s4696_s14 }
 0x151   : > { %5476 = dma.done.wait (%p7066_p4), %s571_s24, 6144  }
 0x152   : > { %5478 = vsyncadd (%p7066_p4), %s571_s24, 4294961152  ;;  %s6035_s10 = scalar_lea.vmem [#allocation15], %s4696_s14  ;;  %s589_s23 = scalar_lea.sflag [#allocation17], %s534_s1 }
 0x153   : > { %s6037_s8 = scalar_lea.vmem [#allocation16], %s4696_s14 }
 0x154   : > { %5480 = dma.done.wait (%p7066_p4), %s589_s23, 3072  }
 0x155   : > { %5482 = vsyncadd (%p7066_p4), %s589_s23, 4294964224  ;;  %p7067_p6 = pmov %p7063_p7 }
 0x157   : > { %5484 = dma.done.wait (%p7067_p6), [#allocation17], 2048   ;;  %p7068_p5 = pmov %p7067_p6 }
 0x159   : > { %5486 = vsyncadd (%p7068_p5), [#allocation17], 4294965248  ;;  %p7069_p9 = pmov %p7068_p5 }
 0x15a   : > { %p7070_p3 = pmov %p7068_p5 }
 0x15b   : > { %5488 = dma.done.wait (%p7069_p9), [#allocation20], 16  }
 0x15c   : > { %5490 = vsyncadd (%p7070_p3), [#allocation20], 4294967280  ;;  %s7071_s3 = sld [smem:[#allocation32_spill]] }
 0x162   : > { %p4062_p11 = scmp.ne.s32.totalorder %s7071_s3, 0 }
 0x163   : > { %v669_v0 = vld [vmem:[#allocation4] sm:$0xff] (!%p4062_p11)  ;;  %v670_v1 = vld [vmem:[#allocation4 + $0x8] sm:$0xff] (!%p4062_p11)  ;;  %v671_v2 = vld [vmem:[#allocation4 + $0x10] sm:$0xff] (!%p4062_p11) }
 0x164   : > { %668 = sbr.rel (%p4062_p11) target bundleno = 363 (0x16b), region = 104  ;;  %673 = vst [vmem:[#allocation2] sm:$0xff] (!%p4062_p11), %v669_v0  ;;  %674 = vst [vmem:[#allocation2 + $0x8] sm:$0xff] (!%p4062_p11), %v670_v1  ;;  %v672_v3 = vld [vmem:[#allocation4 + $0x18] sm:$0xff] (!%p4062_p11) }
 0x165   : > { %675 = vst [vmem:[#allocation2 + $0x10] sm:$0xff] (!%p4062_p11), %v671_v2  ;;  %676 = vst [vmem:[#allocation2 + $0x18] sm:$0xff] (!%p4062_p11), %v672_v3 }
 0x16b PF: > { %v6052_v4 = vld [vmem:[#allocation2] sm:$0xff]  ;;  %v6056_v6 = vld [vmem:[#allocation2 + $0x8] sm:$0xff]  ;;  %v4834_v8 = vld [vmem:[%s6021_s15 + $0x4] ss:$8 sps:$4 sm:$0xff]   ;;  %v5535_v10 = vmov 0   ;;  %vm1245_vm0 = vcmask 261120  }
 0x16c   : > { %v6054_v5 = vld [vmem:[#allocation2 + $0x10] sm:$0xff]  ;;  %682 = vadd.xlane.f32.xlu0 %v6052_v4  ;;  %v6060_v7 = vld [vmem:[#allocation2 + $0x18] sm:$0xff]  ;;  %984 = vmatprep.mubr.bf16.mxu1 %v5535_v10  ;;  %v4837_v11 = vld [vmem:[%s6021_s15 + $0x14] ss:$8 sps:$4 sm:$0xff]   ;;  %v854_v30 = vpack.c.bf16 %v6056_v6, %v6052_v4  ;;  %vm5537_vm1 = vmmov 0   ;;  %vm1340_vm2 = vcmask 130048  }
 0x16d   : > { %686 = vadd.xlane.f32.xlu1 %v6054_v5  ;;  %v4836_v9 = vld [vmem:[%s6021_s15] ss:$8 sps:$4 sm:$0xff]   ;;  %952 = vmatprep.subr.bf16.mxu1 %v4834_v8  ;;  %v4839_v12 = vld [vmem:[%s6021_s15 + $0x10] ss:$8 sps:$4 sm:$0xff]   ;;  %v4840_v13 = vld [vmem:[%s6021_s15 + $0x24] ss:$8 sps:$4 sm:$0xff]   ;;  %v855_v38 = vpack.c.bf16 %v6060_v7, %v6054_v5 }
 0x16e   : > { %953 = vmatpush1.bf16.msra.mxu1 %v4836_v9  ;;  %v4842_v14 = vld [vmem:[%s6021_s15 + $0x20] ss:$8 sps:$4 sm:$0xff]   ;;  %v4843_v15 = vld [vmem:[%s6021_s15 + $0x34] ss:$8 sps:$4 sm:$0xff]   ;;  %v4845_v16 = vld [vmem:[%s6021_s15 + $0x30] ss:$8 sps:$4 sm:$0xff]  }
 0x16f   : > { %954 = vmatprep.subr.bf16.mxu1 %v4837_v11  ;;  %v4846_v17 = vld [vmem:[%s6021_s15 + $0x44] ss:$8 sps:$4 sm:$0xff]   ;;  %v4848_v18 = vld [vmem:[%s6021_s15 + $0x40] ss:$8 sps:$4 sm:$0xff]   ;;  %v4849_v19 = vld [vmem:[%s6021_s15 + $0x54] ss:$8 sps:$4 sm:$0xff]  }
 0x170   : > { %684 = vadd.xlane.f32.xlu0 %v6056_v6  ;;  %v4851_v20 = vld [vmem:[%s6021_s15 + $0x50] ss:$8 sps:$4 sm:$0xff]   ;;  %v4852_v21 = vld [vmem:[%s6021_s15 + $0x64] ss:$8 sps:$4 sm:$0xff]   ;;  %v4854_v22 = vld [vmem:[%s6021_s15 + $0x60] ss:$8 sps:$4 sm:$0xff]  }
 0x171   : > { %688 = vadd.xlane.f32.xlu1 %v6060_v7  ;;  %v4855_v23 = vld [vmem:[%s6021_s15 + $0x74] ss:$8 sps:$4 sm:$0xff]   ;;  %v1005_v24 = vld [vmem:[#allocation18] sm:$0xff]  ;;  %v1006_v25 = vld [vmem:[#allocation18 + $0x8] sm:$0xff]  ;;  %s5538_s27 = smov 96   ;;  %s5539_s20 = smov 64  }
 0x172   : > { %955 = vmatpush1.bf16.msra.mxu1 %v4839_v12  ;;  %v4857_v26 = vld [vmem:[%s6021_s15 + $0x70] ss:$8 sps:$4 sm:$0xff]   ;;  %v6081_v27 = vpack.c.bf16 %v1006_v25, %v1005_v24  ;;  %v4858_v31 = vld [vmem:[%s6019_s18] sm:$0xff]   ;;  %v1010_v33 = vld [vmem:[#allocation18 + $0x28] sm:$0xff]  ;;  %s5540_s26 = smov 32   ;;  %vm1743_vm3 = vcmask 523520  }
 0x173   : > { %956 = vmatprep.subr.bf16.mxu1 %v4840_v13  ;;  %v1007_v28 = vld [vmem:[#allocation18 + $0x10] sm:$0xff]  ;;  %v1008_v29 = vld [vmem:[#allocation18 + $0x18] sm:$0xff]  ;;  %v1009_v32 = vld [vmem:[#allocation18 + $0x20] sm:$0xff]  ;;  %4354 = vmatprep.subr.bf16.mxu0 %v4858_v31  ;;  %vm2006_vm4 = vcmask 785920   ;;  %vm2269_vm5 = vcmask 1048320   ;;  %s7109_s12 = sld [smem:[#allocation32_spill]] }
 0x174   : > { %v6087_v34 = vpack.c.bf16 %v1008_v29, %v1007_v28  ;;  %4355 = vmatpush3.bf16.msra.mxu0 %v4858_v31  ;;  %v1011_v35 = vld [vmem:[#allocation18 + $0x30] sm:$0xff]  ;;  %v1012_v36 = vld [vmem:[#allocation18 + $0x38] sm:$0xff]  ;;  %v6092_v37 = vpack.c.bf16 %v1010_v33, %v1009_v32  ;;  %v1013_v39 = vld [vmem:[#allocation18 + $0x40] sm:$0xff] }
 0x175   : > { %v1014_v40 = vld [vmem:[#allocation18 + $0x48] sm:$0xff]  ;;  %v6098_v41 = vpack.c.bf16 %v1012_v36, %v1011_v35  ;;  %v1015_v42 = vld [vmem:[#allocation18 + $0x50] sm:$0xff]  ;;  %v1016_v43 = vld [vmem:[#allocation18 + $0x58] sm:$0xff]  ;;  %v727_v35 = vlaneseq }
 0x176   : > { %957 = vmatpush1.bf16.msra.mxu1 %v4842_v14  ;;  %v6102_v44 = vpack.c.bf16 %v1014_v40, %v1013_v39  ;;  %v6106_v45 = vpack.c.bf16 %v1016_v43, %v1015_v42  ;;  %v1017_v62 = vld [vmem:[#allocation18 + $0x60] sm:$0xff]  ;;  %v1018_v63 = vld [vmem:[#allocation18 + $0x68] sm:$0xff]  ;;  %v1019_v2 = vld [vmem:[#allocation18 + $0x70] sm:$0xff] }
 0x177   : > { %958 = vmatprep.subr.bf16.mxu1 %v4843_v15  ;;  %v6131_v0 = vpack.c.bf16 %v1018_v63, %v1017_v62  ;;  %v4859_v1 = vld [vmem:[%s6019_s18 + $0x8] sm:$0xff]   ;;  %v1020_v3 = vld [vmem:[#allocation18 + $0x78] sm:$0xff]  ;;  %v4864_v9 = vld [vmem:[%s6019_s18 + $0x30] sm:$0xff]   ;;  %v6167_v42 = vshrl.u32 %v727_v35, 7 }
 0x178   : > { %4356 = vmatprep.subr.bf16.mxu0 %v4859_v1  ;;  %v4863_v8 = vld [vmem:[%s6019_s18 + $0x28] sm:$0xff]   ;;  %v4865_v11 = vld [vmem:[%s6019_s18 + $0x38] sm:$0xff]  }
 0x179   : > { %4357 = vmatpush3.bf16.msra.mxu0 %v4859_v1  ;;  %p4195_p13 = scmp.ne.s32.totalorder %s7109_s12, 1 }
 0x17a   : > { %959 = vmatpush1.bf16.msra.mxu1 %v4845_v16 }
 0x17b   : > { %960 = vmatprep.subr.bf16.mxu1 %v4846_v17 }
 0x17e   : > { %961 = vmatpush1.bf16.msra.mxu1 %v4848_v18 }
 0x17f   : > { %962 = vmatprep.subr.bf16.mxu1 %v4849_v19 }
 0x182   : > { %963 = vmatpush1.bf16.msra.mxu1 %v4851_v20 }
 0x183   : > { %964 = vmatprep.subr.bf16.mxu1 %v4852_v21 }
 0x186   : > { %965 = vmatpush1.bf16.msra.mxu1 %v4854_v22 }
 0x187   : > { %966 = vmatprep.subr.bf16.mxu1 %v4855_v23 }
 0x18a   : > { %967 = vmatpush1.bf16.msra.mxu1 %v4857_v26 }
 0x18b   : > { %4659 = vmatprep.subr.bf16.mxu1 %v6081_v27 }
 0x18d   : > { %985 = vmatmul.mubr.bf16.vlgmr.msra.gmra.mrb[0].mxu1 %v854_v30 }
 0x18e   : > { %994 = vmatprep.mubr.bf16.mxu1 %v5535_v10  ;;  %4661 = vmatpush3.bf16.msra.mxu1 %v6081_v27 }
 0x18f   : > { %4663 = vmatprep.subr.bf16.mxu1 %v6087_v34 }
 0x192   : > { %4665 = vmatpush3.bf16.msra.mxu1 %v6087_v34 }
 0x193   : > { %4667 = vmatprep.subr.bf16.mxu1 %v6092_v37 }
 0x195   : > { %995 = vmatmul.mubr.bf16.gmra.mrb[4].mxu1 %v855_v38 }
 0x196   : > { %4669 = vmatpush3.bf16.msra.mxu1 %v6092_v37 }
 0x197   : > { %4671 = vmatprep.subr.bf16.mxu1 %v6098_v41 }
 0x19a   : > { %4673 = vmatpush3.bf16.msra.mxu1 %v6098_v41 }
 0x19b   : > { %4675 = vmatprep.subr.bf16.mxu1 %v6102_v44 }
 0x19e   : > { %4677 = vmatpush3.bf16.msra.mxu1 %v6102_v44 }
 0x19f   : > { %4679 = vmatprep.subr.bf16.mxu1 %v6106_v45 }
 0x1a2   : > { %4681 = vmatpush3.bf16.msra.mxu1 %v6106_v45 }
 0x1a3   : > { %4683 = vmatprep.subr.bf16.mxu1 %v6131_v0 }
 0x1a6   : > { %4685 = vmatpush3.bf16.msra.mxu1 %v6131_v0 }
 0x1f9   : > { %v683_v46 = vpop.xlane.xlu0 %682 }
 0x1fa   : > { %v687_v47 = vpop.xlane.xlu1 %686  ;;  %v691_v48 = vmul.f32 0.0078125, %v683_v46  ;;  %v729_v46 = vsub.s32 0, %v6167_v42 }
 0x1fb   : > { %v693_v49 = vmul.f32 0.0078125, %v687_v47 }
 0x1fc   : > { %v6112_v50 = vsub.f32 %v6052_v4, %v691_v48  ;;  %v6136_v4 = vpack.c.bf16 %v1020_v3, %v1019_v2  ;;  %v6171_v48 = vld [vmem:[%s6013_s13] sm:$0xff] }
 0x1fd   : > { %v6115_v51 = vsub.f32 %v6054_v5, %v693_v49  ;;  %v685_v52 = vpop.xlane.xlu0 %684  ;;  %v4860_v5 = vld [vmem:[%s6019_s18 + $0x10] sm:$0xff]  }
 0x1fe   : > { %v689_v53 = vpop.xlane.xlu1 %688  ;;  %v692_v54 = vmul.f32 0.0078125, %v685_v52  ;;  %v699_v55 = vmul.f32 %v6112_v50, %v6112_v50  ;;  %4687 = vmatprep.subr.bf16.mxu1 %v6136_v4  ;;  %4358 = vmatprep.subr.bf16.mxu0 %v4860_v5  ;;  %v730_v52 = vrot.slane %v6171_v48, %v729_v46 }
 0x1ff   : > { %v694_v56 = vmul.f32 0.0078125, %v689_v53  ;;  %v701_v59 = vmul.f32 %v6115_v51, %v6115_v51  ;;  %4689 = vmatpush3.bf16.msra.mxu1 %v6136_v4  ;;  %4359 = vmatpush3.bf16.msra.mxu0 %v4860_v5 }
 0x200   : > { %v6120_v57 = vsub.f32 %v6056_v6, %v692_v54  ;;  %703 = vadd.xlane.f32.xlu0 %v699_v55  ;;  %v4861_v6 = vld [vmem:[%s6019_s18 + $0x18] sm:$0xff]  }
 0x201   : > { %v6123_v58 = vsub.f32 %v6060_v7, %v694_v56  ;;  %4360 = vmatprep.subr.bf16.mxu0 %v4861_v6  ;;  %v4862_v7 = vld [vmem:[%s6019_s18 + $0x20] sm:$0xff]  }
 0x202   : > { %v700_v60 = vmul.f32 %v6120_v57, %v6120_v57 }
 0x203   : > { %v702_v61 = vmul.f32 %v6123_v58, %v6123_v58  ;;  %4361 = vmatpush3.bf16.msra.mxu0 %v4861_v6 }
 0x204   : > { %707 = vadd.xlane.f32.xlu0 %v701_v59  ;;  %705 = vadd.xlane.f32.xlu1 %v700_v60 }
 0x205   : > { %4362 = vmatprep.subr.bf16.mxu0 %v4862_v7 }
 0x207   : > { %4363 = vmatpush3.bf16.msra.mxu0 %v4862_v7 }
 0x208   : > { %709 = vadd.xlane.f32.xlu1 %v702_v61  ;;  %4364 = vmatprep.subr.bf16.mxu0 %v4863_v8 }
 0x20b   : > { %4365 = vmatpush3.bf16.msra.mxu0 %v4863_v8 }
 0x20c   : > { %4366 = vmatprep.subr.bf16.mxu0 %v4864_v9 }
 0x20f   : > { %4367 = vmatpush3.bf16.msra.mxu0 %v4864_v9 }
 0x210   : > { %4368 = vmatprep.subr.bf16.mxu0 %v4865_v11 }
 0x213   : > { %4369 = vmatpush3.bf16.msra.mxu0 %v4865_v11 }
 0x214   : > { %4627 = vmatprep.subr.bf16.mxu0 %v6081_v27 }
 0x260   : > { %v6147_v12 = vpop.f32.mrb[0].mxu1 }
 0x261   : > { %v1110_v13 = vmul.f32 %v6147_v12, %v6147_v12  ;;  %v988_v14 = vpop.f32.mrb[1].mxu1 }
 0x262   : > { %v6151_v15 = vpop.f32.mrb[2].mxu1 }
 0x263   : > { %v1111_v16 = vmul.f32 %v6151_v15, %v6151_v15  ;;  %4444 = vmatprep.mubr.f32.mxu1 %v1110_v13  ;;  %v992_v17 = vpop.f32.mrb[3].mxu1 }
 0x264   : > { %v6155_v18 = vpack.c.bf16 %v992_v17, %v988_v14 }
 0x265   : > { %4445 = vmatmul.mubr.f32.vlgmr.msra.gmra.mrb[8].mxu1 %v1111_v16 }
 0x268   : > { %v6157_v19 = vpop.f32.mrb[4].mxu1 }
 0x269   : > { %v1112_v20 = vmul.f32 %v6157_v19, %v6157_v19  ;;  %v998_v21 = vpop.f32.mrb[5].mxu1 }
 0x26a   : > { %v6161_v22 = vpop.f32.mrb[6].mxu1 }
 0x26b   : > { %v1113_v23 = vmul.f32 %v6161_v22, %v6161_v22  ;;  %4447 = vmatprep.mubr.f32.mxu1 %v1112_v20  ;;  %v1002_v24 = vpop.f32.mrb[7].mxu1 }
 0x26c   : > { %v6165_v25 = vpack.c.bf16 %v1002_v24, %v998_v21 }
 0x26d   : > { %4448 = vmatmul.mubr.f32.gmra.mrb[10].mxu1 %v1113_v23 }
 0x28d   : > { %v704_v26 = vpop.xlane.xlu0 %703 }
 0x28e   : > { %v711_v28 = vmul.f32 0.0078125, %v704_v26 }
 0x290   : > { %v715_v29 = vadd.f32 1e-05, %v711_v28 }
 0x291   : > { %v706_v30 = vpop.xlane.xlu1 %705  ;;  %v708_v31 = vpop.xlane.xlu0 %707 }
 0x292   : > { %4962 = vrsqrt.f32 %v715_v29  ;;  %v712_v32 = vmul.f32 0.0078125, %v706_v30  ;;  %v713_v33 = vmul.f32 0.0078125, %v708_v31 }
 0x294   : > { %v716_v36 = vadd.f32 1e-05, %v712_v32  ;;  %v717_v38 = vadd.f32 1e-05, %v713_v33 }
 0x295   : > { %v710_v39 = vpop.xlane.xlu1 %709 }
 0x296   : > { %4964 = vrsqrt.f32 %v716_v36  ;;  %v714_v40 = vmul.f32 0.0078125, %v710_v39 }
 0x297   : > { %4966 = vrsqrt.f32 %v717_v38 }
 0x298   : > { %v718_v43 = vadd.f32 1e-05, %v714_v40 }
 0x29a   : > { %4968 = vrsqrt.f32 %v718_v43  ;;  %v1213_v43 = vsub.s32 3, %v6167_v42 }
 0x29c   : > { %v4963_v47 = vpop.eup %4962  ;;  %v1214_v46 = vrot.slane %v6171_v48, %v1213_v43 }
 0x29d   : > { %v723_v49 = vmul.f32 %v4963_v47, %v6112_v50 }
 0x29f   : > { %v731_v56 = vmul.f32 %v730_v52, %v723_v49 }
 0x2a0   : > { %v4965_v53 = vpop.eup %4964 }
 0x2a1   : > { %v4967_v54 = vpop.eup %4966  ;;  %v724_v55 = vmul.f32 %v4965_v53, %v6120_v57 }
 0x2a2   : > { %v725_v60 = vmul.f32 %v4967_v54, %v6115_v51 }
 0x2a3   : > { %v732_v59 = vmul.f32 %v730_v52, %v724_v55 }
 0x2a4   : > { %v4969_v61 = vpop.eup %4968  ;;  %v733_v1 = vmul.f32 %v730_v52, %v725_v60 }
 0x2a5   : > { %v739_v62 = vpack.c.bf16 %v732_v59, %v731_v56  ;;  %v726_v63 = vmul.f32 %v4969_v61, %v6123_v58 }
 0x2a7   : > { %4370 = vmatprep.mubr.bf16.mxu0 %v739_v62  ;;  %v734_v2 = vmul.f32 %v730_v52, %v726_v63 }
 0x2a9   : > { %v740_v3 = vpack.c.bf16 %v734_v2, %v733_v1 }
 0x2ab   : > { %4371 = vmatmul.mubr.bf16.vlgmr.msra.gmra.mrb[0].mxu0 %v740_v3 }
 0x2ac   : > { %4629 = vmatpush3.bf16.msra.mxu0 %v6081_v27  ;;  %v5536_v27 = vmov 0.0  }
 0x2ad   : > { %4631 = vmatprep.subr.bf16.mxu0 %v6087_v34  ;;  %4450 = vmatprep.subr.bf16.mxu1 %v5536_v27 }
 0x2ae   : > { %4452 = vmatprep.mubr.msk.bf16.mxu1 %vm5537_vm1, %v5536_v27 }
 0x2b0   : > { %4633 = vmatpush3.bf16.msra.mxu0 %v6087_v34 }
 0x2b1   : > { %4635 = vmatprep.subr.bf16.mxu0 %v6092_v37 }
 0x2b4   : > { %4637 = vmatpush3.bf16.msra.mxu0 %v6092_v37 }
 0x2b5   : > { %4639 = vmatprep.subr.bf16.mxu0 %v6098_v41 }
 0x2b8   : > { %4641 = vmatpush3.bf16.msra.mxu0 %v6098_v41 }
 0x2b9   : > { %4643 = vmatprep.subr.bf16.mxu0 %v6102_v44 }
 0x2bc   : > { %4645 = vmatpush3.bf16.msra.mxu0 %v6102_v44 }
 0x2bd   : > { %4647 = vmatprep.subr.bf16.mxu0 %v6106_v45 }
 0x2c0   : > { %4649 = vmatpush3.bf16.msra.mxu0 %v6106_v45  ;;  %v1233_v45 = vsub.s32 4, %v6167_v42 }
 0x2c1   : > { %4651 = vmatprep.subr.bf16.mxu0 %v6131_v0 }
 0x2c4   : > { %4653 = vmatpush3.bf16.msra.mxu0 %v6131_v0  ;;  %v1234_v0 = vrot.slane %v6171_v48, %v1233_v45 }
 0x2c5   : > { %4655 = vmatprep.subr.bf16.mxu0 %v6136_v4 }
 0x2c8   : > { %4657 = vmatpush3.bf16.msra.mxu0 %v6136_v4 }
 0x2c9   : > { %4462 = vmatprep.subr.bf16.mxu0 %v5536_v27 }
 0x338   : > { %v4446_v34 = vpop.f32.mrb[8].mxu1 }
 0x339   : > { %v1220_v37 = vmax.f32 %v4446_v34, 1e-24  ;;  %v1180_v41 = vpop.f32.mrb[9].mxu1 }
 0x33a   : > { %v1219_v44 = vmax.f32 %v1180_v41, 1e-24 }
 0x33b   : > { %4970 = vrsqrt.f32 %v1220_v37 }
 0x33c   : > { %4972 = vrsqrt.f32 %v1219_v44 }
 0x340   : > { %v4449_v50 = vpop.f32.mrb[10].mxu1 }
 0x341   : > { %v1222_v51 = vmax.f32 %v4449_v50, 1e-24  ;;  %v1190_v57 = vpop.f32.mrb[11].mxu1 }
 0x342   : > { %v1221_v58 = vmax.f32 %v1190_v57, 1e-24 }
 0x343   : > { %4974 = vrsqrt.f32 %v1222_v51 }
 0x344   : > { %4976 = vrsqrt.f32 %v1221_v58 }
 0x345   : > { %v4971_v4 = vpop.eup %4970 }
 0x346   : > { %v4973_v5 = vpop.eup %4972  ;;  %v1228_v6 = vmul.f32 %v4971_v4, %v6151_v15 }
 0x347   : > { %v1227_v7 = vmul.f32 %v4973_v5, %v6147_v12 }
 0x348   : > { %v1236_v8 = vmul.f32 %v1234_v0, %v1228_v6 }
 0x349   : > { %v1235_v9 = vmul.f32 %v1234_v0, %v1227_v7 }
 0x34b   : > { %v6199_v11 = vpack.c.bf16 %v1236_v8, %v1235_v9 }
 0x34d   : > { %v4975_v13 = vpop.eup %4974  ;;  %v1250_v14 = vsel %vm1245_vm0, %v6199_v11, 0 }
 0x34e   : > { %v4977_v16 = vpop.eup %4976  ;;  %4451 = vmatpush3.bf16.xpose.msra.mxu1 %v1250_v14  ;;  %v1230_v17 = vmul.f32 %v4975_v13, %v6161_v22 }
 0x34f   : > { %v1229_v20 = vmul.f32 %v4977_v16, %v6157_v19  ;;  %4456 = vmatprep.subr.bf16.mxu1 %v5536_v27 }
 0x350   : > { %v1238_v15 = vmul.f32 %v1234_v0, %v1230_v17 }
 0x351   : > { %v1237_v21 = vmul.f32 %v1234_v0, %v1229_v20 }
 0x353   : > { %v6206_v12 = vpack.c.bf16 %v1238_v15, %v1237_v21 }
 0x355   : > { %v1297_v1 = vsel %vm1245_vm0, %v6206_v12, 0 }
 0x37e   : > { %v4372_v23 = vpop.f32.mrb[0].mxu0 }
 0x37f   : > { %v839_v24 = vpop.f32.mrb[1].mxu0  ;;  %v1023_v31 = vmul.f32 %v4372_v23, %v4372_v23 }
 0x380   : > { %v1021_v26 = vmul.f32 %v839_v24, %v839_v24  ;;  %v4373_v28 = vpop.f32.mrb[2].mxu0 }
 0x381   : > { %v842_v29 = vpop.f32.mrb[3].mxu0  ;;  %v1024_v22 = vmul.f32 %v4373_v28, %v4373_v28 }
 0x382   : > { %v1022_v30 = vmul.f32 %v842_v29, %v842_v29  ;;  %4406 = vmatprep.mubr.f32.mxu0 %v1021_v26 }
 0x384   : > { %4407 = vmatmul.mubr.f32.vlgmr.msra.gmra.mrb[4].mxu0 %v1022_v30 }
 0x385   : > { %4463 = vmatpush3.bf16.msra.mxu0 %v6155_v18  ;;  %4409 = vmatprep.mubr.f32.mxu0 %v1023_v31 }
 0x386   : > { %4474 = vmatprep.subr.bf16.mxu0 %v5536_v27 }
 0x388   : > { %4410 = vmatmul.mubr.f32.gmra.mrb[6].mxu0 %v1024_v22 }
 0x389   : > { %4464 = vmatprep.mubr.msk.bf16.mxu0 %vm5537_vm1, %v5536_v27 }
 0x457   : > { %v4408_v19 = vpop.f32.mrb[4].mxu0 }
 0x458   : > { %v1200_v32 = vmax.f32 %v4408_v19, 1e-24  ;;  %v1091_v33 = vpop.f32.mrb[5].mxu0 }
 0x459   : > { %v1199_v35 = vmax.f32 %v1091_v33, 1e-24 }
 0x45a   : > { %4978 = vrsqrt.f32 %v1200_v32 }
 0x45b   : > { %4980 = vrsqrt.f32 %v1199_v35  ;;  %v4411_v36 = vpop.f32.mrb[6].mxu0 }
 0x45c   : > { %v1202_v38 = vmax.f32 %v4411_v36, 1e-24  ;;  %v1101_v39 = vpop.f32.mrb[7].mxu0 }
 0x45d   : > { %v1201_v40 = vmax.f32 %v1101_v39, 1e-24 }
 0x45e   : > { %4982 = vrsqrt.f32 %v1202_v38 }
 0x45f   : > { %4984 = vrsqrt.f32 %v1201_v40 }
 0x464   : > { %v4979_v47 = vpop.eup %4978 }
 0x465   : > { %v4981_v49 = vpop.eup %4980  ;;  %v1208_v52 = vmul.f32 %v4979_v47, %v842_v29 }
 0x466   : > { %v1207_v53 = vmul.f32 %v4981_v49, %v839_v24 }
 0x467   : > { %v1216_v54 = vmul.f32 %v1214_v46, %v1208_v52 }
 0x468   : > { %v4983_v55 = vpop.eup %4982  ;;  %v1215_v56 = vmul.f32 %v1214_v46, %v1207_v53 }
 0x469   : > { %v4985_v59 = vpop.eup %4984  ;;  %v1210_v60 = vmul.f32 %v4983_v55, %v4373_v28 }
 0x46a   : > { %v6216_v61 = vpack.c.bf16 %v1216_v54, %v1215_v56  ;;  %v1209_v62 = vmul.f32 %v4985_v59, %v4372_v23 }
 0x46b   : > { %v1218_v63 = vmul.f32 %v1214_v46, %v1210_v60 }
 0x46c   : > { %4453 = vmatmul.mubr.msk.bf16.vlgmr.msra.gmra.mrb[12].mxu1 %vm1245_vm0, %v6216_v61  ;;  %v1217_v48 = vmul.f32 %v1214_v46, %v1209_v62 }
 0x46d   : > { %4457 = vmatpush3.bf16.xpose.msra.mxu1 %v1297_v1  ;;  %4458 = vmatprep.mubr.msk.bf16.mxu1 %vm5537_vm1, %v5536_v27 }
 0x46e   : > { %4468 = vmatprep.subr.bf16.mxu1 %v5536_v27  ;;  %v6225_v2 = vpack.c.bf16 %v1218_v63, %v1217_v48 }
 0x474   : > { %4459 = vmatmul.mubr.msk.bf16.vlgmr.msra.gmra.mrb[16].mxu1 %vm1245_vm0, %v6225_v2 }
 0x475   : > { %4469 = vmatpush3.bf16.msra.mxu1 %v6165_v25  ;;  %4470 = vmatprep.mubr.msk.bf16.mxu1 %vm5537_vm1, %v5536_v27 }
 0x476   : > { %4480 = vmatprep.subr.bf16.mxu1 %v5536_v27 }
 0x53f   : > { %v1286_v3 = vpop.f32.mrb[12].mxu1 }
 0x540   : > { %v4454_v34 = vpop.f32.mrb[13].mxu1  ;;  %v1341_v37 = vsel %vm1340_vm2, %v1286_v3, -inf }
 0x541   : > { %1342 = vmax.xlane.f32.xlu0 %v1341_v37  ;;  %v1289_v41 = vpop.f32.mrb[14].mxu1 }
 0x542   : > { %v4455_v44 = vpop.f32.mrb[15].mxu1  ;;  %v1344_v45 = vsel %vm1340_vm2, %v1289_v41, -inf }
 0x543   : > { %1345 = vmax.xlane.f32.xlu1 %v1344_v45 }
 0x547   : > { %v1333_v50 = vpop.f32.mrb[16].mxu1 }
 0x548   : > { %v4460_v51 = vpop.f32.mrb[17].mxu1  ;;  %v1347_v57 = vsel %vm1340_vm2, %v1333_v50, -inf }
 0x549   : > { %1348 = vmax.xlane.f32.xlu0 %v1347_v57  ;;  %v1336_v58 = vpop.f32.mrb[18].mxu1 }
 0x54a   : > { %v4461_v0 = vpop.f32.mrb[19].mxu1  ;;  %v1350_v4 = vsel %vm1340_vm2, %v1336_v58, -inf }
 0x54b   : > { %1351 = vmax.xlane.f32.xlu1 %v1350_v4 }
 0x5ce   : > { %v1343_v5 = vpop.xlane.xlu0 %1342 }
 0x5cf   : > { %v1353_v6 = vsub.f32 %v1286_v3, %v1343_v5 }
 0x5d0   : > { %v1346_v7 = vpop.xlane.xlu1 %1345 }
 0x5d1   : > { %v1357_v8 = vmul.f32 1.442695, %v1353_v6  ;;  %v1354_v9 = vsub.f32 %v1289_v41, %v1346_v7 }
 0x5d3   : > { %4986 = vpow2.f32 %v1357_v8  ;;  %v1359_v13 = vmul.f32 1.442695, %v1354_v9 }
 0x5d5   : > { %4988 = vpow2.f32 %v1359_v13 }
 0x5d6   : > { %v1349_v14 = vpop.xlane.xlu0 %1348 }
 0x5d7   : > { %v1355_v16 = vsub.f32 %v1333_v50, %v1349_v14 }
 0x5d8   : > { %v1352_v28 = vpop.xlane.xlu1 %1351 }
 0x5d9   : > { %v1361_v17 = vmul.f32 1.442695, %v1355_v16  ;;  %v1356_v29 = vsub.f32 %v1336_v58, %v1352_v28 }
 0x5db   : > { %4990 = vpow2.f32 %v1361_v17  ;;  %v1363_v30 = vmul.f32 1.442695, %v1356_v29 }
 0x5dd   : > { %v4987_v20 = vpop.eup %4986  ;;  %4992 = vpow2.f32 %v1363_v30 }
 0x5de   : > { %v1365_v15 = vsel %vm1340_vm2, %v4987_v20, 0.0 }
 0x5df   : > { %v4989_v21 = vpop.eup %4988  ;;  %1366 = vadd.xlane.f32.xlu0 %v1365_v15 }
 0x5e0   : > { %v1368_v23 = vsel %vm1340_vm2, %v4989_v21, 0.0 }
 0x5e1   : > { %1369 = vadd.xlane.f32.xlu1 %v1368_v23 }
 0x5e5   : > { %v4991_v24 = vpop.eup %4990 }
 0x5e6   : > { %v1371_v26 = vsel %vm1340_vm2, %v4991_v24, 0.0 }
 0x5e7   : > { %1372 = vadd.xlane.f32.xlu0 %v1371_v26  ;;  %v4993_v31 = vpop.eup %4992 }
 0x5e8   : > { %v1374_v22 = vsel %vm1340_vm2, %v4993_v31, 0.0 }
 0x5f2   : > { %1536 = vrot.lane.b32.xlu1 %v6206_v12, %s5538_s27 }
 0x5fd   : > { %1483 = vrot.lane.b32.xlu0 %v6199_v11, %s5538_s27 }
 0x616   : > { %1375 = vadd.xlane.f32.xlu1 %v1374_v22 }
 0x627   : > { %1480 = vrot.lane.b32.xlu1 %v6216_v61, %s5538_s27 }
 0x62b   : > { %1533 = vrot.lane.b32.xlu1 %v6225_v2, %s5538_s27 }
 0x66c   : > { %v1367_v19 = vpop.xlane.xlu0 %1366 }
 0x66d   : > { %4994 = vrcp.f32 %v1367_v19 }
 0x66e   : > { %v1370_v32 = vpop.xlane.xlu1 %1369 }
 0x66f   : > { %4996 = vrcp.f32 %v1370_v32 }
 0x672   : > { %v1537_v47 = vpop.permute.xlu1 %1536 }
 0x673   : > { %v1542_v60 = vsel %vm1245_vm0, %v1537_v47, 0 }
 0x674   : > { %v1373_v33 = vpop.xlane.xlu0 %1372 }
 0x675   : > { %4998 = vrcp.f32 %v1373_v33 }
 0x677   : > { %v4995_v35 = vpop.eup %4994 }
 0x678   : > { %v1381_v38 = vmul.f32 %v4995_v35, %v4987_v20  ;;  %v1484_v40 = vpop.permute.xlu0 %1483 }
 0x679   : > { %v4997_v36 = vpop.eup %4996  ;;  %v1489_v46 = vsel %vm1245_vm0, %v1484_v40, 0 }
 0x67a   : > { %v1382_v39 = vmul.f32 %v4997_v36, %v4989_v21 }
 0x67c   : > { %v1385_v43 = vpack.c.bf16 %v1382_v39, %v1381_v38 }
 0x67e   : > { %4465 = vmatmul.mubr.msk.bf16.vlgmr.msra.gmra.mrb[8].mxu0 %vm1340_vm2, %v1385_v43 }
 0x67f   : > { %4475 = vmatpush3.bf16.xpose.msra.mxu0 %v1489_v46  ;;  %4476 = vmatprep.mubr.msk.bf16.mxu0 %vm5537_vm1, %v5536_v27  ;;  %v4999_v53 = vpop.eup %4998 }
 0x680   : > { %4486 = vmatprep.subr.bf16.mxu0 %v5536_v27  ;;  %v1383_v55 = vmul.f32 %v4999_v53, %v4991_v24 }
 0x6a3   : > { %v1376_v49 = vpop.xlane.xlu1 %1375 }
 0x6a4   : > { %5000 = vrcp.f32 %v1376_v49 }
 0x6a7   : > { %v1481_v52 = vpop.permute.xlu1 %1480 }
 0x6a8   : > { %4477 = vmatmul.mubr.msk.bf16.vlgmr.msra.gmra.mrb[12].mxu0 %vm1245_vm0, %v1481_v52 }
 0x6a9   : > { %4488 = vmatprep.mubr.msk.bf16.mxu0 %vm5537_vm1, %v5536_v27 }
 0x6ab   : > { %v1534_v62 = vpop.permute.xlu1 %1533 }
 0x6ae   : > { %v5001_v54 = vpop.eup %5000 }
 0x6af   : > { %v1384_v56 = vmul.f32 %v5001_v54, %v4993_v31 }
 0x6b1   : > { %v1386_v59 = vpack.c.bf16 %v1384_v56, %v1383_v55 }
 0x6b3   : > { %4471 = vmatmul.mubr.msk.bf16.vlgmr.msra.gmra.mrb[20].mxu1 %vm1340_vm2, %v1386_v59 }
 0x6b4   : > { %4481 = vmatpush3.bf16.xpose.msra.mxu1 %v1542_v60  ;;  %4482 = vmatprep.mubr.msk.bf16.mxu1 %vm5537_vm1, %v5536_v27 }
 0x6b5   : > { %4492 = vmatprep.subr.bf16.mxu1 %v5536_v27 }
 0x6bb   : > { %4483 = vmatmul.mubr.msk.bf16.vlgmr.msra.gmra.mrb[24].mxu1 %vm1245_vm0, %v1534_v62 }
 0x6bc   : > { %4494 = vmatprep.mubr.msk.bf16.mxu1 %vm5537_vm1, %v5536_v27 }
 0x751   : > { %v1424_v63 = vpop.f32.mrb[8].mxu0 }
 0x752   : > { %1475 = vst.msk [vmem:[#allocation3] sm:$0xff] %vm1245_vm0, %v1424_v63  ;;  %v4466_v1 = vpop.f32.mrb[9].mxu0 }
 0x753   : > { %v1427_v48 = vpop.f32.mrb[10].mxu0 }
 0x754   : > { %1476 = vst.msk [vmem:[#allocation3 + $0x8] sm:$0xff] %vm1245_vm0, %v1427_v48  ;;  %v4467_v3 = vpop.f32.mrb[11].mxu0 }
 0x77b   : > { %v1525_v34 = vpop.f32.mrb[12].mxu0 }
 0x77c   : > { %v4478_v37 = vpop.f32.mrb[13].mxu0  ;;  %v1585_v41 = vsel %vm1340_vm2, %v1525_v34, -inf }
 0x77d   : > { %1586 = vmax.xlane.f32.xlu0 %v1585_v41  ;;  %v1528_v44 = vpop.f32.mrb[14].mxu0 }
 0x77e   : > { %v4479_v45 = vpop.f32.mrb[15].mxu0  ;;  %v1588_v50 = vsel %vm1340_vm2, %v1528_v44, -inf }
 0x77f   : > { %1589 = vmax.xlane.f32.xlu1 %v1588_v50 }
 0x786   : > { %v1468_v51 = vpop.f32.mrb[20].mxu1 }
 0x787   : > { %1477 = vst.msk [vmem:[#allocation3 + $0x10] sm:$0xff] %vm1245_vm0, %v1468_v51  ;;  %v4472_v57 = vpop.f32.mrb[21].mxu1 }
 0x788   : > { %v1471_v58 = vpop.f32.mrb[22].mxu1 }
 0x789   : > { %1478 = vst.msk [vmem:[#allocation3 + $0x18] sm:$0xff] %vm1245_vm0, %v1471_v58  ;;  %v4473_v0 = vpop.f32.mrb[23].mxu1 }
 0x78e   : > { %v1578_v4 = vpop.f32.mrb[24].mxu1 }
 0x78f   : > { %v4484_v5 = vpop.f32.mrb[25].mxu1  ;;  %v1591_v6 = vsel %vm1340_vm2, %v1578_v4, -inf }
 0x790   : > { %1592 = vmax.xlane.f32.xlu0 %v1591_v6  ;;  %v1581_v7 = vpop.f32.mrb[26].mxu1 }
 0x791   : > { %v4485_v8 = vpop.f32.mrb[27].mxu1  ;;  %v1594_v9 = vsel %vm1340_vm2, %v1581_v7, -inf }
 0x794   : > { %1595 = vmax.xlane.f32.xlu0 %v1594_v9 }
 0x80a   : > { %v1587_v13 = vpop.xlane.xlu0 %1586 }
 0x80b   : > { %v1597_v14 = vsub.f32 %v1525_v34, %v1587_v13 }
 0x80c   : > { %v1590_v16 = vpop.xlane.xlu1 %1589 }
 0x80d   : > { %v1601_v17 = vmul.f32 1.442695, %v1597_v14  ;;  %v1598_v20 = vsub.f32 %v1528_v44, %v1590_v16 }
 0x80f   : > { %5002 = vpow2.f32 %v1601_v17  ;;  %v1603_v15 = vmul.f32 1.442695, %v1598_v20 }
 0x811   : > { %5004 = vpow2.f32 %v1603_v15 }
 0x819   : > { %v5003_v21 = vpop.eup %5002 }
 0x81a   : > { %v1609_v23 = vsel %vm1340_vm2, %v5003_v21, 0.0 }
 0x81b   : > { %v5005_v24 = vpop.eup %5004  ;;  %1610 = vadd.xlane.f32.xlu0 %v1609_v23 }
 0x81c   : > { %v1612_v26 = vsel %vm1340_vm2, %v5005_v24, 0.0 }
 0x81d   : > { %1613 = vadd.xlane.f32.xlu1 %v1612_v26  ;;  %v1593_v28 = vpop.xlane.xlu0 %1592 }
 0x81e   : > { %v1599_v29 = vsub.f32 %v1578_v4, %v1593_v28 }
 0x820   : > { %v1605_v30 = vmul.f32 1.442695, %v1599_v29 }
 0x821   : > { %v1596_v19 = vpop.xlane.xlu0 %1595 }
 0x822   : > { %5006 = vpow2.f32 %v1605_v30  ;;  %v1600_v32 = vsub.f32 %v1581_v7, %v1596_v19 }
 0x824   : > { %v1607_v33 = vmul.f32 1.442695, %v1600_v32 }
 0x826   : > { %5008 = vpow2.f32 %v1607_v33 }
 0x82c   : > { %v5007_v31 = vpop.eup %5006 }
 0x82d   : > { %v1615_v22 = vsel %vm1340_vm2, %v5007_v31, 0.0 }
 0x82e   : > { %1680 = vrot.lane.b32.xlu1 %v6165_v25, %s5538_s27  ;;  %1616 = vadd.xlane.f32.xlu0 %v1615_v22 }
 0x830   : > { %v5009_v35 = vpop.eup %5008 }
 0x831   : > { %v1618_v36 = vsel %vm1340_vm2, %v5009_v35, 0.0 }
 0x832   : > { %1750 = vrot.lane.b32.xlu1 %v6199_v11, %s5539_s20 }
 0x844   : > { %1632 = vrot.lane.b32.xlu0 %v6155_v18, %s5538_s27 }
 0x848   : > { %1748 = vrot.lane.b32.xlu0 %v6216_v61, %s5539_s20 }
 0x856   : > { %1619 = vadd.xlane.f32.xlu1 %v1618_v36 }
 0x867   : > { %1801 = vrot.lane.b32.xlu1 %v6206_v12, %s5539_s20 }
 0x86b   : > { %1799 = vrot.lane.b32.xlu1 %v6225_v2, %s5539_s20 }
 0x8a8   : > { %v1611_v40 = vpop.xlane.xlu0 %1610 }
 0x8aa   : > { %v1614_v38 = vpop.xlane.xlu1 %1613 }
 0x8ab   : > { %5010 = vrcp.f32 %v1614_v38 }
 0x8ac   : > { %5012 = vrcp.f32 %v1611_v40 }
 0x8ae   : > { %v1681_v39 = vpop.permute.xlu1 %1680 }
 0x8af   : > { %4493 = vmatpush3.bf16.msra.mxu1 %v1681_v39 }
 0x8b0   : > { %4504 = vmatprep.subr.bf16.mxu1 %v5536_v27 }
 0x8b2   : > { %v1751_v55 = vpop.permute.xlu1 %1750 }
 0x8b3   : > { %v1756_v56 = vsel %vm1245_vm0, %v1751_v55, 0 }
 0x8b5   : > { %v5011_v43 = vpop.eup %5010 }
 0x8b6   : > { %v5013_v47 = vpop.eup %5012  ;;  %v1626_v49 = vmul.f32 %v5011_v43, %v5005_v24 }
 0x8b7   : > { %v1625_v52 = vmul.f32 %v5013_v47, %v5003_v21 }
 0x8b9   : > { %v1629_v54 = vpack.c.bf16 %v1626_v49, %v1625_v52 }
 0x8bb   : > { %v1617_v46 = vpop.xlane.xlu0 %1616 }
 0x8bc   : > { %5014 = vrcp.f32 %v1617_v46 }
 0x8bf   : > { %v1633_v53 = vpop.permute.xlu0 %1632 }
 0x8c0   : > { %4487 = vmatpush3.bf16.msra.mxu0 %v1633_v53 }
 0x8c1   : > { %4498 = vmatprep.subr.bf16.mxu0 %v5536_v27 }
 0x8c3   : > { %4489 = vmatmul.mubr.msk.bf16.vlgmr.msra.gmra.mrb[16].mxu0 %vm1340_vm2, %v1629_v54  ;;  %v1749_v59 = vpop.permute.xlu0 %1748 }
 0x8c4   : > { %4500 = vmatprep.mubr.msk.bf16.mxu0 %vm5537_vm1, %v5536_v27 }
 0x8c6   : > { %v5015_v62 = vpop.eup %5014 }
 0x8c7   : > { %v1627_v1 = vmul.f32 %v5015_v62, %v5007_v31 }
 0x8c9   : > { %4499 = vmatpush3.bf16.xpose.msra.mxu0 %v1756_v56 }
 0x8ca   : > { %4510 = vmatprep.subr.bf16.mxu0 %v5536_v27 }
 0x8d0   : > { %4501 = vmatmul.mubr.msk.bf16.vlgmr.msra.gmra.mrb[20].mxu0 %vm1245_vm0, %v1749_v59 }
 0x8d1   : > { %4512 = vmatprep.mubr.msk.bf16.mxu0 %vm5537_vm1, %v5536_v27 }
 0x8e3   : > { %v1620_v60 = vpop.xlane.xlu1 %1619 }
 0x8e4   : > { %5016 = vrcp.f32 %v1620_v60 }
 0x8e7   : > { %v1802_v3 = vpop.permute.xlu1 %1801 }
 0x8e8   : > { %v1807_v37 = vsel %vm1245_vm0, %v1802_v3, 0 }
 0x8eb   : > { %v1800_v41 = vpop.permute.xlu1 %1799 }
 0x8ee   : > { %v5017_v63 = vpop.eup %5016 }
 0x8ef   : > { %v1628_v48 = vmul.f32 %v5017_v63, %v5009_v35 }
 0x8f1   : > { %v1630_v34 = vpack.c.bf16 %v1628_v48, %v1627_v1 }
 0x8f3   : > { %4495 = vmatmul.mubr.msk.bf16.vlgmr.msra.gmra.mrb[28].mxu1 %vm1340_vm2, %v1630_v34 }
 0x8f4   : > { %4505 = vmatpush3.bf16.xpose.msra.mxu1 %v1807_v37  ;;  %4506 = vmatprep.mubr.msk.bf16.mxu1 %vm5537_vm1, %v5536_v27 }
 0x8f5   : > { %4516 = vmatprep.subr.bf16.mxu1 %v5536_v27 }
 0x8fb   : > { %4507 = vmatmul.mubr.msk.bf16.vlgmr.msra.gmra.mrb[32].mxu1 %vm1245_vm0, %v1800_v41 }
 0x8fc   : > { %4518 = vmatprep.mubr.msk.bf16.mxu1 %vm5537_vm1, %v5536_v27 }
 0x996   : > { %v6307_v44 = vpop.f32.mrb[16].mxu0 }
 0x997   : > { %v4490_v45 = vpop.f32.mrb[17].mxu0 }
 0x998   : > { %v6309_v50 = vpop.f32.mrb[18].mxu0 }
 0x999   : > { %v4491_v51 = vpop.f32.mrb[19].mxu0 }
 0x9a3   : > { %v1792_v57 = vpop.f32.mrb[20].mxu0 }
 0x9a4   : > { %v4502_v58 = vpop.f32.mrb[21].mxu0  ;;  %v1850_v0 = vsel %vm1340_vm2, %v1792_v57, -inf }
 0x9a5   : > { %1851 = vmax.xlane.f32.xlu0 %v1850_v0  ;;  %v1795_v4 = vpop.f32.mrb[22].mxu0 }
 0x9a6   : > { %v4503_v5 = vpop.f32.mrb[23].mxu0  ;;  %v1853_v6 = vsel %vm1340_vm2, %v1795_v4, -inf }
 0x9a7   : > { %1854 = vmax.xlane.f32.xlu1 %v1853_v6 }
 0x9c6   : > { %v6313_v7 = vpop.f32.mrb[28].mxu1 }
 0x9c7   : > { %v4496_v8 = vpop.f32.mrb[29].mxu1 }
 0x9c8   : > { %v6315_v9 = vpop.f32.mrb[30].mxu1 }
 0x9c9   : > { %v4497_v13 = vpop.f32.mrb[31].mxu1 }
 0x9ce   : > { %v1843_v14 = vpop.f32.mrb[32].mxu1 }
 0x9cf   : > { %v4508_v16 = vpop.f32.mrb[33].mxu1  ;;  %v1856_v17 = vsel %vm1340_vm2, %v1843_v14, -inf }
 0x9d0   : > { %1857 = vmax.xlane.f32.xlu0 %v1856_v17  ;;  %v1846_v20 = vpop.f32.mrb[34].mxu1 }
 0x9d1   : > { %v4509_v15 = vpop.f32.mrb[35].mxu1  ;;  %v1859_v21 = vsel %vm1340_vm2, %v1846_v20, -inf }
 0x9d4   : > { %1860 = vmax.xlane.f32.xlu0 %v1859_v21 }
 0xa32   : > { %v1852_v23 = vpop.xlane.xlu0 %1851 }
 0xa33   : > { %v1862_v24 = vsub.f32 %v1792_v57, %v1852_v23 }
 0xa34   : > { %v1855_v26 = vpop.xlane.xlu1 %1854 }
 0xa35   : > { %v1866_v28 = vmul.f32 1.442695, %v1862_v24  ;;  %v1863_v29 = vsub.f32 %v1795_v4, %v1855_v26 }
 0xa37   : > { %5018 = vpow2.f32 %v1866_v28  ;;  %v1868_v30 = vmul.f32 1.442695, %v1863_v29 }
 0xa39   : > { %5020 = vpow2.f32 %v1868_v30 }
 0xa41   : > { %v5019_v31 = vpop.eup %5018 }
 0xa42   : > { %v1874_v22 = vsel %vm1340_vm2, %v5019_v31, 0.0 }
 0xa43   : > { %v5021_v19 = vpop.eup %5020  ;;  %1875 = vadd.xlane.f32.xlu0 %v1874_v22 }
 0xa44   : > { %v1877_v32 = vsel %vm1340_vm2, %v5021_v19, 0.0 }
 0xa45   : > { %1878 = vadd.xlane.f32.xlu1 %v1877_v32 }
 0xa56   : > { %1943 = vrot.lane.b32.xlu1 %v6165_v25, %s5539_s20 }
 0xa5a   : > { %2013 = vrot.lane.b32.xlu1 %v6199_v11, %s5540_s26 }
 0xa5d   : > { %v1858_v33 = vpop.xlane.xlu0 %1857 }
 0xa5e   : > { %v1864_v35 = vsub.f32 %v1843_v14, %v1858_v33 }
 0xa60   : > { %v1870_v36 = vmul.f32 1.442695, %v1864_v35 }
 0xa61   : > { %v1861_v38 = vpop.xlane.xlu0 %1860 }
 0xa62   : > { %5022 = vpow2.f32 %v1870_v36  ;;  %v1865_v39 = vsub.f32 %v1846_v20, %v1861_v38 }
 0xa64   : > { %v1872_v43 = vmul.f32 1.442695, %v1865_v39 }
 0xa66   : > { %5024 = vpow2.f32 %v1872_v43 }
 0xa6c   : > { %v5023_v40 = vpop.eup %5022 }
 0xa6d   : > { %v1880_v46 = vsel %vm1340_vm2, %v5023_v40, 0.0 }
 0xa6e   : > { %1881 = vadd.xlane.f32.xlu0 %v1880_v46 }
 0xa70   : > { %v5025_v47 = vpop.eup %5024 }
 0xa71   : > { %v1883_v49 = vsel %vm1340_vm2, %v5025_v47, 0.0 }
 0xa7e   : > { %1884 = vadd.xlane.f32.xlu1 %v1883_v49 }
 0xa84   : > { %1896 = vrot.lane.b32.xlu0 %v6155_v18, %s5539_s20 }
 0xa88   : > { %2011 = vrot.lane.b32.xlu0 %v6216_v61, %s5540_s26 }
 0xa8f   : > { %2064 = vrot.lane.b32.xlu1 %v6206_v12, %s5540_s26 }
 0xa93   : > { %2062 = vrot.lane.b32.xlu1 %v6225_v2, %s5540_s26 }
 0xad0   : > { %v1876_v53 = vpop.xlane.xlu0 %1875 }
 0xad2   : > { %v1879_v11 = vpop.xlane.xlu1 %1878 }
 0xad3   : > { %5026 = vrcp.f32 %v1879_v11 }
 0xad4   : > { %5028 = vrcp.f32 %v1876_v53 }
 0xad6   : > { %v1944_v52 = vpop.permute.xlu1 %1943 }
 0xad7   : > { %4517 = vmatpush3.bf16.msra.mxu1 %v1944_v52 }
 0xad8   : > { %4528 = vmatprep.subr.bf16.mxu1 %v5536_v27 }
 0xada   : > { %v2014_v12 = vpop.permute.xlu1 %2013 }
 0xadb   : > { %v2019_v2 = vsel %vm1245_vm0, %v2014_v12, 0 }
 0xadd   : > { %v5027_v54 = vpop.eup %5026 }
 0xade   : > { %v5029_v56 = vpop.eup %5028  ;;  %v1891_v59 = vmul.f32 %v5027_v54, %v5021_v19 }
 0xadf   : > { %v1890_v60 = vmul.f32 %v5029_v56, %v5019_v31 }
 0xae1   : > { %v1894_v62 = vpack.c.bf16 %v1891_v59, %v1890_v60 }
 0xafb   : > { %v1882_v55 = vpop.xlane.xlu0 %1881 }
 0xafc   : > { %5030 = vrcp.f32 %v1882_v55 }
 0xaff   : > { %v1897_v61 = vpop.permute.xlu0 %1896 }
 0xb00   : > { %4511 = vmatpush3.bf16.msra.mxu0 %v1897_v61 }
 0xb01   : > { %4522 = vmatprep.subr.bf16.mxu0 %v5536_v27 }
 0xb03   : > { %4513 = vmatmul.mubr.msk.bf16.vlgmr.msra.gmra.mrb[24].mxu0 %vm1340_vm2, %v1894_v62  ;;  %v2012_v1 = vpop.permute.xlu0 %2011 }
 0xb04   : > { %4524 = vmatprep.mubr.msk.bf16.mxu0 %vm5537_vm1, %v5536_v27 }
 0xb06   : > { %v5031_v48 = vpop.eup %5030 }
 0xb07   : > { %v1892_v34 = vmul.f32 %v5031_v48, %v5023_v40 }
 0xb09   : > { %4523 = vmatpush3.bf16.xpose.msra.mxu0 %v2019_v2 }
 0xb0a   : > { %4534 = vmatprep.subr.bf16.mxu0 %v5536_v27 }
 0xb0b   : > { %v1885_v63 = vpop.xlane.xlu1 %1884 }
 0xb0c   : > { %5032 = vrcp.f32 %v1885_v63 }
 0xb0f   : > { %v2065_v41 = vpop.permute.xlu1 %2064 }
 0xb10   : > { %4525 = vmatmul.mubr.msk.bf16.vlgmr.msra.gmra.mrb[28].mxu0 %vm1245_vm0, %v2012_v1  ;;  %v2070_v51 = vsel %vm1245_vm0, %v2065_v41, 0 }
 0xb11   : > { %4536 = vmatprep.mubr.msk.bf16.mxu0 %vm5537_vm1, %v5536_v27 }
 0xb13   : > { %v2063_v57 = vpop.permute.xlu1 %2062 }
 0xb16   : > { %v5033_v3 = vpop.eup %5032 }
 0xb17   : > { %v1893_v37 = vmul.f32 %v5033_v3, %v5025_v47 }
 0xb19   : > { %v1895_v45 = vpack.c.bf16 %v1893_v37, %v1892_v34 }
 0xb1b   : > { %4519 = vmatmul.mubr.msk.bf16.vlgmr.msra.gmra.mrb[36].mxu1 %vm1340_vm2, %v1895_v45 }
 0xb1c   : > { %4529 = vmatpush3.bf16.xpose.msra.mxu1 %v2070_v51  ;;  %4530 = vmatprep.mubr.msk.bf16.mxu1 %vm5537_vm1, %v5536_v27 }
 0xb1d   : > { %4540 = vmatprep.subr.bf16.mxu1 %v5536_v27 }
 0xb23   : > { %4531 = vmatmul.mubr.msk.bf16.vlgmr.msra.gmra.mrb[40].mxu1 %vm1245_vm0, %v2063_v57 }
 0xb24   : > { %4542 = vmatprep.mubr.msk.bf16.mxu1 %vm5537_vm1, %v5536_v27 }
 0xbd6   : > { %v1936_v58 = vpop.f32.mrb[24].mxu0 }
 0xbd7   : > { %v4514_v0 = vpop.f32.mrb[25].mxu0 }
 0xbd8   : > { %v1939_v4 = vpop.f32.mrb[26].mxu0 }
 0xbd9   : > { %v4515_v5 = vpop.f32.mrb[27].mxu0 }
 0xbda   : > { %v4867_v5 = vld [vmem:[%s6027_s19 + $0x8] sm:$0xff]  }
 0xbe3   : > { %v2055_v6 = vpop.f32.mrb[28].mxu0 }
 0xbe4   : > { %v4526_v8 = vpop.f32.mrb[29].mxu0  ;;  %v2113_v13 = vsel %vm1340_vm2, %v2055_v6, -inf }
 0xbe5   : > { %2114 = vmax.xlane.f32.xlu0 %v2113_v13  ;;  %v2058_v14 = vpop.f32.mrb[30].mxu0  ;;  %v4869_v8 = vld [vmem:[%s6027_s19 + $0x18] sm:$0xff]   ;;  %v4870_v13 = vld [vmem:[%s6027_s19 + $0x20] sm:$0xff]  }
 0xbe6   : > { %v4527_v16 = vpop.f32.mrb[31].mxu0  ;;  %v2116_v17 = vsel %vm1340_vm2, %v2058_v14, -inf }
 0xbe7   : > { %2117 = vmax.xlane.f32.xlu1 %v2116_v17 }
 0xbee   : > { %v1983_v20 = vpop.f32.mrb[36].mxu1 }
 0xbef   : > { %v4520_v15 = vpop.f32.mrb[37].mxu1 }
 0xbf0   : > { %v1986_v21 = vpop.f32.mrb[38].mxu1  ;;  %v4872_v15 = vld [vmem:[%s6027_s19 + $0x30] sm:$0xff]  }
 0xbf1   : > { %v4521_v23 = vpop.f32.mrb[39].mxu1 }
 0xbf2   : > { %v4873_v23 = vld [vmem:[%s6027_s19 + $0x38] sm:$0xff]  }
 0xbf6   : > { %v2106_v24 = vpop.f32.mrb[40].mxu1 }
 0xbf7   : > { %v4532_v27 = vpop.f32.mrb[41].mxu1  ;;  %v2119_v26 = vsel %vm1340_vm2, %v2106_v24, -inf }
 0xbf8   : > { %2120 = vmax.xlane.f32.xlu0 %v2119_v26  ;;  %v2109_v28 = vpop.f32.mrb[42].mxu1 }
 0xbf9   : > { %v4533_v29 = vpop.f32.mrb[43].mxu1  ;;  %v2122_v30 = vsel %vm1340_vm2, %v2109_v28, -inf }
 0xbfc   : > { %2123 = vmax.xlane.f32.xlu0 %v2122_v30 }
 0xc72   : > { %v2115_v31 = vpop.xlane.xlu0 %2114 }
 0xc73   : > { %v2125_v22 = vsub.f32 %v2055_v6, %v2115_v31  ;;  %v4868_v6 = vld [vmem:[%s6027_s19 + $0x10] sm:$0xff]  }
 0xc74   : > { %v2118_v19 = vpop.xlane.xlu1 %2117 }
 0xc75   : > { %v2129_v32 = vmul.f32 1.442695, %v2125_v22  ;;  %v2126_v33 = vsub.f32 %v2058_v14, %v2118_v19  ;;  %v4871_v14 = vld [vmem:[%s6027_s19 + $0x28] sm:$0xff]  }
 0xc77   : > { %5034 = vpow2.f32 %v2129_v32  ;;  %v2131_v35 = vmul.f32 1.442695, %v2126_v33 }
 0xc79   : > { %5036 = vpow2.f32 %v2131_v35 }
 0xc81   : > { %v5035_v36 = vpop.eup %5034 }
 0xc82   : > { %v2137_v38 = vsel %vm1340_vm2, %v5035_v36, 0.0 }
 0xc83   : > { %v5037_v39 = vpop.eup %5036  ;;  %2138 = vadd.xlane.f32.xlu0 %v2137_v38 }
 0xc84   : > { %v2140_v40 = vsel %vm1340_vm2, %v5037_v39, 0.0 }
 0xc85   : > { %2141 = vadd.xlane.f32.xlu1 %v2140_v40  ;;  %v2121_v43 = vpop.xlane.xlu0 %2120 }
 0xc86   : > { %v2127_v46 = vsub.f32 %v2106_v24, %v2121_v43  ;;  %v5106_v43 = vld [vmem:[#allocation2] sm:$0xff] }
 0xc88   : > { %v2133_v47 = vmul.f32 1.442695, %v2127_v46 }
 0xc89   : > { %v2124_v49 = vpop.xlane.xlu0 %2123 }
 0xc8a   : > { %5038 = vpow2.f32 %v2133_v47  ;;  %v2128_v11 = vsub.f32 %v2109_v28, %v2124_v49 }
 0xc8c   : > { %v2135_v52 = vmul.f32 1.442695, %v2128_v11  ;;  %v5107_v11 = vld [vmem:[#allocation2 + $0x8] sm:$0xff] }
 0xc8e   : > { %5040 = vpow2.f32 %v2135_v52 }
 0xc94   : > { %v5039_v53 = vpop.eup %5038 }
 0xc95   : > { %v2143_v54 = vsel %vm1340_vm2, %v5039_v53, 0.0 }
 0xc96   : > { %2144 = vadd.xlane.f32.xlu0 %v2143_v54 }
 0xc98   : > { %v5041_v55 = vpop.eup %5040 }
 0xc99   : > { %v2146_v56 = vsel %vm1340_vm2, %v5041_v55, 0.0 }
 0xc9a   : > { %2147 = vadd.xlane.f32.xlu1 %v2146_v56 }
 0xcab   : > { %2206 = vrot.lane.b32.xlu1 %v6165_v25, %s5540_s26 }
 0xcac   : > { %2159 = vrot.lane.b32.xlu0 %v6155_v18, %s5540_s26 }
 0xcaf   : > { %1731 = vrot.lane.b32.xlu1 %v6307_v44, %s5540_s26 }
 0xcb0   : > { %1735 = vrot.lane.b32.xlu0 %v6313_v7, %s5540_s26 }
 0xcb3   : > { %1733 = vrot.lane.b32.xlu1 %v6309_v50, %s5540_s26 }
 0xcb4   : > { %1994 = vrot.lane.b32.xlu0 %v1936_v58, %s5539_s20 }
 0xcb7   : > { %1737 = vrot.lane.b32.xlu1 %v6315_v9, %s5540_s26 }
 0xcb8   : > { %1998 = vrot.lane.b32.xlu0 %v1983_v20, %s5539_s20 }
 0xcbb   : > { %1996 = vrot.lane.b32.xlu1 %v1939_v4, %s5539_s20  ;;  %v4866_v4 = vld [vmem:[%s6027_s19] sm:$0xff]  }
 0xcbf   : > { %2000 = vrot.lane.b32.xlu1 %v1986_v21, %s5539_s20 }
 0xd10   : > { %v2139_v25 = vpop.xlane.xlu0 %2138 }
 0xd12   : > { %v2142_v18 = vpop.xlane.xlu1 %2141 }
 0xd13   : > { %5042 = vrcp.f32 %v2142_v18  ;;  %v4874_v18 = vld [vmem:[%s6029_s29] ss:$12 sps:$4 sm:$0xff]  }
 0xd14   : > { %5044 = vrcp.f32 %v2139_v25  ;;  %v4876_v25 = vld [vmem:[%s6029_s29 + $0x4] ss:$12 sps:$4 sm:$0xff]  }
 0xd1d   : > { %v5043_v44 = vpop.eup %5042 }
 0xd1e   : > { %v5045_v59 = vpop.eup %5044  ;;  %v2154_v60 = vmul.f32 %v5043_v44, %v5037_v39  ;;  %v4879_v44 = vld [vmem:[%s6029_s29 + $0x1c] ss:$12 sps:$4 sm:$0xff]  }
 0xd1f   : > { %v2153_v50 = vmul.f32 %v5045_v59, %v5035_v36  ;;  %v4877_v59 = vld [vmem:[%s6029_s29 + $0x18] ss:$12 sps:$4 sm:$0xff]  }
 0xd21   : > { %v2157_v9 = vpack.c.bf16 %v2154_v60, %v2153_v50 }
 0xd23   : > { %v2145_v7 = vpop.xlane.xlu0 %2144 }
 0xd24   : > { %5046 = vrcp.f32 %v2145_v7  ;;  %v4880_v7 = vld [vmem:[%s6029_s29 + $0x8] ss:$12 sps:$4 sm:$0xff]  }
 0xd27   : > { %v2148_v61 = vpop.xlane.xlu1 %2147  ;;  %v2160_v62 = vpop.permute.xlu0 %2159 }
 0xd28   : > { %5048 = vrcp.f32 %v2148_v61  ;;  %4535 = vmatpush3.bf16.msra.mxu0 %v2160_v62 }
 0xd29   : > { %4546 = vmatprep.subr.bf16.mxu0 %v4866_v4 }
 0xd2b   : > { %v2207_v12 = vpop.permute.xlu1 %2206  ;;  %4537 = vmatmul.mubr.msk.bf16.vlgmr.msra.gmra.mrb[32].mxu0 %vm1340_vm2, %v2157_v9  ;;  %v1736_v2 = vpop.permute.xlu0 %1735 }
 0xd2c   : > { %1746 = vst.msk [vmem:[#allocation3 + $0x10] sm:$0xff] %vm1743_vm3, %v1736_v2  ;;  %4541 = vmatpush3.bf16.msra.mxu1 %v2207_v12  ;;  %4547 = vmatpush3.bf16.msra.mxu0 %v4866_v4  ;;  %v4887_v4 = vld [vmem:[%s6029_s29 + $0x4c] ss:$12 sps:$4 sm:$0xff]  }
 0xd2d   : > { %4548 = vmatprep.subr.bf16.mxu0 %v4867_v5  ;;  %2619 = vmatprep.subr.bf16.mxu1 %v4876_v25 }
 0xd2e   : > { %v5047_v48 = vpop.eup %5046 }
 0xd2f   : > { %v1732_v63 = vpop.permute.xlu1 %1731  ;;  %v1995_v1 = vpop.permute.xlu0 %1994  ;;  %v2155_v34 = vmul.f32 %v5047_v48, %v5039_v53  ;;  %v5108_v53 = vld [vmem:[#allocation2 + $0x10] sm:$0xff] }
 0xd30   : > { %1744 = vst.msk [vmem:[#allocation3] sm:$0xff] %vm1743_vm3, %v1732_v63  ;;  %4549 = vmatpush3.bf16.msra.mxu0 %v4867_v5  ;;  %v4885_v5 = vld [vmem:[%s6029_s29 + $0x48] ss:$12 sps:$4 sm:$0xff]  }
 0xd31   : > { %2007 = vst.msk [vmem:[#allocation3] sm:$0xff] %vm2006_vm4, %v1995_v1  ;;  %4550 = vmatprep.subr.bf16.mxu0 %v4868_v6 }
 0xd32   : > { %v5049_v3 = vpop.eup %5048 }
 0xd33   : > { %v2156_v37 = vmul.f32 %v5049_v3, %v5041_v55  ;;  %v1734_v41 = vpop.permute.xlu1 %1733  ;;  %v1999_v45 = vpop.permute.xlu0 %1998  ;;  %v5109_v55 = vld [vmem:[#allocation2 + $0x18] sm:$0xff] }
 0xd34   : > { %1745 = vst.msk [vmem:[#allocation3 + $0x8] sm:$0xff] %vm1743_vm3, %v1734_v41  ;;  %4551 = vmatpush3.bf16.msra.mxu0 %v4868_v6  ;;  %v4888_v6 = vld [vmem:[%s6029_s29 + $0x38] ss:$12 sps:$4 sm:$0xff]  }
 0xd35   : > { %2009 = vst.msk [vmem:[#allocation3 + $0x10] sm:$0xff] %vm2006_vm4, %v1999_v45  ;;  %v2158_v51 = vpack.c.bf16 %v2156_v37, %v2155_v34  ;;  %4552 = vmatprep.subr.bf16.mxu0 %v4869_v8 }
 0xd37   : > { %v1738_v57 = vpop.permute.xlu1 %1737  ;;  %4543 = vmatmul.mubr.msk.bf16.vlgmr.msra.gmra.mrb[44].mxu1 %vm1340_vm2, %v2158_v51 }
 0xd38   : > { %1747 = vst.msk [vmem:[#allocation3 + $0x18] sm:$0xff] %vm1743_vm3, %v1738_v57  ;;  %2651 = vmatprep.mubr.bf16.mxu1 %v5535_v10  ;;  %4553 = vmatpush3.bf16.msra.mxu0 %v4869_v8  ;;  %v4883_v57 = vld [vmem:[%s6029_s29 + $0x34] ss:$12 sps:$4 sm:$0xff]   ;;  %v4891_v8 = vld [vmem:[%s6029_s29 + $0x64] ss:$12 sps:$4 sm:$0xff]  }
 0xd39   : > { %4554 = vmatprep.subr.bf16.mxu0 %v4870_v13  ;;  %2620 = vmatpush1.bf16.msra.mxu1 %v4874_v18 }
 0xd3a   : > { %2621 = vmatprep.subr.bf16.mxu1 %v4879_v44 }
 0xd3b   : > { %v1997_v58 = vpop.permute.xlu1 %1996 }
 0xd3c   : > { %2008 = vst.msk [vmem:[#allocation3 + $0x8] sm:$0xff] %vm2006_vm4, %v1997_v58  ;;  %4555 = vmatpush3.bf16.msra.mxu0 %v4870_v13  ;;  %v4881_v58 = vld [vmem:[%s6029_s29 + $0x30] ss:$12 sps:$4 sm:$0xff]   ;;  %v4889_v13 = vld [vmem:[%s6029_s29 + $0x60] ss:$12 sps:$4 sm:$0xff]  }
 0xd3d   : > { %4556 = vmatprep.subr.bf16.mxu0 %v4871_v14  ;;  %2622 = vmatpush1.bf16.msra.mxu1 %v4877_v59 }
 0xd3e   : > { %2623 = vmatprep.subr.bf16.mxu1 %v4883_v57  ;;  %v4915_v57 = vld [vmem:[%s6035_s10 + $0x34] ss:$12 sps:$4 sm:$0xff]  }
 0xd3f   : > { %v2001_v0 = vpop.permute.xlu1 %2000 }
 0xd40   : > { %2010 = vst.msk [vmem:[#allocation3 + $0x18] sm:$0xff] %vm2006_vm4, %v2001_v0  ;;  %4557 = vmatpush3.bf16.msra.mxu0 %v4871_v14  ;;  %v4884_v0 = vld [vmem:[%s6029_s29 + $0x20] ss:$12 sps:$4 sm:$0xff]   ;;  %v4892_v14 = vld [vmem:[%s6029_s29 + $0x50] ss:$12 sps:$4 sm:$0xff]  }
 0xd41   : > { %4558 = vmatprep.subr.bf16.mxu0 %v4872_v15  ;;  %2624 = vmatpush1.bf16.msra.mxu1 %v4881_v58 }
 0xd42   : > { %2625 = vmatprep.subr.bf16.mxu1 %v4887_v4  ;;  %v4919_v4 = vld [vmem:[%s6035_s10 + $0x4c] ss:$12 sps:$4 sm:$0xff]  }
 0xd44   : > { %4559 = vmatpush3.bf16.msra.mxu0 %v4872_v15  ;;  %v4899_v15 = vld [vmem:[%s6029_s29 + $0x94] ss:$12 sps:$4 sm:$0xff]  }
 0xd45   : > { %4560 = vmatprep.subr.bf16.mxu0 %v4873_v23  ;;  %2626 = vmatpush1.bf16.msra.mxu1 %v4885_v5  ;;  %v4920_v5 = vld [vmem:[%s6035_s10 + $0x38] ss:$12 sps:$4 sm:$0xff]  }
 0xd46   : > { %2627 = vmatprep.subr.bf16.mxu1 %v4891_v8  ;;  %v4923_v8 = vld [vmem:[%s6035_s10 + $0x64] ss:$12 sps:$4 sm:$0xff]  }
 0xd48   : > { %4561 = vmatpush3.bf16.msra.mxu0 %v4873_v23  ;;  %v4900_v23 = vld [vmem:[%s6029_s29 + $0x80] ss:$12 sps:$4 sm:$0xff]  }
 0xd49   : > { %4566 = vmatprep.subr.bf16.mxu0 %v4880_v7  ;;  %2628 = vmatpush1.bf16.msra.mxu1 %v4889_v13  ;;  %v4924_v13 = vld [vmem:[%s6035_s10 + $0x50] ss:$12 sps:$4 sm:$0xff]  }
 0xdfe   : > { %v2199_v16 = vpop.f32.mrb[32].mxu0 }
 0xdff   : > { %2257 = vrot.lane.b32.xlu0 %v2199_v16, %s5538_s27  ;;  %v4538_v17 = vpop.f32.mrb[33].mxu0  ;;  %v4895_v16 = vld [vmem:[%s6029_s29 + $0x7c] ss:$12 sps:$4 sm:$0xff]  }
 0xe00   : > { %v2202_v20 = vpop.f32.mrb[34].mxu0  ;;  %v4893_v17 = vld [vmem:[%s6029_s29 + $0x78] ss:$12 sps:$4 sm:$0xff]   ;;  %2629 = vmatprep.subr.bf16.mxu1 %v4895_v16  ;;  %v4927_v16 = vld [vmem:[%s6035_s10 + $0x7c] ss:$12 sps:$4 sm:$0xff]  }
 0xe01   : > { %2259 = vrot.lane.b32.xlu1 %v2202_v20, %s5538_s27  ;;  %v4539_v21 = vpop.f32.mrb[35].mxu0  ;;  %v4896_v20 = vld [vmem:[%s6029_s29 + $0x68] ss:$12 sps:$4 sm:$0xff]   ;;  %2630 = vmatpush1.bf16.msra.mxu1 %v4893_v17 }
 0xe02   : > { %v4897_v21 = vld [vmem:[%s6029_s29 + $0x90] ss:$12 sps:$4 sm:$0xff]   ;;  %2631 = vmatprep.subr.bf16.mxu1 %v4899_v15  ;;  %v4928_v17 = vld [vmem:[%s6035_s10 + $0x68] ss:$12 sps:$4 sm:$0xff]  }
 0xe03   : > { %v4931_v15 = vld [vmem:[%s6035_s10 + $0x94] ss:$12 sps:$4 sm:$0xff]  }
 0xe05   : > { %2632 = vmatpush1.bf16.msra.mxu1 %v4897_v21  ;;  %v4932_v21 = vld [vmem:[%s6035_s10 + $0x80] ss:$12 sps:$4 sm:$0xff]  }
 0xe0a   : > { %v2246_v24 = vpop.f32.mrb[44].mxu1 }
 0xe0b   : > { %2261 = vrot.lane.b32.xlu0 %v2246_v24, %s5538_s27  ;;  %v4544_v27 = vpop.f32.mrb[45].mxu1  ;;  %v4903_v24 = vld [vmem:[%s6029_s29 + $0xac] ss:$12 sps:$4 sm:$0xff]  }
 0xe0c   : > { %v2249_v26 = vpop.f32.mrb[46].mxu1  ;;  %v4901_v27 = vld [vmem:[%s6029_s29 + $0xa8] ss:$12 sps:$4 sm:$0xff]   ;;  %2633 = vmatprep.subr.bf16.mxu1 %v4903_v24  ;;  %v4935_v24 = vld [vmem:[%s6035_s10 + $0xac] ss:$12 sps:$4 sm:$0xff]  }
 0xe0d   : > { %2263 = vrot.lane.b32.xlu1 %v2249_v26, %s5538_s27  ;;  %v4545_v28 = vpop.f32.mrb[47].mxu1  ;;  %v4904_v26 = vld [vmem:[%s6029_s29 + $0x98] ss:$12 sps:$4 sm:$0xff]   ;;  %2634 = vmatpush1.bf16.msra.mxu1 %v4901_v27 }
 0xe0e   : > { %v4907_v28 = vld [vmem:[%s6035_s10 + $0x4] ss:$12 sps:$4 sm:$0xff]  }
 0xe0f   : > { %2881 = vmatprep.subr.bf16.mxu1 %v4907_v28  ;;  %v4936_v27 = vld [vmem:[%s6035_s10 + $0x98] ss:$12 sps:$4 sm:$0xff]   ;;  %v4937_v28 = vld [vmem:[%s6035_s10 + $0xb0] ss:$12 sps:$4 sm:$0xff]  }
 0xe71   : > { %v2258_v29 = vpop.permute.xlu0 %2257 }
 0xe72   : > { %2270 = vst.msk [vmem:[#allocation3] sm:$0xff] %vm2269_vm5, %v2258_v29  ;;  %v4908_v29 = vld [vmem:[%s6029_s29 + $0xb0] ss:$12 sps:$4 sm:$0xff]  }
 0xe73   : > { %v2260_v30 = vpop.permute.xlu1 %2259 }
 0xe74   : > { %2271 = vst.msk [vmem:[#allocation3 + $0x8] sm:$0xff] %vm2269_vm5, %v2260_v30  ;;  %v4912_v30 = vld [vmem:[%s6035_s10 + $0x8] ss:$12 sps:$4 sm:$0xff]  }
 0xe79   : > { %v2274_v31 = vld [vmem:[#allocation3] sm:$0xff] }
 0xe7b   : > { %v2275_v22 = vld [vmem:[#allocation3 + $0x8] sm:$0xff] }
 0xe7c   : > { %v2278_v19 = vpack.c.bf16 %v2275_v22, %v2274_v31 }
 0xe7d   : > { %v2262_v32 = vpop.permute.xlu0 %2261 }
 0xe7e   : > { %2272 = vst.msk [vmem:[#allocation3 + $0x10] sm:$0xff] %vm2269_vm5, %v2262_v32  ;;  %4562 = vmatprep.mubr.bf16.mxu0 %v2278_v19 }
 0xe7f   : > { %v2264_v33 = vpop.permute.xlu1 %2263 }
 0xe80   : > { %2273 = vst.msk [vmem:[#allocation3 + $0x18] sm:$0xff] %vm2269_vm5, %v2264_v33 }
 0xe85   : > { %v2276_v35 = vld [vmem:[#allocation3 + $0x10] sm:$0xff] }
 0xe87   : > { %v2277_v36 = vld [vmem:[#allocation3 + $0x18] sm:$0xff] }
 0xe88   : > { %v2279_v38 = vpack.c.bf16 %v2277_v36, %v2276_v35 }
 0xe8a   : > { %4563 = vmatmul.mubr.bf16.vlgmr.msra.gmra.mrb[36].mxu0 %v2279_v38 }
 0xe8b   : > { %4567 = vmatpush3.bf16.msra.mxu0 %v4880_v7 }
 0xe8c   : > { %4568 = vmatprep.subr.bf16.mxu0 %v4884_v0 }
 0xe8f   : > { %4569 = vmatpush3.bf16.msra.mxu0 %v4884_v0  ;;  %v4913_v0 = vld [vmem:[%s6035_s10 + $0x30] ss:$12 sps:$4 sm:$0xff]  }
 0xe90   : > { %4570 = vmatprep.subr.bf16.mxu0 %v4888_v6 }
 0xe93   : > { %4571 = vmatpush3.bf16.msra.mxu0 %v4888_v6  ;;  %v4917_v6 = vld [vmem:[%s6035_s10 + $0x48] ss:$12 sps:$4 sm:$0xff]  }
 0xe94   : > { %4572 = vmatprep.subr.bf16.mxu0 %v4892_v14 }
 0xe97   : > { %4573 = vmatpush3.bf16.msra.mxu0 %v4892_v14  ;;  %v4921_v14 = vld [vmem:[%s6035_s10 + $0x60] ss:$12 sps:$4 sm:$0xff]  }
 0xe98   : > { %4574 = vmatprep.subr.bf16.mxu0 %v4896_v20 }
 0xe9b   : > { %4575 = vmatpush3.bf16.msra.mxu0 %v4896_v20  ;;  %v4925_v20 = vld [vmem:[%s6035_s10 + $0x78] ss:$12 sps:$4 sm:$0xff]  }
 0xe9c   : > { %4576 = vmatprep.subr.bf16.mxu0 %v4900_v23 }
 0xe9f   : > { %4577 = vmatpush3.bf16.msra.mxu0 %v4900_v23  ;;  %v4929_v23 = vld [vmem:[%s6035_s10 + $0x90] ss:$12 sps:$4 sm:$0xff]  }
 0xea0   : > { %4578 = vmatprep.subr.bf16.mxu0 %v4904_v26 }
 0xea3   : > { %4579 = vmatpush3.bf16.msra.mxu0 %v4904_v26  ;;  %v4933_v26 = vld [vmem:[%s6035_s10 + $0xa8] ss:$12 sps:$4 sm:$0xff]  }
 0xea4   : > { %4580 = vmatprep.subr.bf16.mxu0 %v4908_v29 }
 0xea7   : > { %4581 = vmatpush3.bf16.msra.mxu0 %v4908_v29 }
 0xea8   : > { %4586 = vmatprep.subr.bf16.mxu0 %v4912_v30 }
 0xf5d   : > { %v4564_v39 = vpop.f32.mrb[36].mxu0 }
 0xf5e   : > { %v2378_v40 = vpop.f32.mrb[37].mxu0  ;;  %v6405_v54 = vadd.f32 %v5108_v53, %v4564_v39 }
 0xf5f   : > { %v6400_v46 = vadd.f32 %v5106_v43, %v2378_v40  ;;  %v4565_v47 = vpop.f32.mrb[38].mxu0 }
 0xf60   : > { %v2381_v49 = vpop.f32.mrb[39].mxu0  ;;  %7074 = vst [vmem:[#allocation42_spill] sm:$0xff] %v6405_v54  ;;  %v6409_v56 = vadd.f32 %v5109_v55, %v4565_v47  ;;  %v2443_v47 = vsub.s32 1, %v6167_v42  ;;  %v2451_v55 = vsub.s32 2, %v6167_v42 }
 0xf61   : > { %7072 = vst [vmem:[#allocation40_spill] sm:$0xff] %v6400_v46  ;;  %v6402_v52 = vadd.f32 %v5107_v11, %v2381_v49  ;;  %2397 = vadd.xlane.f32.xlu0 %v6400_v46  ;;  %v5110_v11 = vld [vmem:[%s6013_s13] sm:$0xff] }
 0xf62   : > { %7075 = vst [vmem:[#allocation43_spill] sm:$0xff] %v6409_v56  ;;  %v2444_v53 = vrot.slane %v5110_v11, %v2443_v47 }
 0xf63   : > { %7073 = vst [vmem:[#allocation41_spill] sm:$0xff] %v6402_v52  ;;  %2399 = vadd.xlane.f32.xlu1 %v6402_v52 }
 0xf65   : > { %2401 = vadd.xlane.f32.xlu0 %v6405_v54 }
 0xf69   : > { %2403 = vadd.xlane.f32.xlu0 %v6409_v56 }
 0xfee   : > { %v2398_v60 = vpop.xlane.xlu0 %2397 }
 0xfef   : > { %v2405_v50 = vmul.f32 0.0078125, %v2398_v60  ;;  %v2452_v60 = vrot.slane %v5110_v11, %v2451_v55 }
 0xff0   : > { %v2400_v61 = vpop.xlane.xlu1 %2399 }
 0xff1   : > { %v6418_v62 = vsub.f32 %v6400_v46, %v2405_v50  ;;  %v2406_v9 = vmul.f32 0.0078125, %v2400_v61 }
 0xff2   : > { %v2402_v12 = vpop.xlane.xlu0 %2401 }
 0xff3   : > { %v6421_v2 = vsub.f32 %v6402_v52, %v2406_v9  ;;  %v2407_v63 = vmul.f32 0.0078125, %v2402_v12  ;;  %v2413_v1 = vmul.f32 %v6418_v62, %v6418_v62 }
 0xff5   : > { %v6426_v48 = vsub.f32 %v6405_v54, %v2407_v63  ;;  %2417 = vadd.xlane.f32.xlu0 %v2413_v1  ;;  %v2414_v3 = vmul.f32 %v6421_v2, %v6421_v2 }
 0xff6   : > { %v2404_v34 = vpop.xlane.xlu0 %2403 }
 0xff7   : > { %v2408_v37 = vmul.f32 0.0078125, %v2404_v34  ;;  %2419 = vadd.xlane.f32.xlu1 %v2414_v3  ;;  %v2415_v41 = vmul.f32 %v6426_v48, %v6426_v48  ;;  %v4905_v3 = vld [vmem:[%s6035_s10] ss:$12 sps:$4 sm:$0xff]  }
 0xff9   : > { %v6433_v45 = vsub.f32 %v6409_v56, %v2408_v37  ;;  %2421 = vadd.xlane.f32.xlu0 %v2415_v41  ;;  %v4909_v41 = vld [vmem:[%s6035_s10 + $0x18] ss:$12 sps:$4 sm:$0xff]  }
 0xffb   : > { %v2416_v51 = vmul.f32 %v6433_v45, %v6433_v45 }
 0xffd   : > { %2423 = vadd.xlane.f32.xlu1 %v2416_v51 }
0x1082   : > { %v2418_v31 = vpop.xlane.xlu0 %2417 }
0x1083   : > { %v2425_v22 = vmul.f32 0.0078125, %v2418_v31 }
0x1084   : > { %v2420_v19 = vpop.xlane.xlu1 %2419 }
0x1085   : > { %v2429_v32 = vadd.f32 1e-05, %v2425_v22  ;;  %v2426_v33 = vmul.f32 0.0078125, %v2420_v19 }
0x1086   : > { %v2422_v35 = vpop.xlane.xlu0 %2421 }
0x1087   : > { %5050 = vrsqrt.f32 %v2429_v32  ;;  %v2430_v36 = vadd.f32 1e-05, %v2426_v33  ;;  %v2427_v38 = vmul.f32 0.0078125, %v2422_v35 }
0x1089   : > { %5052 = vrsqrt.f32 %v2430_v36  ;;  %v2431_v39 = vadd.f32 1e-05, %v2427_v38 }
0x108a   : > { %v2424_v40 = vpop.xlane.xlu1 %2423 }
0x108b   : > { %5054 = vrsqrt.f32 %v2431_v39  ;;  %v2428_v43 = vmul.f32 0.0078125, %v2424_v40 }
0x108d   : > { %v2432_v49 = vadd.f32 1e-05, %v2428_v43 }
0x108f   : > { %5056 = vrsqrt.f32 %v2432_v49 }
0x1091   : > { %v5051_v18 = vpop.eup %5050 }
0x1092   : > { %v2437_v25 = vmul.f32 %v5051_v18, %v6418_v62  ;;  %v4911_v62 = vld [vmem:[%s6035_s10 + $0x1c] ss:$12 sps:$4 sm:$0xff]  }
0x1093   : > { %v5053_v44 = vpop.eup %5052 }
0x1094   : > { %v2438_v7 = vmul.f32 %v5053_v44, %v6421_v2  ;;  %v2445_v59 = vmul.f32 %v2444_v53, %v2437_v25  ;;  %v4938_v44 = vld [vmem:[%s6037_s8 + $0x40] sm:$0xff]  }
0x1095   : > { %v5055_v50 = vpop.eup %5054 }
0x1096   : > { %v2439_v61 = vmul.f32 %v5055_v50, %v6426_v48  ;;  %v2446_v9 = vmul.f32 %v2444_v53, %v2438_v7  ;;  %v2453_v12 = vadd.f32 %v2452_v60, %v2445_v59 }
0x1098   : > { %v2454_v63 = vadd.f32 %v2452_v60, %v2446_v9  ;;  %v2447_v37 = vmul.f32 %v2444_v53, %v2439_v61 }
0x1099   : > { %v5057_v1 = vpop.eup %5056 }
0x109a   : > { %v2440_v42 = vmul.f32 %v5057_v1, %v6433_v45  ;;  %v2457_v34 = vpack.c.bf16 %v2454_v63, %v2453_v12  ;;  %v2455_v48 = vadd.f32 %v2452_v60, %v2447_v37  ;;  %v4916_v45 = vld [vmem:[%s6035_s10 + $0x20] ss:$12 sps:$4 sm:$0xff]  }
0x109c   : > { %2652 = vmatmul.mubr.bf16.vlgmr.msra.gmra.mrb[48].mxu1 %v2457_v34  ;;  %4582 = vmatprep.mubr.bf16.mxu0 %v2457_v34  ;;  %v2448_v2 = vmul.f32 %v2444_v53, %v2440_v42 }
0x109d   : > { %2882 = vmatpush1.bf16.msra.mxu1 %v4905_v3  ;;  %2661 = vmatprep.mubr.bf16.mxu1 %v5535_v10 }
0x109e   : > { %2883 = vmatprep.subr.bf16.mxu1 %v4911_v62  ;;  %v2456_v51 = vadd.f32 %v2452_v60, %v2448_v2  ;;  %v4939_v60 = vld [vmem:[%s6037_s8] sm:$0xff]  }
0x10a0   : > { %v2458_v58 = vpack.c.bf16 %v2456_v51, %v2455_v48  ;;  %v4940_v48 = vld [vmem:[%s6037_s8 + $0x48] sm:$0xff]  }
0x10a1   : > { %2884 = vmatpush1.bf16.msra.mxu1 %v4909_v41  ;;  %v4941_v51 = vld [vmem:[%s6037_s8 + $0x8] sm:$0xff]  }
0x10a2   : > { %4583 = vmatmul.mubr.bf16.vlgmr.msra.gmra.mrb[40].mxu0 %v2458_v58  ;;  %2885 = vmatprep.subr.bf16.mxu1 %v4915_v57 }
0x10a3   : > { %4587 = vmatpush3.bf16.msra.mxu0 %v4912_v30  ;;  %4602 = vmatprep.mubr.bf16.mxu0 %v2457_v34 }
0x10a4   : > { %2662 = vmatmul.mubr.bf16.gmra.mrb[52].mxu1 %v2458_v58  ;;  %4588 = vmatprep.subr.bf16.mxu0 %v4916_v45 }
0x10a5   : > { %2886 = vmatpush1.bf16.msra.mxu1 %v4913_v0  ;;  %2913 = vmatprep.mubr.bf16.mxu1 %v5535_v10  ;;  %v4942_v0 = vld [vmem:[%s6037_s8 + $0x80] sm:$0xff]  }
0x10a6   : > { %2887 = vmatprep.subr.bf16.mxu1 %v4919_v4 }
0x10a7   : > { %4589 = vmatpush3.bf16.msra.mxu0 %v4916_v45 }
0x10a8   : > { %4590 = vmatprep.subr.bf16.mxu0 %v4920_v5 }
0x10a9   : > { %2888 = vmatpush1.bf16.msra.mxu1 %v4917_v6 }
0x10aa   : > { %2889 = vmatprep.subr.bf16.mxu1 %v4923_v8 }
0x10ab   : > { %4591 = vmatpush3.bf16.msra.mxu0 %v4920_v5 }
0x10ac   : > { %4592 = vmatprep.subr.bf16.mxu0 %v4924_v13 }
0x10ad   : > { %2890 = vmatpush1.bf16.msra.mxu1 %v4921_v14 }
0x10ae   : > { %2891 = vmatprep.subr.bf16.mxu1 %v4927_v16 }
0x10af   : > { %4593 = vmatpush3.bf16.msra.mxu0 %v4924_v13  ;;  %v4943_v13 = vld [vmem:[%s6037_s8 + $0x50] sm:$0xff]  }
0x10b0   : > { %4594 = vmatprep.subr.bf16.mxu0 %v4928_v17 }
0x10b1   : > { %2892 = vmatpush1.bf16.msra.mxu1 %v4925_v20 }
0x10b2   : > { %2893 = vmatprep.subr.bf16.mxu1 %v4931_v15 }
0x10b3   : > { %4595 = vmatpush3.bf16.msra.mxu0 %v4928_v17 }
0x10b4   : > { %4596 = vmatprep.subr.bf16.mxu0 %v4932_v21 }
0x10b5   : > { %2894 = vmatpush1.bf16.msra.mxu1 %v4929_v23  ;;  %v4945_v23 = vld [vmem:[%s6037_s8 + $0x88] sm:$0xff]  }
0x10b6   : > { %2895 = vmatprep.subr.bf16.mxu1 %v4935_v24 }
0x10b7   : > { %4597 = vmatpush3.bf16.msra.mxu0 %v4932_v21  ;;  %v4944_v21 = vld [vmem:[%s6037_s8 + $0x10] sm:$0xff]  }
0x10b8   : > { %4598 = vmatprep.subr.bf16.mxu0 %v4936_v27 }
0x10b9   : > { %2896 = vmatpush1.bf16.msra.mxu1 %v4933_v26 }
0x10ba   : > { %4316 = vmatprep.subr.bf16.mxu1 %v4938_v44 }
0x10bb   : > { %4599 = vmatpush3.bf16.msra.mxu0 %v4936_v27 }
0x10bc   : > { %2914 = vmatmul.mubr.bf16.vlgmr.msra.gmra.mrb[56].mxu1 %v2457_v34  ;;  %4600 = vmatprep.subr.bf16.mxu0 %v4937_v28 }
0x10bd   : > { %2923 = vmatprep.mubr.bf16.mxu1 %v5535_v10  ;;  %4317 = vmatpush3.bf16.msra.mxu1 %v4939_v60 }
0x10be   : > { %4318 = vmatprep.subr.bf16.mxu1 %v4940_v48 }
0x10bf   : > { %4601 = vmatpush3.bf16.msra.mxu0 %v4937_v28 }
0x10c0   : > { %4606 = vmatprep.subr.bf16.mxu0 %v4942_v0 }
0x10c1   : > { %4319 = vmatpush3.bf16.msra.mxu1 %v4941_v51 }
0x10c2   : > { %4603 = vmatmul.mubr.bf16.vlgmr.msra.gmra.mrb[44].mxu0 %v2458_v58  ;;  %4320 = vmatprep.subr.bf16.mxu1 %v4943_v13 }
0x10c3   : > { %4607 = vmatpush3.bf16.msra.mxu0 %v4942_v0 }
0x10c4   : > { %2924 = vmatmul.mubr.bf16.gmra.mrb[60].mxu1 %v2458_v58  ;;  %4608 = vmatprep.subr.bf16.mxu0 %v4945_v23 }
0x10c5   : > { %4321 = vmatpush3.bf16.msra.mxu1 %v4944_v21 }
0x10c7   : > { %4609 = vmatpush3.bf16.msra.mxu0 %v4945_v23 }
0x116f   : > { %v6490_v29 = vpop.f32.mrb[48].mxu1 }
0x1170   : > { %v6492_v30 = vpop.f32.mrb[49].mxu1 }
0x1171   : > { %v6494_v31 = vpop.f32.mrb[50].mxu1 }
0x1172   : > { %v6496_v22 = vpop.f32.mrb[51].mxu1 }
0x1175   : > { %v6498_v19 = vpop.f32.mrb[40].mxu0 }
0x1176   : > { %v6500_v32 = vpop.f32.mrb[41].mxu0 }
0x1177   : > { %v6502_v33 = vpop.f32.mrb[52].mxu1  ;;  %v6504_v35 = vpop.f32.mrb[42].mxu0 }
0x1178   : > { %7076 = vst [vmem:[#allocation44_spill] sm:$0xff] %v6502_v33  ;;  %7077 = vst [vmem:[#allocation45_spill] sm:$0xff] %v6504_v35  ;;  %v6506_v10 = vpop.f32.mrb[53].mxu1  ;;  %v6508_v36 = vpop.f32.mrb[43].mxu0 }
0x1179   : > { %7078 = vst [vmem:[#allocation46_spill] sm:$0xff] %v6506_v10  ;;  %7079 = vst [vmem:[#allocation47_spill] sm:$0xff] %v6508_v36  ;;  %v6510_v38 = vpop.f32.mrb[54].mxu1 }
0x117a   : > { %7080 = vst [vmem:[#allocation48_spill] sm:$0xff] %v6510_v38  ;;  %v6512_v39 = vpop.f32.mrb[55].mxu1 }
0x117b   : > { %7081 = vst [vmem:[#allocation49_spill] sm:$0xff] %v6512_v39 }
0x118f   : > { %v2915_v40 = vpop.f32.mrb[56].mxu1 }
0x1190   : > { %v6514_v43 = vmul.f32 0.70710677, %v2915_v40  ;;  %v2917_v47 = vpop.f32.mrb[57].mxu1  ;;  %v6590_v28 = vmul.f32 0.5, %v2915_v40  ;;  %v4947_v40 = vld [vmem:[%s6037_s8 + $0x18] sm:$0xff]  }
0x1191   : > { %v6516_v49 = vmul.f32 0.70710677, %v2917_v47  ;;  %v2919_v11 = vpop.f32.mrb[58].mxu1 }
0x1192   : > { %v6519_v53 = vand.u32 2147483647, %v6514_v43  ;;  %v6521_v55 = vmul.f32 0.70710677, %v2919_v11  ;;  %v6526_v25 = vpop.f32.mrb[59].mxu1  ;;  %vm3343_vm6 = vcmp.ge.f32.partialorder %v6514_v43, 0.0 }
0x1193   : > { %v6524_v18 = vand.u32 2147483647, %v6516_v49  ;;  %v6536_v61 = vmul.f32 0.70710677, %v6526_v25  ;;  %v6607_v51 = vmul.f32 0.5, %v6526_v25  ;;  %vm3344_vm7 = vcmp.ge.f32.partialorder %v6516_v49, 0.0 }
0x1194   : > { %v3019_v7 = vmul.f32 0.5, %v6519_v53  ;;  %v6531_v59 = vand.u32 2147483647, %v6521_v55  ;;  %v3271_v17 = vsub.f32 0.0, %v6519_v53  ;;  %vm3346_vm8 = vcmp.ge.f32.partialorder %v6521_v55, 0.0 }
0x1195   : > { %v3020_v50 = vmul.f32 0.5, %v6524_v18  ;;  %v6538_v9 = vpop.f32.mrb[44].mxu0  ;;  %v6544_v42 = vand.u32 2147483647, %v6536_v61  ;;  %v3272_v24 = vsub.f32 0.0, %v6524_v18  ;;  %vm3347_vm9 = vcmp.ge.f32.partialorder %v6536_v61, 0.0 }
0x1196   : > { %v3031_v12 = vadd.f32 1.0, %v3019_v7  ;;  %v3022_v63 = vmul.f32 0.5, %v6531_v59  ;;  %v6541_v1 = vpop.f32.mrb[45].mxu0  ;;  %v6558_v58 = vmul.f32 0.70710677, %v6538_v9  ;;  %v3274_v44 = vsub.f32 0.0, %v6531_v59 }
0x1197   : > { %v3032_v3 = vadd.f32 1.0, %v3020_v50  ;;  %v6546_v34 = vpop.f32.mrb[60].mxu1  ;;  %v6548_v62 = vpop.f32.mrb[46].mxu0  ;;  %v3023_v57 = vmul.f32 0.5, %v6544_v42  ;;  %v6564_v4 = vmul.f32 0.70710677, %v6541_v1  ;;  %v6604_v48 = vmul.f32 %v3271_v17, %v6519_v53 }
0x1198   : > { %5058 = vrcp.f32 %v3031_v12  ;;  %v3034_v37 = vadd.f32 1.0, %v3022_v63  ;;  %v6550_v2 = vpop.f32.mrb[61].mxu1  ;;  %v6552_v41 = vpop.f32.mrb[47].mxu0  ;;  %v6569_v8 = vand.u32 2147483647, %v6558_v58  ;;  %v4946_v50 = vld [vmem:[%s6037_s8 + $0x58] sm:$0xff]   ;;  %v6623_v17 = vmul.f32 %v3274_v44, %v6531_v59 }
0x1199   : > { %7082 = vst [vmem:[#allocation50_spill] sm:$0xff] %v6550_v2  ;;  %7083 = vst [vmem:[#allocation51_spill] sm:$0xff] %v6552_v41  ;;  %5060 = vrcp.f32 %v3032_v3  ;;  %v6560_v45 = vpop.f32.mrb[62].mxu1  ;;  %v3035_v6 = vadd.f32 1.0, %v3023_v57  ;;  %v6573_v14 = vand.u32 2147483647, %v6564_v4  ;;  %4322 = vmatprep.subr.bf16.mxu1 %v4946_v50 }
0x119a   : > { %7084 = vst [vmem:[#allocation52_spill] sm:$0xff] %v6560_v45  ;;  %5062 = vrcp.f32 %v3034_v37  ;;  %v6566_v5 = vpop.f32.mrb[63].mxu1  ;;  %v6576_v16 = vmul.f32 0.70710677, %v6546_v34  ;;  %v3027_v20 = vmul.f32 0.5, %v6569_v8  ;;  %v6597_v12 = vmul.f32 0.5, %v2917_v47  ;;  %4323 = vmatpush3.bf16.msra.mxu1 %v4947_v40 }
0x119b   : > { %5064 = vrcp.f32 %v3035_v6  ;;  %v6581_v15 = vmul.f32 0.70710677, %v6548_v62  ;;  %v3021_v27 = vmul.f32 0.5, %v6573_v14  ;;  %v6599_v63 = vmul.f32 0.5, %v2919_v11  ;;  %v4948_v47 = vld [vmem:[%s6037_s8 + $0x90] sm:$0xff]   ;;  %v4950_v59 = vld [vmem:[%s6037_s8 + $0x20] sm:$0xff]  }
0x119c   : > { %v6588_v26 = vand.u32 2147483647, %v6576_v16  ;;  %v3039_v7 = vadd.f32 1.0, %v3027_v20  ;;  %v6614_v11 = vmul.f32 %v3272_v24, %v6524_v18  ;;  %v6617_v53 = vmul.f32 0.70710677, %v6550_v2  ;;  %4610 = vmatprep.subr.bf16.mxu0 %v4948_v47  ;;  %v4949_v18 = vld [vmem:[%s6037_s8 + $0x60] sm:$0xff]  }
0x119d   : > { %v6594_v60 = vand.u32 2147483647, %v6581_v15  ;;  %v3033_v3 = vadd.f32 1.0, %v3021_v27  ;;  %v3275_v20 = vsub.f32 0.0, %v6544_v42  ;;  %v3279_v27 = vsub.f32 0.0, %v6569_v8  ;;  %4611 = vmatpush3.bf16.msra.mxu0 %v4948_v47  ;;  %4324 = vmatprep.subr.bf16.mxu1 %v4949_v18  ;;  %v4951_v47 = vld [vmem:[%s6037_s8 + $0x98] sm:$0xff]  }
0x119e   : > { %v3025_v37 = vmul.f32 0.5, %v6588_v26  ;;  %5066 = vrcp.f32 %v3039_v7  ;;  %7085 = vst [vmem:[#allocation53_spill] sm:$0xff] %v6617_v53  ;;  %v6632_v7 = vand.u32 2147483647, %v6617_v53  ;;  %v6640_v40 = vmul.f32 0.5, %v6538_v9  ;;  %4325 = vmatpush3.bf16.msra.mxu1 %v4950_v59  ;;  %v4952_v9 = vld [vmem:[%s6037_s8 + $0x68] sm:$0xff]   ;;  %4612 = vmatprep.subr.bf16.mxu0 %v4951_v47 }
0x119f   : > { %v3030_v57 = vmul.f32 0.5, %v6594_v60  ;;  %5068 = vrcp.f32 %v3033_v3  ;;  %v6637_v3 = vmul.f32 0.70710677, %v6552_v41  ;;  %v6656_v46 = vmul.f32 %v3275_v20, %v6544_v42  ;;  %4326 = vmatprep.subr.bf16.mxu1 %v4952_v9 }
0x11a0   : > { %v3037_v6 = vadd.f32 1.0, %v3025_v37  ;;  %7086 = vst [vmem:[#allocation54_spill] sm:$0xff] %v6632_v7  ;;  %v6659_v39 = vmul.f32 %v3279_v27, %v6569_v8  ;;  %v6669_v8 = vmul.f32 0.70710677, %v6560_v45  ;;  %vm3351_vm10 = vcmp.ge.f32.partialorder %v6558_v58, 0.0 }
0x11a1   : > { %v3042_v21 = vadd.f32 1.0, %v3030_v57  ;;  %7087 = vst [vmem:[#allocation55_spill] sm:$0xff] %v6637_v3  ;;  %v3273_v57 = vsub.f32 0.0, %v6573_v14  ;;  %v6650_v18 = vand.u32 2147483647, %v6637_v3  ;;  %4613 = vmatpush3.bf16.msra.mxu0 %v4951_v47  ;;  %v4957_v47 = vld [vmem:[%s6037_s8 + $0xa8] sm:$0xff]  }
0x11a2   : > { %v6611_v0 = vpop.eup %5058  ;;  %5070 = vrcp.f32 %v3037_v6  ;;  %v3026_v6 = vmul.f32 0.5, %v6632_v7  ;;  %7089 = vst [vmem:[#allocation57_spill] sm:$0xff] %v6669_v8  ;;  %vm3345_vm11 = vcmp.ge.f32.partialorder %v6564_v4, 0.0  ;;  %vm3349_vm12 = vcmp.ge.f32.partialorder %v6576_v16, 0.0 }
0x11a3   : > { %v6619_v13 = vpop.eup %5060  ;;  %v3055_v25 = vmul.f32 0.17087276, %v6611_v0  ;;  %5072 = vrcp.f32 %v3042_v21  ;;  %v3277_v21 = vsub.f32 0.0, %v6588_v26  ;;  %7088 = vst [vmem:[#allocation56_spill] sm:$0xff] %v6650_v18  ;;  %v3024_v59 = vmul.f32 0.5, %v6650_v18 }
0x11a4   : > { %v6627_v23 = vpop.eup %5062  ;;  %v3056_v24 = vmul.f32 0.17087276, %v6619_v13  ;;  %v3038_v36 = vadd.f32 1.0, %v3026_v6  ;;  %v6666_v42 = vmul.f32 %v3273_v57, %v6573_v14  ;;  %vm3354_vm13 = vcmp.ge.f32.partialorder %v6581_v15, 0.0 }
0x11a5   : > { %v3067_v44 = vadd.f32 -0.82215226, %v3055_v25  ;;  %v3058_v50 = vmul.f32 0.17087276, %v6627_v23  ;;  %v6645_v56 = vpop.eup %5064  ;;  %v6675_v6 = vmul.f32 %v3277_v21, %v6588_v26 }
0x11a6   : > { %v3068_v37 = vadd.f32 -0.82215226, %v3056_v24  ;;  %v3059_v52 = vmul.f32 0.17087276, %v6645_v56  ;;  %5074 = vrcp.f32 %v3038_v36  ;;  %v4958_v36 = vld [vmem:[%s6037_s8 + $0x78] sm:$0xff]  }
0x11a7   : > { %v3079_v25 = vmul.f32 %v6611_v0, %v3067_v44  ;;  %v3070_v54 = vadd.f32 -0.82215226, %v3058_v50  ;;  %v4953_v44 = vld [vmem:[%s6037_s8 + $0x28] sm:$0xff]  }
0x11a8   : > { %v3080_v24 = vmul.f32 %v6619_v13, %v3068_v37  ;;  %v4954_v37 = vld [vmem:[%s6037_s8 + $0xa0] sm:$0xff]   ;;  %v3071_v41 = vadd.f32 -0.82215226, %v3059_v52  ;;  %v6671_v20 = vpop.eup %5066  ;;  %4327 = vmatpush3.bf16.msra.mxu1 %v4953_v44  ;;  %v4955_v52 = vld [vmem:[%s6037_s8 + $0x70] sm:$0xff]   ;;  %v3036_v44 = vadd.f32 1.0, %v3024_v59 }
0x11a9   : > { %v3091_v50 = vadd.f32 1.4885159, %v3079_v25  ;;  %v3082_v38 = vmul.f32 %v6627_v23, %v3070_v54  ;;  %4614 = vmatprep.subr.bf16.mxu0 %v4954_v37  ;;  %v6679_v25 = vpop.eup %5068  ;;  %v3063_v9 = vmul.f32 0.17087276, %v6671_v20  ;;  %4328 = vmatprep.subr.bf16.mxu1 %v4955_v52 }
0x11aa   : > { %v3092_v10 = vadd.f32 1.4885159, %v3080_v24  ;;  %v3083_v57 = vmul.f32 %v6645_v56, %v3071_v41  ;;  %v6685_v24 = vand.u32 2147483647, %v6669_v8  ;;  %4615 = vmatpush3.bf16.msra.mxu0 %v4954_v37  ;;  %5076 = vrcp.f32 %v3036_v44 }
0x11ab   : > { %v3103_v54 = vmul.f32 %v6611_v0, %v3091_v50  ;;  %v3094_v27 = vadd.f32 1.4885159, %v3082_v38  ;;  %v4956_v38 = vld [vmem:[%s6037_s8 + $0x30] sm:$0xff]   ;;  %v3057_v50 = vmul.f32 0.17087276, %v6679_v25  ;;  %4616 = vmatprep.subr.bf16.mxu0 %v4957_v47 }
0x11ac   : > { %v3104_v14 = vmul.f32 %v6619_v13, %v3092_v10  ;;  %v6691_v45 = vpop.eup %5070  ;;  %v3095_v41 = vadd.f32 1.4885159, %v3083_v57  ;;  %v3075_v3 = vadd.f32 -0.82215226, %v3063_v9  ;;  %4329 = vmatpush3.bf16.msra.mxu1 %v4956_v38  ;;  %v4959_v9 = vld [vmem:[%s6037_s8 + $0x38] sm:$0xff]   ;;  %v4960_v38 = vld [vmem:[%s6037_s8 + $0xb0] sm:$0xff]  }
0x11ad   : > { %v3115_v26 = vadd.f32 -1.135204, %v3103_v54  ;;  %v3106_v21 = vmul.f32 %v6627_v23, %v3094_v27  ;;  %v6693_v8 = vpop.eup %5072  ;;  %v3069_v27 = vadd.f32 -0.82215226, %v3057_v50  ;;  %v3061_v59 = vmul.f32 0.17087276, %v6691_v45  ;;  %4330 = vmatprep.subr.bf16.mxu1 %v4958_v36 }
0x11ae   : > { %v3116_v10 = vadd.f32 -1.135204, %v3104_v14  ;;  %v3107_v52 = vmul.f32 %v6645_v56, %v3095_v41  ;;  %v3087_v14 = vmul.f32 %v6671_v20, %v3075_v3  ;;  %v3066_v57 = vmul.f32 0.17087276, %v6693_v8  ;;  %4617 = vmatpush3.bf16.msra.mxu0 %v4957_v47 }
0x11af   : > { %v3127_v54 = vmul.f32 %v6611_v0, %v3115_v26  ;;  %v3118_v2 = vadd.f32 -1.135204, %v3106_v21  ;;  %v3081_v21 = vmul.f32 %v6679_v25, %v3069_v27  ;;  %v3073_v50 = vadd.f32 -0.82215226, %v3061_v59  ;;  %4618 = vmatprep.subr.bf16.mxu0 %v4960_v38 }
0x11b0   : > { %v3128_v37 = vmul.f32 %v6619_v13, %v3116_v10  ;;  %v3119_v7 = vadd.f32 -1.135204, %v3107_v52  ;;  %v3099_v10 = vadd.f32 1.4885159, %v3087_v14  ;;  %4331 = vmatpush3.bf16.msra.mxu1 %v4959_v9  ;;  %v3078_v59 = vadd.f32 -0.82215226, %v3066_v57  ;;  %v6717_v57 = vpop.eup %5074 }
0x11b1   : > { %v3139_v53 = vadd.f32 0.27886808, %v3127_v54  ;;  %v3130_v26 = vmul.f32 %v6627_v23, %v3118_v2  ;;  %v3093_v35 = vadd.f32 1.4885159, %v3081_v21  ;;  %v3085_v33 = vmul.f32 %v6691_v45, %v3073_v50  ;;  %v4961_v2 = vld [vmem:[%s6037_s8 + $0xb8] sm:$0xff]  }
0x11b2   : > { %v3140_v18 = vadd.f32 0.27886808, %v3128_v37  ;;  %v3131_v27 = vmul.f32 %v6645_v56, %v3119_v7  ;;  %v3111_v47 = vmul.f32 %v6671_v20, %v3099_v10  ;;  %4619 = vmatpush3.bf16.msra.mxu0 %v4960_v38  ;;  %v3090_v9 = vmul.f32 %v6693_v8, %v3078_v59 }
0x11b3   : > { %v3151_v3 = vmul.f32 %v6611_v0, %v3139_v53  ;;  %v3142_v41 = vadd.f32 0.27886808, %v3130_v26  ;;  %v3105_v52 = vmul.f32 %v6679_v25, %v3093_v35  ;;  %v3097_v53 = vadd.f32 1.4885159, %v3085_v33  ;;  %4620 = vmatprep.subr.bf16.mxu0 %v4961_v2 }
0x11b4   : > { %v3152_v54 = vmul.f32 %v6619_v13, %v3140_v18  ;;  %v3143_v36 = vadd.f32 0.27886808, %v3131_v27  ;;  %v3123_v26 = vadd.f32 -1.135204, %v3111_v47  ;;  %v3102_v38 = vadd.f32 1.4885159, %v3090_v9 }
0x11b5   : > { %v3163_v37 = vadd.f32 -0.18628806, %v3151_v3  ;;  %v3154_v44 = vmul.f32 %v6627_v23, %v3142_v41  ;;  %v3117_v7 = vadd.f32 -1.135204, %v3105_v52  ;;  %v3109_v50 = vmul.f32 %v6691_v45, %v3097_v53 }
0x11b6   : > { %v3164_v14 = vadd.f32 -0.18628806, %v3152_v54  ;;  %v3155_v35 = vmul.f32 %v6645_v56, %v3143_v36  ;;  %v3135_v33 = vmul.f32 %v6671_v20, %v3123_v26  ;;  %4621 = vmatpush3.bf16.msra.mxu0 %v4961_v2  ;;  %v6727_v26 = vpop.eup %5076 }
0x11b7   : > { %v3175_v18 = vmul.f32 %v6611_v0, %v3163_v37  ;;  %v3166_v21 = vadd.f32 -0.18628806, %v3154_v44  ;;  %v3129_v54 = vmul.f32 %v6679_v25, %v3117_v7  ;;  %v3121_v27 = vadd.f32 -1.135204, %v3109_v50 }
0x11b8   : > { %v3176_v10 = vmul.f32 %v6619_v13, %v3164_v14  ;;  %v3167_v59 = vadd.f32 -0.18628806, %v3155_v35  ;;  %v3147_v37 = vadd.f32 0.27886808, %v3135_v33  ;;  %v3114_v44 = vmul.f32 %v6693_v8, %v3102_v38 }
0x11b9   : > { %v3187_v3 = vadd.f32 0.09678418, %v3175_v18  ;;  %v3178_v41 = vmul.f32 %v6627_v23, %v3166_v21  ;;  %v3141_v14 = vadd.f32 0.27886808, %v3129_v54  ;;  %v3133_v36 = vmul.f32 %v6691_v45, %v3121_v27 }
0x11ba   : > { %v3188_v47 = vadd.f32 0.09678418, %v3176_v10  ;;  %v3179_v18 = vmul.f32 %v6645_v56, %v3167_v59  ;;  %v3159_v21 = vmul.f32 %v6671_v20, %v3147_v37  ;;  %v3126_v2 = vadd.f32 -1.135204, %v3114_v44 }
0x11bb   : > { %v3199_v52 = vmul.f32 %v6611_v0, %v3187_v3  ;;  %v3190_v53 = vadd.f32 0.09678418, %v3178_v41  ;;  %v3153_v10 = vmul.f32 %v6679_v25, %v3141_v14  ;;  %v3145_v35 = vadd.f32 0.27886808, %v3133_v36 }
0x11bc   : > { %v3200_v9 = vmul.f32 %v6619_v13, %v3188_v47  ;;  %v3191_v38 = vadd.f32 0.09678418, %v3179_v18  ;;  %v3171_v3 = vadd.f32 -0.18628806, %v3159_v21  ;;  %v3138_v41 = vmul.f32 %v6693_v8, %v3126_v2 }
0x11bd   : > { %v3211_v7 = vadd.f32 0.37409195, %v3199_v52  ;;  %v3202_v50 = vmul.f32 %v6627_v23, %v3190_v53  ;;  %v3165_v47 = vadd.f32 -0.18628806, %v3153_v10  ;;  %v3157_v59 = vmul.f32 %v6691_v45, %v3145_v35 }
0x11be   : > { %v3212_v33 = vadd.f32 0.37409195, %v3200_v9  ;;  %v3203_v44 = vmul.f32 %v6645_v56, %v3191_v38  ;;  %v3183_v52 = vmul.f32 %v6671_v20, %v3171_v3  ;;  %v3150_v53 = vadd.f32 0.27886808, %v3138_v41 }
0x11bf   : > { %v3223_v54 = vmul.f32 %v6611_v0, %v3211_v7  ;;  %v3214_v27 = vadd.f32 0.37409195, %v3202_v50  ;;  %v3177_v9 = vmul.f32 %v6679_v25, %v3165_v47  ;;  %v3169_v18 = vadd.f32 -0.18628806, %v3157_v59 }
0x11c0   : > { %v3224_v37 = vmul.f32 %v6619_v13, %v3212_v33  ;;  %v3215_v2 = vadd.f32 0.37409195, %v3203_v44  ;;  %v3195_v7 = vadd.f32 0.09678418, %v3183_v52  ;;  %v3162_v50 = vmul.f32 %v6693_v8, %v3150_v53 }
0x11c1   : > { %v3235_v14 = vadd.f32 1.0000237, %v3223_v54  ;;  %v3226_v36 = vmul.f32 %v6627_v23, %v3214_v27  ;;  %v3189_v33 = vadd.f32 0.09678418, %v3177_v9  ;;  %v3181_v38 = vmul.f32 %v6691_v45, %v3169_v18 }
0x11c2   : > { %v3236_v21 = vadd.f32 1.0000237, %v3224_v37  ;;  %v3227_v41 = vmul.f32 %v6645_v56, %v3215_v2  ;;  %v3207_v54 = vmul.f32 %v6671_v20, %v3195_v7  ;;  %v3174_v27 = vadd.f32 -0.18628806, %v3162_v50 }
0x11c3   : > { %v3247_v10 = vmul.f32 %v6611_v0, %v3235_v14  ;;  %v3238_v35 = vadd.f32 1.0000237, %v3226_v36  ;;  %v3201_v37 = vmul.f32 %v6679_v25, %v3189_v33  ;;  %v3193_v44 = vadd.f32 0.09678418, %v3181_v38 }
0x11c4   : > { %v3248_v3 = vmul.f32 %v6619_v13, %v3236_v21  ;;  %v3239_v53 = vadd.f32 1.0000237, %v3227_v41  ;;  %v3219_v14 = vadd.f32 0.37409195, %v3207_v54  ;;  %v3186_v36 = vmul.f32 %v6693_v8, %v3174_v27 }
0x11c5   : > { %v3259_v47 = vadd.f32 -1.2655122, %v3247_v10  ;;  %v3250_v59 = vmul.f32 %v6627_v23, %v3238_v35  ;;  %v3213_v21 = vadd.f32 0.37409195, %v3201_v37  ;;  %v3205_v2 = vmul.f32 %v6691_v45, %v3193_v44 }
0x11c6   : > { %v3260_v52 = vadd.f32 -1.2655122, %v3248_v3  ;;  %v3251_v50 = vmul.f32 %v6645_v56, %v3239_v53  ;;  %v3231_v10 = vmul.f32 %v6671_v20, %v3219_v14  ;;  %v3198_v35 = vadd.f32 0.09678418, %v3186_v36 }
0x11c7   : > { %v3295_v9 = vadd.f32 %v6604_v48, %v3259_v47  ;;  %v3262_v18 = vadd.f32 -1.2655122, %v3250_v59  ;;  %v3225_v3 = vmul.f32 %v6679_v25, %v3213_v21  ;;  %v3217_v41 = vadd.f32 0.37409195, %v3205_v2 }
0x11c8   : > { %v3296_v7 = vadd.f32 %v6614_v11, %v3260_v52  ;;  %v3263_v27 = vadd.f32 -1.2655122, %v3251_v50  ;;  %v3243_v48 = vadd.f32 1.0000237, %v3231_v10  ;;  %v3210_v47 = vmul.f32 %v6693_v8, %v3198_v35 }
0x11c9   : > { %v3307_v33 = vmul.f32 1.442695, %v3295_v9  ;;  %v3298_v38 = vadd.f32 %v6623_v17, %v3262_v18  ;;  %v3237_v37 = vadd.f32 1.0000237, %v3225_v3  ;;  %v3229_v11 = vmul.f32 %v6691_v45, %v3217_v41 }
0x11ca   : > { %v3309_v54 = vmul.f32 1.442695, %v3296_v7  ;;  %v3299_v44 = vadd.f32 %v6656_v46, %v3263_v27  ;;  %v3255_v52 = vmul.f32 %v6671_v20, %v3243_v48  ;;  %v3222_v53 = vadd.f32 0.37409195, %v3210_v47 }
0x11cb   : > { %5078 = vpow2.f32 %v3307_v33  ;;  %v3313_v59 = vmul.f32 1.442695, %v3298_v38  ;;  %v3249_v17 = vmul.f32 %v6679_v25, %v3237_v37  ;;  %v3241_v14 = vadd.f32 1.0000237, %v3229_v11 }
0x11cc   : > { %5080 = vpow2.f32 %v3309_v54  ;;  %v3062_v36 = vmul.f32 0.17087276, %v6717_v57  ;;  %v3315_v9 = vmul.f32 1.442695, %v3299_v44  ;;  %v3267_v18 = vadd.f32 -1.2655122, %v3255_v52 }
0x11cd   : > { %5082 = vpow2.f32 %v3313_v59  ;;  %v3234_v21 = vmul.f32 %v6693_v8, %v3222_v53  ;;  %v3060_v2 = vmul.f32 0.17087276, %v6727_v26  ;;  %v3261_v7 = vadd.f32 -1.2655122, %v3249_v17 }
0x11ce   : > { %v3253_v50 = vmul.f32 %v6691_v45, %v3241_v14  ;;  %v3074_v10 = vadd.f32 -0.82215226, %v3062_v36  ;;  %v3028_v46 = vmul.f32 0.5, %v6685_v24  ;;  %5084 = vpow2.f32 %v3315_v9 }
0x11cf   : > { %v3303_v35 = vadd.f32 %v6659_v39, %v3267_v18  ;;  %v3246_v33 = vadd.f32 1.0000237, %v3234_v21  ;;  %v3072_v38 = vadd.f32 -0.82215226, %v3060_v2  ;;  %v3297_v3 = vadd.f32 %v6666_v42, %v3261_v7 }
0x11d0   : > { %v3265_v41 = vadd.f32 -1.2655122, %v3253_v50  ;;  %v3086_v54 = vmul.f32 %v6717_v57, %v3074_v10  ;;  %v3040_v27 = vadd.f32 1.0, %v3028_v46  ;;  %v6774_v47 = vmul.f32 0.5, %v6541_v1 }
0x11d1   : > { %v3323_v48 = vmul.f32 1.442695, %v3303_v35  ;;  %v3258_v59 = vmul.f32 %v6693_v8, %v3246_v33  ;;  %v3084_v39 = vmul.f32 %v6727_v26, %v3072_v38  ;;  %v3311_v37 = vmul.f32 1.442695, %v3297_v3 }
0x11d2   : > { %v3301_v11 = vadd.f32 %v6675_v6, %v3265_v41  ;;  %v3098_v42 = vadd.f32 1.4885159, %v3086_v54  ;;  %5086 = vrcp.f32 %v3040_v27  ;;  %v7090_v52 = vsub.f32 0.0, %v6594_v60 }
0x11d3   : > { %5088 = vpow2.f32 %v3323_v48  ;;  %v3270_v44 = vadd.f32 -1.2655122, %v3258_v59  ;;  %v3096_v17 = vadd.f32 1.4885159, %v3084_v39  ;;  %v6784_v14 = vmul.f32 0.5, %v6546_v34 }
0x11d4   : > { %v3294_v53 = vmul.f32 %v7090_v52, %v6594_v60  ;;  %5090 = vpow2.f32 %v3311_v37  ;;  %v3319_v36 = vmul.f32 1.442695, %v3301_v11  ;;  %v3110_v9 = vmul.f32 %v6717_v57, %v3098_v42 }
0x11d5   : > { %v5079_v1 = vpop.eup %5078  ;;  %v6790_v21 = vmul.f32 0.5, %v6548_v62  ;;  %v3108_v60 = vmul.f32 %v6727_v26, %v3096_v17  ;;  %v6795_v10 = vmul.f32 0.70710677, %v6566_v5 }
0x11d6   : > { %v5081_v18 = vpop.eup %5080  ;;  %v3331_v6 = vmul.f32 %v5079_v1, %v6611_v0  ;;  %v3306_v2 = vadd.f32 %v3294_v53, %v3270_v44  ;;  %5092 = vpow2.f32 %v3319_v36  ;;  %v3122_v34 = vadd.f32 -1.135204, %v3110_v9 }
0x11d7   : > { %v5083_v7 = vpop.eup %5082  ;;  %v3332_v50 = vmul.f32 %v5081_v18, %v6619_v13  ;;  %v3120_v41 = vadd.f32 -1.135204, %v3108_v60  ;;  %v6810_v44 = vand.u32 2147483647, %v6795_v10  ;;  %vm3353_vm1 = vcmp.ge.f32.partialorder %v6795_v10, 0.0 }
0x11d8   : > { %v3355_v46 = vsub.f32 1.0, %v3331_v6  ;;  %v4159_v35 = vadd.f32 -1.0, %v3331_v6  ;;  %v3334_v0 = vmul.f32 %v5083_v7, %v6627_v23  ;;  %v3329_v33 = vmul.f32 1.442695, %v3306_v2  ;;  %v5085_v54 = vpop.eup %5084 }
0x11d9   : > { %v3356_v38 = vsub.f32 1.0, %v3332_v50  ;;  %v4160_v3 = vadd.f32 -1.0, %v3332_v50  ;;  %v3134_v62 = vmul.f32 %v6717_v57, %v3122_v34  ;;  %v3335_v23 = vmul.f32 %v5085_v54, %v6645_v56 }
0x11da   : > { %v3379_v27 = vsel %vm3343_vm6, %v3355_v46, %v4159_v35  ;;  %v3358_v13 = vsub.f32 1.0, %v3334_v0  ;;  %v4162_v48 = vadd.f32 -1.0, %v3334_v0  ;;  %5094 = vpow2.f32 %v3329_v33 }
0x11db   : > { %v3391_v59 = vadd.f32 1.0, %v3379_v27  ;;  %v3380_v39 = vsel %vm3344_vm7, %v3356_v38, %v4160_v3  ;;  %v3146_v37 = vadd.f32 0.27886808, %v3134_v62  ;;  %v3132_v43 = vmul.f32 %v6727_v26, %v3120_v41 }
0x11dc   : > { %v3392_v11 = vadd.f32 1.0, %v3380_v39  ;;  %v3382_v42 = vsel %vm3346_vm8, %v3358_v13, %v4162_v48  ;;  %v6812_v52 = vpop.eup %5086  ;;  %v3359_v17 = vsub.f32 1.0, %v3335_v23  ;;  %v4163_v1 = vadd.f32 -1.0, %v3335_v23 }
0x11dd   : > { %v3403_v53 = vmul.f32 %v3391_v59, %v6590_v28  ;;  %v3394_v49 = vadd.f32 1.0, %v3382_v42  ;;  %v5089_v56 = vpop.eup %5088  ;;  %v3158_v55 = vmul.f32 %v6717_v57, %v3146_v37  ;;  %v3144_v9 = vadd.f32 0.27886808, %v3132_v43 }
0x11de   : > { %v3404_v36 = vmul.f32 %v3392_v11, %v6597_v12  ;;  %v3064_v18 = vmul.f32 0.17087276, %v6812_v52  ;;  %v5091_v6 = vpop.eup %5090  ;;  %v3383_v28 = vsel %vm3347_vm9, %v3359_v17, %v4163_v1  ;;  %v3339_v7 = vmul.f32 %v5089_v56, %v6671_v20 }
0x11df   : > { %v6820_v2 = vmul.f32 %v3403_v53, %v6490_v29  ;;  %v3406_v60 = vmul.f32 %v3394_v49, %v6599_v63  ;;  %v3395_v50 = vadd.f32 1.0, %v3383_v28  ;;  %v3333_v34 = vmul.f32 %v5091_v6, %v6679_v25 }
0x11e0   : > { %v3416_v12 = vmul.f32 %v3404_v36, %v6492_v30  ;;  %v3170_v46 = vadd.f32 -0.18628806, %v3158_v55  ;;  %v5093_v35 = vpop.eup %5092  ;;  %v3363_v29 = vsub.f32 1.0, %v3339_v7  ;;  %v4167_v33 = vadd.f32 -1.0, %v3339_v7  ;;  %v7092_v7 = vld [vmem:[#allocation45_spill] sm:$0xff] }
0x11e1   : > { %v3418_v0 = vmul.f32 %v3406_v60, %v6494_v31  ;;  %v3156_v63 = vmul.f32 %v6727_v26, %v3144_v9  ;;  %v3407_v61 = vmul.f32 %v3395_v50, %v6607_v51  ;;  %v3357_v38 = vsub.f32 1.0, %v3333_v34 }
0x11e2   : > { %v4161_v3 = vadd.f32 -1.0, %v3333_v34  ;;  %v3337_v20 = vmul.f32 %v5093_v35, %v6691_v45  ;;  %v3387_v25 = vsel %vm3351_vm10, %v3363_v29, %v4167_v33  ;;  %v3182_v62 = vmul.f32 %v6717_v57, %v3170_v46  ;;  %v7093_v34 = vld [vmem:[#allocation54_spill] sm:$0xff] }
0x11e3   : > { %v3427_v30 = vpack.c.bf16 %v3418_v0, %v6820_v2  ;;  %v3168_v41 = vadd.f32 -0.18628806, %v3156_v63  ;;  %v3419_v31 = vmul.f32 %v3407_v61, %v6496_v22  ;;  %v3399_v27 = vadd.f32 1.0, %v3387_v25 }
0x11e4   : > { %v5095_v54 = vpop.eup %5094  ;;  %v3381_v13 = vsel %vm3345_vm11, %v3357_v38, %v4161_v3  ;;  %v3361_v51 = vsub.f32 1.0, %v3337_v20  ;;  %v4165_v59 = vadd.f32 -1.0, %v3337_v20  ;;  %v3194_v39 = vadd.f32 0.09678418, %v3182_v62 }
0x11e5   : > { %v3393_v48 = vadd.f32 1.0, %v3381_v13  ;;  %v3342_v45 = vmul.f32 %v5095_v54, %v6693_v8  ;;  %v3411_v23 = vmul.f32 %v3399_v27, %v6640_v40  ;;  %v3180_v58 = vmul.f32 %v6727_v26, %v3168_v41 }
0x11e6   : > { %v3076_v37 = vadd.f32 -0.82215226, %v3064_v18  ;;  %v3029_v11 = vmul.f32 0.5, %v6810_v44  ;;  %v3385_v22 = vsel %vm3349_vm12, %v3361_v51, %v4165_v59  ;;  %v3206_v8 = vmul.f32 %v6717_v57, %v3194_v39  ;;  %v7091_v18 = vld [vmem:[#allocation44_spill] sm:$0xff] }
0x11e7   : > { %v3405_v42 = vmul.f32 %v3393_v48, %v6774_v47  ;;  %v3366_v4 = vsub.f32 1.0, %v3342_v45  ;;  %v4170_v43 = vadd.f32 -1.0, %v3342_v45  ;;  %v6848_v53 = vmul.f32 %v6498_v19, %v3411_v23 }
0x11e8   : > { %v3397_v49 = vadd.f32 1.0, %v3385_v22  ;;  %v3192_v17 = vadd.f32 0.09678418, %v3180_v58  ;;  %v3088_v47 = vmul.f32 %v6812_v52, %v3076_v37  ;;  %v3041_v56 = vadd.f32 1.0, %v3029_v11 }
0x11e9   : > { %v6852_v40 = vmul.f32 %v3405_v42, %v6500_v32  ;;  %v3390_v1 = vsel %vm3354_vm13, %v3366_v4, %v4170_v43  ;;  %v3218_v55 = vadd.f32 0.37409195, %v3206_v8  ;;  %v3428_v28 = vpack.c.bf16 %v3419_v31, %v3416_v12 }
0x11ea   : > { %v3409_v16 = vmul.f32 %v3397_v49, %v6784_v14  ;;  %v3402_v36 = vadd.f32 1.0, %v3390_v1  ;;  %v3204_v19 = vmul.f32 %v6727_v26, %v3192_v17  ;;  %v3100_v9 = vadd.f32 1.4885159, %v3088_v47 }
0x11eb   : > { %5096 = vrcp.f32 %v3041_v56  ;;  %v3230_v2 = vmul.f32 %v6717_v57, %v3218_v55  ;;  %v3278_v46 = vsub.f32 0.0, %v7093_v34  ;;  %3657 = vmatprep.mubr.bf16.mxu1 %v3428_v28  ;;  %v3280_v8 = vsub.f32 0.0, %v6685_v24 }
0x11ec   : > { %v6860_v6 = vmul.f32 %v3409_v16, %v7091_v18  ;;  %v3414_v32 = vmul.f32 %v3402_v36, %v6790_v21  ;;  %v3216_v15 = vadd.f32 0.37409195, %v3204_v19  ;;  %v3112_v60 = vmul.f32 %v6812_v52, %v3100_v9  ;;  %v7094_v21 = vld [vmem:[#allocation56_spill] sm:$0xff]  ;;  %3658 = vmatmul.mubr.bf16.vlgmr.msra.gmra.mrb[64].mxu1 %v3427_v30  ;;  %v7095_v18 = vld [vmem:[#allocation53_spill] sm:$0xff] }
0x11ed   : > { %v3242_v14 = vadd.f32 1.0000237, %v3230_v2  ;;  %v3276_v63 = vsub.f32 0.0, %v7094_v21  ;;  %v3290_v3 = vmul.f32 %v3278_v46, %v7093_v34  ;;  %vm3350_vm14 = vcmp.ge.f32.partialorder %v7095_v18, 0.0  ;;  %v7097_v46 = vld [vmem:[#allocation55_spill] sm:$0xff] }
0x11ee   : > { %v6866_v50 = vmul.f32 %v7092_v7, %v3414_v32  ;;  %v3228_v35 = vmul.f32 %v6727_v26, %v3216_v15  ;;  %v3124_v0 = vadd.f32 -1.135204, %v3112_v60  ;;  %v3292_v32 = vmul.f32 %v3280_v8, %v6685_v24 }
0x11ef   : > { %v3254_v29 = vmul.f32 %v6717_v57, %v3242_v14  ;;  %v3288_v54 = vmul.f32 %v3276_v63, %v7094_v21  ;;  %vm3348_vm15 = vcmp.ge.f32.partialorder %v7097_v46, 0.0 }
0x11f0   : > { %v3240_v33 = vadd.f32 1.0000237, %v3228_v35  ;;  %v3432_v61 = vpack.c.bf16 %v6866_v50, %v6848_v53  ;;  %v3136_v12 = vmul.f32 %v6812_v52, %v3124_v0  ;;  %v7102_v53 = vld [vmem:[#allocation52_spill] sm:$0xff] }
0x11f1   : > { %v3266_v38 = vadd.f32 -1.2655122, %v3254_v29  ;;  %v2992_v50 = vmul.f32 0.5, %v7102_v53 }
0x11f2   : > { %v3252_v20 = vmul.f32 %v6727_v26, %v3240_v33  ;;  %v3148_v25 = vadd.f32 0.27886808, %v3136_v12  ;;  %v7098_v33 = vld [vmem:[#allocation51_spill] sm:$0xff] }
0x11f3   : > { %v3302_v62 = vadd.f32 %v3290_v3, %v3266_v38  ;;  %v2988_v21 = vmul.f32 0.5, %v7098_v33  ;;  %v7099_v38 = vld [vmem:[#allocation46_spill] sm:$0xff] }
0x11f4   : > { %v3264_v41 = vadd.f32 -1.2655122, %v3252_v20  ;;  %v3160_v27 = vmul.f32 %v6812_v52, %v3148_v25 }
0x11f5   : > { %v6878_v31 = vpop.eup %5096  ;;  %v3321_v30 = vmul.f32 1.442695, %v3302_v62  ;;  %v7100_v62 = vld [vmem:[#allocation47_spill] sm:$0xff] }
0x11f6   : > { %v3300_v13 = vadd.f32 %v3288_v54, %v3264_v41  ;;  %v3065_v51 = vmul.f32 0.17087276, %v6878_v31  ;;  %v3172_v48 = vadd.f32 -0.18628806, %v3160_v27 }
0x11f7   : > { %5098 = vpow2.f32 %v3321_v30 }
0x11f8   : > { %v3317_v59 = vmul.f32 1.442695, %v3300_v13  ;;  %v3077_v45 = vadd.f32 -0.82215226, %v3065_v51  ;;  %v3184_v39 = vmul.f32 %v6812_v52, %v3172_v48  ;;  %v3281_v48 = vsub.f32 0.0, %v6810_v44 }
0x11fa   : > { %5100 = vpow2.f32 %v3317_v59  ;;  %v3089_v23 = vmul.f32 %v6878_v31, %v3077_v45  ;;  %v3196_v58 = vadd.f32 0.09678418, %v3184_v39 }
0x11fc   : > { %v3101_v37 = vadd.f32 1.4885159, %v3089_v23  ;;  %v3208_v11 = vmul.f32 %v6812_v52, %v3196_v58  ;;  %v3293_v58 = vmul.f32 %v3281_v48, %v6810_v44 }
0x11fe   : > { %v3113_v42 = vmul.f32 %v6878_v31, %v3101_v37  ;;  %v3220_v22 = vadd.f32 0.37409195, %v3208_v11 }
0x1200   : > { %v3125_v4 = vadd.f32 -1.135204, %v3113_v42  ;;  %v3232_v43 = vmul.f32 %v6812_v52, %v3220_v22  ;;  %v7101_v42 = vld [vmem:[#allocation57_spill] sm:$0xff] }
0x1201   : > { %v5099_v49 = vpop.eup %5098  ;;  %vm3352_vm0 = vcmp.ge.f32.partialorder %v7101_v42, 0.0 }
0x1202   : > { %v3137_v17 = vmul.f32 %v6878_v31, %v3125_v4  ;;  %v3338_v1 = vmul.f32 %v5099_v49, %v6717_v57  ;;  %v3244_v47 = vadd.f32 1.0000237, %v3232_v43  ;;  %v7096_v57 = vld [vmem:[#allocation50_spill] sm:$0xff]  ;;  %v7103_v49 = vld [vmem:[#allocation48_spill] sm:$0xff] }
0x1203   : > { %v2990_v14 = vmul.f32 0.5, %v7096_v57 }
0x1204   : > { %v5101_v56 = vpop.eup %5100  ;;  %v3149_v16 = vadd.f32 0.27886808, %v3137_v17  ;;  %v3362_v36 = vsub.f32 1.0, %v3338_v1  ;;  %v4166_v55 = vadd.f32 -1.0, %v3338_v1  ;;  %v3256_v9 = vmul.f32 %v6812_v52, %v3244_v47 }
0x1205   : > { %v3336_v19 = vmul.f32 %v5101_v56, %v6727_v26 }
0x1206   : > { %v3161_v2 = vmul.f32 %v6878_v31, %v3149_v16  ;;  %v3386_v15 = vsel %vm3350_vm14, %v3362_v36, %v4166_v55  ;;  %v3268_v7 = vadd.f32 -1.2655122, %v3256_v9  ;;  %v2993_v16 = vmul.f32 0.5, %v6566_v5 }
0x1207   : > { %v3360_v60 = vsub.f32 1.0, %v3336_v19  ;;  %v4164_v28 = vadd.f32 -1.0, %v3336_v19  ;;  %v3398_v34 = vadd.f32 1.0, %v3386_v15  ;;  %v7104_v19 = vld [vmem:[#allocation49_spill] sm:$0xff] }
0x1208   : > { %v3173_v35 = vadd.f32 -0.18628806, %v3161_v2  ;;  %v3304_v26 = vadd.f32 %v3292_v32, %v3268_v7 }
0x1209   : > { %v3384_v0 = vsel %vm3348_vm15, %v3360_v60, %v4164_v28  ;;  %v3410_v29 = vmul.f32 %v3398_v34, %v2990_v14  ;;  %v7105_v34 = vld [vmem:[#allocation40_spill] sm:$0xff] }
0x120a   : > { %v3396_v63 = vadd.f32 1.0, %v3384_v0  ;;  %v3185_v24 = vmul.f32 %v6878_v31, %v3173_v35  ;;  %v3325_v12 = vmul.f32 1.442695, %v3304_v26  ;;  %v7106_v35 = vld [vmem:[#allocation41_spill] sm:$0xff] }
0x120b   : > { %v3422_v3 = vmul.f32 %v3410_v29, %v7099_v38  ;;  %v7107_v38 = vld [vmem:[#allocation42_spill] sm:$0xff] }
0x120c   : > { %v3408_v20 = vmul.f32 %v3396_v63, %v2988_v21  ;;  %v3197_v25 = vadd.f32 0.09678418, %v3185_v24  ;;  %5102 = vpow2.f32 %v3325_v12 }
0x120e   : > { %v3420_v41 = vmul.f32 %v3408_v20, %v7100_v62  ;;  %v3209_v54 = vmul.f32 %v6878_v31, %v3197_v25  ;;  %v7108_v25 = vld [vmem:[#allocation43_spill] sm:$0xff] }
0x1210   : > { %v3221_v27 = vadd.f32 0.37409195, %v3209_v54  ;;  %v3429_v30 = vpack.c.bf16 %v3420_v41, %v6852_v40 }
0x1212   : > { %v3233_v13 = vmul.f32 %v6878_v31, %v3221_v27  ;;  %4622 = vmatprep.mubr.bf16.mxu0 %v3429_v30 }
0x1213   : > { %4623 = vmatmul.mubr.bf16.vlgmr.msra.gmra.mrb[48].mxu0 %v3432_v61 }
0x1214   : > { %v3245_v51 = vadd.f32 1.0000237, %v3233_v13 }
0x1216   : > { %v3257_v59 = vmul.f32 %v6878_v31, %v3245_v51  ;;  %v5103_v45 = vpop.eup %5102 }
0x1217   : > { %v3340_v39 = vmul.f32 %v5103_v45, %v6812_v52 }
0x1218   : > { %v3269_v23 = vadd.f32 -1.2655122, %v3257_v59 }
0x1219   : > { %v3364_v37 = vsub.f32 1.0, %v3340_v39  ;;  %v4168_v40 = vadd.f32 -1.0, %v3340_v39 }
0x121a   : > { %v3305_v11 = vadd.f32 %v3293_v58, %v3269_v23 }
0x121b   : > { %v3388_v22 = vsel %vm3352_vm0, %v3364_v37, %v4168_v40 }
0x121c   : > { %v3327_v4 = vmul.f32 1.442695, %v3305_v11  ;;  %v3400_v61 = vadd.f32 1.0, %v3388_v22 }
0x121e   : > { %5104 = vpow2.f32 %v3327_v4  ;;  %v3412_v43 = vmul.f32 %v3400_v61, %v2992_v50 }
0x1220   : > { %v3424_v8 = vmul.f32 %v3412_v43, %v7103_v49 }
0x1222   : > { %v3430_v17 = vpack.c.bf16 %v3424_v8, %v6860_v6 }
0x1228   : > { %v5105_v52 = vpop.eup %5104 }
0x1229   : > { %v3341_v1 = vmul.f32 %v5105_v52, %v6878_v31 }
0x122b   : > { %v3365_v44 = vsub.f32 1.0, %v3341_v1  ;;  %v4169_v47 = vadd.f32 -1.0, %v3341_v1 }
0x122d   : > { %v3389_v56 = vsel %vm3353_vm1, %v3365_v44, %v4169_v47 }
0x122e   : > { %v3401_v36 = vadd.f32 1.0, %v3389_v56  ;;  %v4196_v56 = vld [vmem:[#allocation19] ss:$0 sm:$0xff] (!%p4195_p13) }
0x1230   : > { %v3413_v55 = vmul.f32 %v3401_v36, %v2993_v16 }
0x1232   : > { %v3425_v9 = vmul.f32 %v3413_v55, %v7104_v19 }
0x1234   : > { %v3431_v18 = vpack.c.bf16 %v3425_v9, %v3422_v3 }
0x1236   : > { %3665 = vmatprep.mubr.bf16.mxu1 %v3431_v18 }
0x1237   : > { %3666 = vmatmul.mubr.bf16.gmra.mrb[68].mxu1 %v3430_v17 }
0x12bf   : > { %v4332_v32 = vpop.f32.mrb[64].mxu1 }
0x12c0   : > { %v4333_v2 = vpop.f32.mrb[65].mxu1 }
0x12c1   : > { %v4334_v6 = vadd.f32 %v4333_v2, %v4332_v32  ;;  %v4335_v15 = vpop.f32.mrb[66].mxu1 }
0x12c2   : > { %v4336_v60 = vpop.f32.mrb[67].mxu1 }
0x12c3   : > { %v4337_v31 = vadd.f32 %v4336_v60, %v4335_v15 }
0x12e6   : > { %v4624_v28 = vpop.f32.mrb[48].mxu0 }
0x12e7   : > { %v3708_v7 = vpop.f32.mrb[49].mxu0 }
0x12e8   : > { %v3709_v57 = vadd.f32 %v4334_v6, %v3708_v7  ;;  %v4625_v10 = vpop.f32.mrb[50].mxu0 }
0x12e9   : > { %v3711_v14 = vpop.f32.mrb[51].mxu0 }
0x12ea   : > { %v3723_v5 = vadd.f32 %v3709_v57, %v7105_v34  ;;  %v3712_v46 = vadd.f32 %v4337_v31, %v3711_v14 }
0x12ec   : > { %3727 = vst [vmem:[#allocation2] sm:$0xff] %v3723_v5  ;;  %v3724_v0 = vadd.f32 %v3712_v46, %v7106_v35  ;;  %3736 = vadd.xlane.f32.xlu0 (!%p4195_p13), %v3723_v5 }
0x12ee   : > { %3728 = vst [vmem:[#allocation2 + $0x8] sm:$0xff] %v3724_v0 }
0x12f0   : > { %3738 = vadd.xlane.f32.xlu0 (!%p4195_p13), %v3724_v0 }
0x130a   : > { %v4338_v26 = vpop.f32.mrb[68].mxu1 }
0x130b   : > { %v4339_v29 = vpop.f32.mrb[69].mxu1 }
0x130c   : > { %v4340_v33 = vadd.f32 %v4339_v29, %v4338_v26  ;;  %v4341_v21 = vpop.f32.mrb[70].mxu1 }
0x130d   : > { %v4342_v63 = vpop.f32.mrb[71].mxu1 }
0x130e   : > { %v3717_v24 = vadd.f32 %v4624_v28, %v4340_v33  ;;  %v4343_v12 = vadd.f32 %v4342_v63, %v4341_v21  ;;  %3734 = sbr.rel (%p4195_p13) target bundleno = 5196 (0x144c), region = 108 }
0x1310   : > { %v3725_v3 = vadd.f32 %v3717_v24, %v7107_v38  ;;  %v3720_v20 = vadd.f32 %v4625_v10, %v4343_v12 }
0x1312   : > { %3729 = vst [vmem:[#allocation2 + $0x10] sm:$0xff] %v3725_v3  ;;  %v3726_v62 = vadd.f32 %v3720_v20, %v7108_v25  ;;  %3740 = vadd.xlane.f32.xlu1 (!%p4195_p13), %v3725_v3 }
0x1314   : > { %3730 = vst [vmem:[#allocation2 + $0x18] sm:$0xff] %v3726_v62 }
0x1316   : > { %3742 = vadd.xlane.f32.xlu1 %v3726_v62 }
0x1379   : > { %v3737_v41 = vpop.xlane.xlu0 %3736 }
0x137a   : > { %v3744_v27 = vmul.f32 0.0078125, %v3737_v41 }
0x137c   : > { %v3748_v13 = vsub.f32 %v3723_v5, %v3744_v27 }
0x137d   : > { %v3739_v48 = vpop.xlane.xlu0 %3738 }
0x137e   : > { %v3745_v45 = vmul.f32 0.0078125, %v3739_v48  ;;  %v3752_v39 = vmul.f32 %v3748_v13, %v3748_v13 }
0x1380   : > { %v3749_v58 = vsub.f32 %v3724_v0, %v3745_v45  ;;  %3756 = vadd.xlane.f32.xlu0 %v3752_v39 }
0x1382   : > { %v3753_v11 = vmul.f32 %v3749_v58, %v3749_v58 }
0x1384   : > { %3758 = vadd.xlane.f32.xlu1 %v3753_v11 }
0x139f   : > { %v3741_v54 = vpop.xlane.xlu1 %3740 }
0x13a0   : > { %v3746_v30 = vmul.f32 0.0078125, %v3741_v54 }
0x13a2   : > { %v3750_v51 = vsub.f32 %v3725_v3, %v3746_v30 }
0x13a3   : > { %v3743_v59 = vpop.xlane.xlu1 %3742 }
0x13a4   : > { %v3747_v23 = vmul.f32 0.0078125, %v3743_v59  ;;  %v3754_v40 = vmul.f32 %v3750_v51, %v3750_v51 }
0x13a6   : > { %v3751_v37 = vsub.f32 %v3726_v62, %v3747_v23  ;;  %3760 = vadd.xlane.f32.xlu0 %v3754_v40 }
0x13a8   : > { %v3755_v42 = vmul.f32 %v3751_v37, %v3751_v37 }
0x13aa   : > { %3762 = vadd.xlane.f32.xlu1 %v3755_v42 }
0x140d   : > { %v3757_v22 = vpop.xlane.xlu0 %3756 }
0x140e   : > { %v3764_v4 = vmul.f32 0.0078125, %v3757_v22 }
0x1410   : > { %v3768_v53 = vadd.f32 1e-05, %v3764_v4 }
0x1411   : > { %v3759_v50 = vpop.xlane.xlu1 %3758 }
0x1412   : > { %5111 = vrsqrt.f32 %v3768_v53  ;;  %v3765_v43 = vmul.f32 0.0078125, %v3759_v50 }
0x1414   : > { %v3769_v8 = vadd.f32 1e-05, %v3765_v43 }
0x1416   : > { %5113 = vrsqrt.f32 %v3769_v8 }
0x141c   : > { %v5112_v47 = vpop.eup %5111 }
0x141d   : > { %v3776_v16 = vmul.f32 %v5112_v47, %v3748_v13 }
0x141f   : > { %v3786_v36 = vmul.f32 %v4196_v56, %v3776_v16 }
0x1420   : > { %v5114_v55 = vpop.eup %5113 }
0x1421   : > { %3794 = vst [vmem:[#allocation21] sm:$0xff] %v3786_v36  ;;  %v3777_v9 = vmul.f32 %v5114_v55, %v3749_v58 }
0x1423   : > { %v3787_v32 = vmul.f32 %v4196_v56, %v3777_v9 }
0x1425   : > { %3795 = vst [vmem:[#allocation21 + $0x8] sm:$0xff] %v3787_v32 }
0x1433   : > { %v3761_v61 = vpop.xlane.xlu0 %3760 }
0x1434   : > { %v3766_v49 = vmul.f32 0.0078125, %v3761_v61 }
0x1436   : > { %v3770_v17 = vadd.f32 1e-05, %v3766_v49 }
0x1437   : > { %v3763_v52 = vpop.xlane.xlu1 %3762 }
0x1438   : > { %v3767_v1 = vmul.f32 0.0078125, %v3763_v52  ;;  %5115 = vrsqrt.f32 %v3770_v17 }
0x143a   : > { %v3771_v44 = vadd.f32 1e-05, %v3767_v1 }
0x143c   : > { %5117 = vrsqrt.f32 %v3771_v44 }
0x1442   : > { %v5116_v19 = vpop.eup %5115 }
0x1443   : > { %v3778_v18 = vmul.f32 %v5116_v19, %v3750_v51 }
0x1445   : > { %v3788_v6 = vmul.f32 %v4196_v56, %v3778_v18 }
0x1446   : > { %v5118_v2 = vpop.eup %5117 }
0x1447   : > { %v3779_v15 = vmul.f32 %v5118_v2, %v3751_v37  ;;  %3796 = vst [vmem:[#allocation21 + $0x10] sm:$0xff] %v3788_v6 }
0x1449   : > { %v3789_v60 = vmul.f32 %v4196_v56, %v3779_v15 }
0x144b   : > { %3797 = vst [vmem:[#allocation21 + $0x18] sm:$0xff] %v3789_v60 }
0x144c PF: > { %s7110_s7 = sld [smem:[#allocation34_spill]]  ;;  %s5541_s25 = smov [#allocation21]  }
0x144d   : > { %s3808_s1 = sshll.u32 %s5541_s25, 4  ;;  %s3809_s1 = int_to_ptr.vmem [resolvable:$true] %s3808_s1 }
0x144e   : > { %s5413_s28 = scalar_lea.vmem %s3809_s1, 512  ;;  %p5420_p2 = scmp.lt.s32.totalorder %s3809_s1, %s3809_s1 }
0x144f   : > { %p5414_p0 = scmp.ne.s32.totalorder %s3809_s1, %s5413_s28  ;;  %p5421_p10 = scmp.lt.s32.totalorder %s5413_s28, %s5413_s28 }
0x1451   : > { %p5422_p7 = por %p5421_p10, %p5420_p2 }
0x1452   : > { %p4766_p8 = scmp.eq.s32.totalorder %s7110_s7, 1 }
0x1454   : > { %p5415_p12 = pnand %p5414_p0, %p4766_p8 }
0x1456   : > { %p5416_p1 = pneg %p5415_p12 }
0x1458   : > { %p5423_p4 = pnand %p5422_p7, %p5416_p1 }
0x145a   : > { %5426 = shalt.err (!%p5423_p4)
}
0x145b   : > { %s7111_s13 = sld [smem:[#allocation63_spill]] }
0x1461   : > { %s7112_s11 = smov %s7111_s13  ;;  %s5427_s5 = scalar_lea.hbm %s7111_s13, 512 }
0x1462   : > { %p5428_p6 = scmp.ne.s32.totalorder %s7112_s11, %s5427_s5  ;;  %p5433_p3 = scmp.lt.u32.totalorder %s5427_s5, %s7112_s11 }
0x1464   : > { %p5429_p5 = pnand %p5428_p6, %p4766_p8 }
0x1466   : > { %p5430_p9 = pneg %p5429_p5 }
0x1468   : > { %p5435_p11 = pnand %p5433_p3, %p5430_p9 }
0x146a   : > { %5438 = shalt.err (!%p5435_p11)
}
0x146b   : > { %s5542_s19 = smov 128   ;;  %s5543_s24 = smov 8  }
0x146c   : > { %4724 = dma.vmem_to_hbm [thread:$0]  (%p4766_p8), %s3809_s1, 512, %s7112_s11, [#allocation6], %s5542_s19, %s5542_s19, %s5543_s24  }
0x146d   : > { %5492 = dma.done.wait (%p4766_p8), [#allocation6], 512  }
0x146e   : > { %5494 = vsyncadd (%p4766_p8), [#allocation6], 4294966784 }
0x146f PF: > { %s7113_s23 = sld [smem:[#allocation33_spill]]  ;;  %s7114_s13 = sld [smem:[#allocation30_spill]] }
0x1470   : > { %s7115_s14 = sld [smem:[#allocation31_spill]]  ;;  %s7116_s15 = sld [smem:[#allocation38_spill]] }
0x1471   : > { %s7117_s8 = sld [smem:[#allocation37_spill]]  ;;  %s7118_s16 = smov %s5513_s17 }
0x1475   : > { %s35_s18 = sadd.s32 1, %s7113_s23  }
0x1476   : > { %p32_p13 = scmp.ge.s32.totalorder %s35_s18, 4  }
0x1477   : > { %s7119_s17 = smov %s7117_s8 }
0x1478   :  { %34 = sbr.rel (!%p32_p13) target bundleno = 20 (0x14), region = 192 }
0x147f   :  { %3824 = vsyncpa [#allocation5], 1 }
0x1480   :  { %3826 = vsyncpa [#allocation5 + $0x1], 1 }
0x1481   :  { %3827 = vsyncpa [#allocation8], 1 }
0x1482   :  { %3829 = vsyncpa [#allocation8 + $0x1], 1 }
0x1483   :  { %3830 = vsyncpa [#allocation11], 1 }
0x1484   :  { %3832 = vsyncpa [#allocation11 + $0x1], 1 }
0x1485   :  { %3833 = vsyncpa [#allocation14], 1 }
0x1486   :  { %3835 = vsyncpa [#allocation14 + $0x1], 1 }
0x1487   :  { %3836 = vsyncpa [#allocation17], 1 }
0x1488   :  { %3838 = vsyncpa [#allocation17 + $0x1], 1 }
0x1489   :  { %3839 = vsyncpa [#allocation20], 1 }
0x148a   :  { %3840 = vsyncpa [#allocation6], 1 }
0x148b   :  { %3842 = vsyncpa [#allocation6 + $0x1], 1 }

</bundles_post_ra>
